<compile_context>
chip_gen: v6e
topology: v6e:2x2x1
jax: 0.10.0
libtpu: 0.0.40
codegen_flags: <defaults>
</compile_context>

<pallas_src>
import functools
import math

import jax
import jax.numpy as jnp
from jax.experimental import pallas as pl
from jax.experimental.pallas import tpu as pltpu

# ----------------------------- model config (scaled-down 'full') -------------
SR = 16000
HOP = 160                  # self.window in the torch module
WINDOW = 512               # frame length (original: 1024)
PITCH_BINS = 360
CENTS_PER_BIN = 20.0
CENTS_OFFSET = 1997.3794084376191

IN_CH = [1, 32, 16, 16, 16, 32]
OUT_CH = [32, 16, 16, 16, 32, 64]
KERNELS = [64, 16, 16, 16, 16, 16]
STRIDES = [4, 1, 1, 1, 1, 1]
PADS = [(30, 30)] + 5 * [(7, 8)]     # analog of (254,254) and (31,32)
IN_FEATURES = 128                    # 64 channels * 2 positions
BN_EPS = 1e-5

L1_OUT = 128                         # layer-1 conv output length (pre-pool)


def _freq_to_bins(freq, quantize):
    cents = 1200.0 * math.log2(freq / 10.0)
    return int(quantize((cents - CENTS_OFFSET) / CENTS_PER_BIN))


MINIDX = _freq_to_bins(50.0, math.floor)      # 39
MAXIDX = _freq_to_bins(1100.0, math.ceil)     # 308


# ----------------------------- fused Pallas kernel ----------------------------
def _crepe_kernel(patches_ref, w1_ref, w2_ref, w3_ref, w4_ref, w5_ref, w6_ref,
                  wc_ref, bc_ref, b_ref, s_ref, h_ref,
                  out_ref,
                  p2_ref, p3_ref, p4_ref, p5_ref, p6_ref,
                  *, minidx, maxidx):
    f32 = jnp.float32
    bf16 = jnp.bfloat16

    def affine(acc, li, o_ch):
        # conv bias -> ReLU -> BatchNorm(eval) affine; acc: (L, O) f32
        b = b_ref[li:li + 1, 0:o_ch]
        s = s_ref[li:li + 1, 0:o_ch]
        h = h_ref[li:li + 1, 0:o_ch]
        return jnp.maximum(acc + b, 0.0) * s + h

    def maxpool2(y):
        # max over adjacent row pairs via exact 0/1 selection matmuls
        rows = y.shape[0]
        r = jax.lax.broadcasted_iota(jnp.int32, (rows // 2, rows), 0)
        c = jax.lax.broadcasted_iota(jnp.int32, (rows // 2, rows), 1)
        even = jnp.dot((c == 2 * r).astype(f32), y, preferred_element_type=f32)
        odd = jnp.dot((c == 2 * r + 1).astype(f32), y, preferred_element_type=f32)
        return jnp.maximum(even, odd)

    def stage(pad_ref, a_prev, w_ref, li, l_in, o_ch):
        # stride-1 16-tap conv against a zero-padded VMEM buffer.
        # Buffer rows [8, 8+l_in) hold the input; with pads (7, 8) the tap-k
        # window over all output positions is buffer rows [k+1, k+1+l_in).
        pad_ref[...] = jnp.zeros_like(pad_ref)
        pad_ref[8:8 + l_in, :] = a_prev
        acc = jnp.zeros((l_in, o_ch), f32)
        for k in range(16):
            xk = pad_ref[k + 1:k + 1 + l_in, :].astype(bf16)
            acc = acc + jnp.dot(xk, w_ref[k], preferred_element_type=f32)
        return maxpool2(affine(acc, li, o_ch))

    # ---- layer 1: stride-4 conv via pre-built im2col patches -----------------
    p1 = patches_ref[0]                                         # (128, 64) bf16
    acc1 = jnp.dot(p1, w1_ref[...], preferred_element_type=f32)  # (128, 32)
    a = maxpool2(affine(acc1, 0, 32))                           # (64, 32)

    # ---- layers 2..6: stride-1 convs, activations stay in VMEM ---------------
    a = stage(p2_ref, a, w2_ref, 1, 64, 16)                     # (32, 16)
    a = stage(p3_ref, a, w3_ref, 2, 32, 16)                     # (16, 16)
    a = stage(p4_ref, a, w4_ref, 3, 16, 16)                     # (8, 16)
    a = stage(p5_ref, a, w5_ref, 4, 8, 32)                      # (4, 32)
    a = stage(p6_ref, a, w6_ref, 5, 4, 64)                      # (2, 64)

    # ---- classifier (Linear 128 -> 360) + sigmoid -----------------------------
    # feature order is (position, channel): row 0 of `a`, then row 1.
    e = jax.lax.broadcasted_iota(jnp.int32, (1, 2), 1)
    pos0 = jnp.dot((e == 0).astype(f32), a, preferred_element_type=f32)   # (1,64)
    pos1 = jnp.dot((e == 1).astype(f32), a, preferred_element_type=f32)   # (1,64)
    logits = (jnp.dot(pos0.astype(bf16), wc_ref[0:64, :],
                      preferred_element_type=f32)
              + jnp.dot(pos1.astype(bf16), wc_ref[64:128, :],
                        preferred_element_type=f32)
              + bc_ref[...])                                    # (1, 360)
    probs = jax.nn.sigmoid(logits)

    # ---- decode: masked argmax over pitch bins + periodicity -----------------
    bins_i = jax.lax.broadcasted_iota(jnp.int32, probs.shape, 1)
    valid = (bins_i >= minidx) & (bins_i < maxidx)
    masked = jnp.where(valid, probs, jnp.float32(-jnp.inf))
    pd = jnp.max(masked, axis=-1, keepdims=True)                # (1, 1)
    best = jnp.min(jnp.where(masked == pd, bins_i, jnp.int32(2 ** 30)),
                   axis=-1, keepdims=True).astype(f32)
    cents = CENTS_PER_BIN * best + CENTS_OFFSET
    f0 = 10.0 * jnp.exp(cents * (math.log(2.0) / 1200.0))       # 10 * 2^(c/1200)

    lane = jax.lax.broadcasted_iota(jnp.int32, (1, 128), 1)
    out_ref[0] = jnp.where(lane == 0, f0, jnp.where(lane == 1, pd, 0.0))


def crepe_fused(patches1, kp):
    """One pallas_call for the whole network; grid over frames."""
    T = patches1.shape[0]
    kernel = functools.partial(_crepe_kernel, minidx=MINIDX, maxidx=MAXIDX)
    out = pl.pallas_call(
        kernel,
        out_shape=jax.ShapeDtypeStruct((T, 1, 128), jnp.float32),
        grid=(T,),
        in_specs=[
            pl.BlockSpec((1, L1_OUT, 64), lambda t: (t, 0, 0)),        # patches
            pl.BlockSpec((64, 32), lambda t: (0, 0)),                  # w1
            pl.BlockSpec((16, 32, 16), lambda t: (0, 0, 0)),           # w2
            pl.BlockSpec((16, 16, 16), lambda t: (0, 0, 0)),           # w3
            pl.BlockSpec((16, 16, 16), lambda t: (0, 0, 0)),           # w4
            pl.BlockSpec((16, 16, 32), lambda t: (0, 0, 0)),           # w5
            pl.BlockSpec((16, 32, 64), lambda t: (0, 0, 0)),           # w6
            pl.BlockSpec((IN_FEATURES, PITCH_BINS), lambda t: (0, 0)),  # wc
            pl.BlockSpec((1, PITCH_BINS), lambda t: (0, 0)),           # bc
            pl.BlockSpec((6, 64), lambda t: (0, 0)),                   # conv bias
            pl.BlockSpec((6, 64), lambda t: (0, 0)),                   # bn scale
            pl.BlockSpec((6, 64), lambda t: (0, 0)),                   # bn shift
        ],
        out_specs=pl.BlockSpec((1, 1, 128), lambda t: (t, 0, 0)),
        scratch_shapes=[
            pltpu.VMEM((80, 32), jnp.float32),   # layer-2 padded input
            pltpu.VMEM((48, 16), jnp.float32),   # layer-3
            pltpu.VMEM((32, 16), jnp.float32),   # layer-4
            pltpu.VMEM((24, 16), jnp.float32),   # layer-5
            pltpu.VMEM((20, 32), jnp.float32),   # layer-6
        ],
        compiler_params=pltpu.CompilerParams(
            dimension_semantics=("parallel",)),
    )(patches1,
      kp["w1"], kp["w2"], kp["w3"], kp["w4"], kp["w5"], kp["w6"],
      kp["wc"], kp["bc"], kp["bias"], kp["scale"], kp["shift"])
    return out.reshape(T, 128)


# ----------------------------- JAX glue ---------------------------------------
def preprocess(audio):
    """torchcrepe.preprocess: pad, frame (hop=160, window=512), normalize."""
    n = audio.shape[1]
    total_frames = 1 + n // HOP
    audio_p = jnp.pad(audio, ((0, 0), (WINDOW // 2, WINDOW // 2)))
    starts = jnp.arange(total_frames) * HOP
    idx = starts[:, None] + jnp.arange(WINDOW)[None, :]
    frames = audio_p[0][idx]                                 # (T, WINDOW)
    frames = frames - frames.mean(axis=1, keepdims=True)
    std = frames.std(axis=1, keepdims=True, ddof=1)
    frames = frames / jnp.maximum(1e-10, std)
    return frames


def layer1_patches(frames):
    """Stride-4 im2col for layer 1 via strided slices (no gather).

    patches[t, l, k] = pad(frames, 30)[t, 4*l + k], l in [0,128), k in [0,64).
    """
    fp = jnp.pad(frames, ((0, 0), (30, 30)))                  # (T, 572)
    limit = 4 * (L1_OUT - 1) + 1
    cols = [jax.lax.slice_in_dim(fp, k, k + limit, stride=4, axis=1)
            for k in range(KERNELS[0])]                        # each (T, 128)
    return jnp.stack(cols, axis=-1)                            # (T, 128, 64)


def median_filter3(x):
    """torchcrepe.filter.median(win=3): truncated windows, lower median."""
    T = x.shape[0]
    xp = jnp.concatenate([jnp.full((1,), jnp.inf, x.dtype), x,
                          jnp.full((1,), jnp.inf, x.dtype)])
    w = jnp.stack([xp[0:T], xp[1:T + 1], xp[2:T + 2]], axis=1)   # (T, 3)
    ws = jnp.sort(w, axis=1)
    counts = jnp.sum(jnp.isfinite(w), axis=1)
    pick = (counts - 1) // 2
    return jnp.take_along_axis(ws, pick[:, None], axis=1)[:, 0]


def mean_filter3(x):
    """torchcrepe.filter.mean(win=3): truncated-window moving average."""
    T = x.shape[0]
    xp = jnp.pad(x, (1, 1))
    s = xp[0:T] + xp[1:T + 1] + xp[2:T + 2]
    i = jnp.arange(T)
    counts = 3.0 - (i == 0).astype(jnp.float32) - (i == T - 1).astype(jnp.float32)
    return s / counts


def crepe_test_forward(x, kparams):
    """Equivalent of TorchCrepeTest.forward; x: (n_samples,) f32 -> f0 (1, T)."""
    audio = x[None].astype(jnp.float32)                       # (1, N)
    frames = preprocess(audio)                                # (T, WINDOW)
    patches1 = layer1_patches(frames).astype(jnp.bfloat16)    # (T, 128, 64)

    dec = crepe_fused(patches1, kparams)                      # (T, 128)
    f0 = dec[:, 0]
    pd = dec[:, 1]

    pd = median_filter3(pd)
    f0 = mean_filter3(f0)
    f0 = jnp.where(pd < 0.1, 0.0, f0)
    return f0[None, :]                                        # (1, T)


# ----------------------------- deterministic parameters ----------------------
def init_params(key):
    params = {}
    keys = jax.random.split(key, 3 * 6 + 2)
    ki = 0
    for li in range(6):
        c_in, c_out, k = IN_CH[li], OUT_CH[li], KERNELS[li]
        fan_in = c_in * k
        w = jax.random.normal(keys[ki], (c_out, c_in, k), jnp.float32) / math.sqrt(fan_in)
        b = 0.01 * jax.random.normal(keys[ki + 1], (c_out,), jnp.float32)
        bn = jax.random.normal(keys[ki + 2], (4, c_out), jnp.float32)
        gamma = 1.0 + 0.1 * bn[0]
        beta = 0.1 * bn[1]
        running_mean = 0.1 * bn[2]
        running_var = 1.0 + 0.05 * jnp.abs(bn[3])
        scale = gamma / jnp.sqrt(running_var + BN_EPS)
        shift = beta - running_mean * scale
        params[f"conv{li + 1}"] = (w, b, scale, shift)
        ki += 3
    wc = jax.random.normal(keys[ki], (IN_FEATURES, PITCH_BINS), jnp.float32) / math.sqrt(IN_FEATURES)
    bc = 0.01 * jax.random.normal(keys[ki + 1], (PITCH_BINS,), jnp.float32)
    params["classifier"] = (wc, bc)
    return params


def pack_params(params):
    """Re-layout parameters for the fused kernel (bf16 matmul operands)."""
    kp = {}
    w1 = params["conv1"][0]                                               # (32,1,64)
    kp["w1"] = w1.reshape(OUT_CH[0], KERNELS[0]).T.astype(jnp.bfloat16)   # (64,32)
    for li in range(1, 6):
        w = params[f"conv{li + 1}"][0]                                    # (O,C,K)
        kp[f"w{li + 1}"] = jnp.transpose(w, (2, 1, 0)).astype(jnp.bfloat16)  # (K,C,O)

    def pad_rows(vecs):
        return jnp.stack([jnp.pad(v, (0, 64 - v.shape[0])) for v in vecs]
                         ).astype(jnp.float32)                            # (6,64)

    kp["bias"] = pad_rows([params[f"conv{l + 1}"][1] for l in range(6)])
    kp["scale"] = pad_rows([params[f"conv{l + 1}"][2] for l in range(6)])
    kp["shift"] = pad_rows([params[f"conv{l + 1}"][3] for l in range(6)])

    wc, bc = params["classifier"]
    kp["wc"] = wc.astype(jnp.bfloat16)                                    # (128,360)
    kp["bc"] = bc.astype(jnp.float32)[None, :]                            # (1,360)
    return kp


# ----------------------------- main -------------------------------------------
if __name__ == "__main__":
    key = jax.random.PRNGKey(0)
    k_audio, k_params = jax.random.split(key)

    n_samples = 1600                                  # -> 11 frames at hop=160
    x = 0.1 * jax.random.normal(k_audio, (n_samples,), jnp.float32)
    params = init_params(k_params)
    kparams = pack_params(params)

    fwd = jax.jit(crepe_test_forward)
    f0 = fwd(x, kparams)
    jax.block_until_ready(f0)

    assert f0.shape == (1, 1 + n_samples // HOP)
    assert bool(jnp.all(jnp.isfinite(f0)))
    print("KERNEL_OK")
</pallas_src>

<mosaic_0001>
module attributes {stable_mosaic.version = 11 : i64} {
  func.func @_crepe_kernel(%arg0: i32, %arg1: memref<1x128x64xbf16, #tpu.memory_space<vmem>>, %arg2: memref<64x32xbf16, #tpu.memory_space<vmem>>, %arg3: memref<16x32x16xbf16, #tpu.memory_space<vmem>>, %arg4: memref<16x16x16xbf16, #tpu.memory_space<vmem>>, %arg5: memref<16x16x16xbf16, #tpu.memory_space<vmem>>, %arg6: memref<16x16x32xbf16, #tpu.memory_space<vmem>>, %arg7: memref<16x32x64xbf16, #tpu.memory_space<vmem>>, %arg8: memref<128x360xbf16, #tpu.memory_space<vmem>>, %arg9: memref<1x360xf32, #tpu.memory_space<vmem>>, %arg10: memref<6x64xf32, #tpu.memory_space<vmem>>, %arg11: memref<6x64xf32, #tpu.memory_space<vmem>>, %arg12: memref<6x64xf32, #tpu.memory_space<vmem>>, %arg13: memref<1x1x128xf32, #tpu.memory_space<vmem>>, %arg14: memref<80x32xf32, #tpu.memory_space<vmem>>, %arg15: memref<48x16xf32, #tpu.memory_space<vmem>>, %arg16: memref<32x16xf32, #tpu.memory_space<vmem>>, %arg17: memref<24x16xf32, #tpu.memory_space<vmem>>, %arg18: memref<20x32xf32, #tpu.memory_space<vmem>>) attributes {dimension_semantics = [#tpu.dimension_semantics<parallel>], iteration_bounds = array<i64: 11>, scalar_prefetch = 0 : i64, scratch_operands = 5 : i64, tpu.core_type = #tpu.core_type<tc>, window_params = [{transform_indices = @transform_0, window_bounds = array<i64: 1, 128, 64>}, {pipeline_mode = #tpu.pipeline_mode<synchronous>, transform_indices = @transform_1, window_bounds = array<i64: 64, 32>}, {pipeline_mode = #tpu.pipeline_mode<synchronous>, transform_indices = @transform_2, window_bounds = array<i64: 16, 32, 16>}, {pipeline_mode = #tpu.pipeline_mode<synchronous>, transform_indices = @transform_3, window_bounds = array<i64: 16, 16, 16>}, {pipeline_mode = #tpu.pipeline_mode<synchronous>, transform_indices = @transform_4, window_bounds = array<i64: 16, 16, 16>}, {pipeline_mode = #tpu.pipeline_mode<synchronous>, transform_indices = @transform_5, window_bounds = array<i64: 16, 16, 32>}, {pipeline_mode = #tpu.pipeline_mode<synchronous>, transform_indices = @transform_6, window_bounds = array<i64: 16, 32, 64>}, {pipeline_mode = #tpu.pipeline_mode<synchronous>, transform_indices = @transform_7, window_bounds = array<i64: 128, 360>}, {pipeline_mode = #tpu.pipeline_mode<synchronous>, transform_indices = @transform_8, window_bounds = array<i64: 1, 360>}, {pipeline_mode = #tpu.pipeline_mode<synchronous>, transform_indices = @transform_9, window_bounds = array<i64: 6, 64>}, {pipeline_mode = #tpu.pipeline_mode<synchronous>, transform_indices = @transform_10, window_bounds = array<i64: 6, 64>}, {pipeline_mode = #tpu.pipeline_mode<synchronous>, transform_indices = @transform_11, window_bounds = array<i64: 6, 64>}, {transform_indices = @transform_12, window_bounds = array<i64: 1, 1, 128>}]} {
    %c0 = arith.constant 0 : index
    %c0_0 = arith.constant 0 : index
    %c0_1 = arith.constant 0 : index
    %0 = vector.load %arg1[%c0, %c0_0, %c0_1] : memref<1x128x64xbf16, #tpu.memory_space<vmem>>, vector<1x128x64xbf16>
    %1 = vector.shape_cast %0 : vector<1x128x64xbf16> to vector<128x64xbf16>
    %c0_2 = arith.constant 0 : index
    %c0_3 = arith.constant 0 : index
    %2 = vector.load %arg2[%c0_2, %c0_3] : memref<64x32xbf16, #tpu.memory_space<vmem>>, vector<64x32xbf16>
    %cst = arith.constant dense<0.000000e+00> : vector<128x32xf32>
    %3 = tpu.matmul %1, %2, %cst {dimension_numbers = #tpu.dot_dimension_numbers<[1], [0], [0], [1], [0, 0, 1, 1], [], []>} : vector<128x64xbf16>, vector<64x32xbf16>, vector<128x32xf32> -> vector<128x32xf32>
    %c0_4 = arith.constant 0 : index
    %c0_5 = arith.constant 0 : index
    %4 = vector.load %arg10[%c0_4, %c0_5] : memref<6x64xf32, #tpu.memory_space<vmem>>, vector<1x32xf32>
    %c0_6 = arith.constant 0 : index
    %c0_7 = arith.constant 0 : index
    %5 = vector.load %arg11[%c0_6, %c0_7] : memref<6x64xf32, #tpu.memory_space<vmem>>, vector<1x32xf32>
    %c0_8 = arith.constant 0 : index
    %c0_9 = arith.constant 0 : index
    %6 = vector.load %arg12[%c0_8, %c0_9] : memref<6x64xf32, #tpu.memory_space<vmem>>, vector<1x32xf32>
    %7 = vector.broadcast %4 : vector<1x32xf32> to vector<128x32xf32>
    %8 = arith.addf %3, %7 : vector<128x32xf32>
    %cst_10 = arith.constant 0.000000e+00 : f32
    %9 = vector.broadcast %cst_10 : f32 to vector<128x32xf32>
    %10 = arith.maximumf %8, %9 : vector<128x32xf32>
    %11 = vector.broadcast %5 : vector<1x32xf32> to vector<128x32xf32>
    %12 = arith.mulf %10, %11 : vector<128x32xf32>
    %13 = vector.broadcast %6 : vector<1x32xf32> to vector<128x32xf32>
    %14 = arith.addf %12, %13 : vector<128x32xf32>
    %15 = tpu.iota {dimensions = array<i32: 0>} : vector<64x128xi32>
    %16 = tpu.iota {dimensions = array<i32: 1>} : vector<64x128xi32>
    %c2_i32 = arith.constant 2 : i32
    %17 = vector.broadcast %c2_i32 : i32 to vector<64x128xi32>
    %18 = arith.muli %17, %15 : vector<64x128xi32>
    %19 = arith.cmpi eq, %16, %18 : vector<64x128xi32>
    %20 = arith.extui %19 : vector<64x128xi1> to vector<64x128xi32>
    %21 = arith.sitofp %20 : vector<64x128xi32> to vector<64x128xf32>
    %cst_11 = arith.constant dense<0.000000e+00> : vector<64x32xf32>
    %22 = tpu.matmul %21, %14, %cst_11 {dimension_numbers = #tpu.dot_dimension_numbers<[1], [0], [0], [1], [0, 0, 1, 1], [], []>} : vector<64x128xf32>, vector<128x32xf32>, vector<64x32xf32> -> vector<64x32xf32>
    %c2_i32_12 = arith.constant 2 : i32
    %23 = vector.broadcast %c2_i32_12 : i32 to vector<64x128xi32>
    %24 = arith.muli %23, %15 : vector<64x128xi32>
    %c1_i32 = arith.constant 1 : i32
    %25 = vector.broadcast %c1_i32 : i32 to vector<64x128xi32>
    %26 = arith.addi %24, %25 : vector<64x128xi32>
    %27 = arith.cmpi eq, %16, %26 : vector<64x128xi32>
    %28 = arith.extui %27 : vector<64x128xi1> to vector<64x128xi32>
    %29 = arith.sitofp %28 : vector<64x128xi32> to vector<64x128xf32>
    %cst_13 = arith.constant dense<0.000000e+00> : vector<64x32xf32>
    %30 = tpu.matmul %29, %14, %cst_13 {dimension_numbers = #tpu.dot_dimension_numbers<[1], [0], [0], [1], [0, 0, 1, 1], [], []>} : vector<64x128xf32>, vector<128x32xf32>, vector<64x32xf32> -> vector<64x32xf32>
    %31 = arith.maximumf %22, %30 : vector<64x32xf32>
    %cst_14 = arith.constant 0.000000e+00 : f32
    %32 = vector.broadcast %cst_14 : f32 to vector<80x32xf32>
    %c0_15 = arith.constant 0 : index
    %c0_16 = arith.constant 0 : index
    %33 = vector.load %arg14[%c0_15, %c0_16] : memref<80x32xf32, #tpu.memory_space<vmem>>, vector<80x32xf32>
    tpu.vector_store %arg14[%c0_15, %c0_16], %32 {strides = array<i32>} : memref<80x32xf32, #tpu.memory_space<vmem>>, vector<80x32xf32>,
    %c8 = arith.constant 8 : index
    %c0_17 = arith.constant 0 : index
    %34 = vector.load %arg14[%c8, %c0_17] : memref<80x32xf32, #tpu.memory_space<vmem>>, vector<64x32xf32>
    tpu.vector_store %arg14[%c8, %c0_17], %31 {strides = array<i32>} : memref<80x32xf32, #tpu.memory_space<vmem>>, vector<64x32xf32>,
    %cst_18 = arith.constant 0.000000e+00 : f32
    %35 = vector.broadcast %cst_18 : f32 to vector<64x16xf32>
    %c1 = arith.constant 1 : index
    %c0_19 = arith.constant 0 : index
    %36 = vector.load %arg14[%c1, %c0_19] : memref<80x32xf32, #tpu.memory_space<vmem>>, vector<64x32xf32>
    %37 = arith.truncf %36 : vector<64x32xf32> to vector<64x32xbf16>
    %c0_20 = arith.constant 0 : index
    %c0_21 = arith.constant 0 : index
    %c0_22 = arith.constant 0 : index
    %38 = vector.load %arg3[%c0_20, %c0_21, %c0_22] : memref<16x32x16xbf16, #tpu.memory_space<vmem>>, vector<1x32x16xbf16>
    %39 = vector.shape_cast %38 : vector<1x32x16xbf16> to vector<32x16xbf16>
    %cst_23 = arith.constant dense<0.000000e+00> : vector<64x16xf32>
    %40 = tpu.matmul %37, %39, %cst_23 {dimension_numbers = #tpu.dot_dimension_numbers<[1], [0], [0], [1], [0, 0, 1, 1], [], []>} : vector<64x32xbf16>, vector<32x16xbf16>, vector<64x16xf32> -> vector<64x16xf32>
    %41 = arith.addf %35, %40 : vector<64x16xf32>
    %c2 = arith.constant 2 : index
    %c0_24 = arith.constant 0 : index
    %42 = vector.load %arg14[%c2, %c0_24] : memref<80x32xf32, #tpu.memory_space<vmem>>, vector<64x32xf32>
    %43 = arith.truncf %42 : vector<64x32xf32> to vector<64x32xbf16>
    %c1_25 = arith.constant 1 : index
    %c0_26 = arith.constant 0 : index
    %c0_27 = arith.constant 0 : index
    %44 = vector.load %arg3[%c1_25, %c0_26, %c0_27] : memref<16x32x16xbf16, #tpu.memory_space<vmem>>, vector<1x32x16xbf16>
    %45 = vector.shape_cast %44 : vector<1x32x16xbf16> to vector<32x16xbf16>
    %cst_28 = arith.constant dense<0.000000e+00> : vector<64x16xf32>
    %46 = tpu.matmul %43, %45, %cst_28 {dimension_numbers = #tpu.dot_dimension_numbers<[1], [0], [0], [1], [0, 0, 1, 1], [], []>} : vector<64x32xbf16>, vector<32x16xbf16>, vector<64x16xf32> -> vector<64x16xf32>
    %47 = arith.addf %41, %46 : vector<64x16xf32>
    %c3 = arith.constant 3 : index
    %c0_29 = arith.constant 0 : index
    %48 = vector.load %arg14[%c3, %c0_29] : memref<80x32xf32, #tpu.memory_space<vmem>>, vector<64x32xf32>
    %49 = arith.truncf %48 : vector<64x32xf32> to vector<64x32xbf16>
    %c2_30 = arith.constant 2 : index
    %c0_31 = arith.constant 0 : index
    %c0_32 = arith.constant 0 : index
    %50 = vector.load %arg3[%c2_30, %c0_31, %c0_32] : memref<16x32x16xbf16, #tpu.memory_space<vmem>>, vector<1x32x16xbf16>
    %51 = vector.shape_cast %50 : vector<1x32x16xbf16> to vector<32x16xbf16>
    %cst_33 = arith.constant dense<0.000000e+00> : vector<64x16xf32>
    %52 = tpu.matmul %49, %51, %cst_33 {dimension_numbers = #tpu.dot_dimension_numbers<[1], [0], [0], [1], [0, 0, 1, 1], [], []>} : vector<64x32xbf16>, vector<32x16xbf16>, vector<64x16xf32> -> vector<64x16xf32>
    %53 = arith.addf %47, %52 : vector<64x16xf32>
    %c4 = arith.constant 4 : index
    %c0_34 = arith.constant 0 : index
    %54 = vector.load %arg14[%c4, %c0_34] : memref<80x32xf32, #tpu.memory_space<vmem>>, vector<64x32xf32>
    %55 = arith.truncf %54 : vector<64x32xf32> to vector<64x32xbf16>
    %c3_35 = arith.constant 3 : index
    %c0_36 = arith.constant 0 : index
    %c0_37 = arith.constant 0 : index
    %56 = vector.load %arg3[%c3_35, %c0_36, %c0_37] : memref<16x32x16xbf16, #tpu.memory_space<vmem>>, vector<1x32x16xbf16>
    %57 = vector.shape_cast %56 : vector<1x32x16xbf16> to vector<32x16xbf16>
    %cst_38 = arith.constant dense<0.000000e+00> : vector<64x16xf32>
    %58 = tpu.matmul %55, %57, %cst_38 {dimension_numbers = #tpu.dot_dimension_numbers<[1], [0], [0], [1], [0, 0, 1, 1], [], []>} : vector<64x32xbf16>, vector<32x16xbf16>, vector<64x16xf32> -> vector<64x16xf32>
    %59 = arith.addf %53, %58 : vector<64x16xf32>
    %c5 = arith.constant 5 : index
    %c0_39 = arith.constant 0 : index
    %60 = vector.load %arg14[%c5, %c0_39] : memref<80x32xf32, #tpu.memory_space<vmem>>, vector<64x32xf32>
    %61 = arith.truncf %60 : vector<64x32xf32> to vector<64x32xbf16>
    %c4_40 = arith.constant 4 : index
    %c0_41 = arith.constant 0 : index
    %c0_42 = arith.constant 0 : index
    %62 = vector.load %arg3[%c4_40, %c0_41, %c0_42] : memref<16x32x16xbf16, #tpu.memory_space<vmem>>, vector<1x32x16xbf16>
    %63 = vector.shape_cast %62 : vector<1x32x16xbf16> to vector<32x16xbf16>
    %cst_43 = arith.constant dense<0.000000e+00> : vector<64x16xf32>
    %64 = tpu.matmul %61, %63, %cst_43 {dimension_numbers = #tpu.dot_dimension_numbers<[1], [0], [0], [1], [0, 0, 1, 1], [], []>} : vector<64x32xbf16>, vector<32x16xbf16>, vector<64x16xf32> -> vector<64x16xf32>
    %65 = arith.addf %59, %64 : vector<64x16xf32>
    %c6 = arith.constant 6 : index
    %c0_44 = arith.constant 0 : index
    %66 = vector.load %arg14[%c6, %c0_44] : memref<80x32xf32, #tpu.memory_space<vmem>>, vector<64x32xf32>
    %67 = arith.truncf %66 : vector<64x32xf32> to vector<64x32xbf16>
    %c5_45 = arith.constant 5 : index
    %c0_46 = arith.constant 0 : index
    %c0_47 = arith.constant 0 : index
    %68 = vector.load %arg3[%c5_45, %c0_46, %c0_47] : memref<16x32x16xbf16, #tpu.memory_space<vmem>>, vector<1x32x16xbf16>
    %69 = vector.shape_cast %68 : vector<1x32x16xbf16> to vector<32x16xbf16>
    %cst_48 = arith.constant dense<0.000000e+00> : vector<64x16xf32>
    %70 = tpu.matmul %67, %69, %cst_48 {dimension_numbers = #tpu.dot_dimension_numbers<[1], [0], [0], [1], [0, 0, 1, 1], [], []>} : vector<64x32xbf16>, vector<32x16xbf16>, vector<64x16xf32> -> vector<64x16xf32>
    %71 = arith.addf %65, %70 : vector<64x16xf32>
    %c7 = arith.constant 7 : index
    %c0_49 = arith.constant 0 : index
    %72 = vector.load %arg14[%c7, %c0_49] : memref<80x32xf32, #tpu.memory_space<vmem>>, vector<64x32xf32>
    %73 = arith.truncf %72 : vector<64x32xf32> to vector<64x32xbf16>
    %c6_50 = arith.constant 6 : index
    %c0_51 = arith.constant 0 : index
    %c0_52 = arith.constant 0 : index
    %74 = vector.load %arg3[%c6_50, %c0_51, %c0_52] : memref<16x32x16xbf16, #tpu.memory_space<vmem>>, vector<1x32x16xbf16>
    %75 = vector.shape_cast %74 : vector<1x32x16xbf16> to vector<32x16xbf16>
    %cst_53 = arith.constant dense<0.000000e+00> : vector<64x16xf32>
    %76 = tpu.matmul %73, %75, %cst_53 {dimension_numbers = #tpu.dot_dimension_numbers<[1], [0], [0], [1], [0, 0, 1, 1], [], []>} : vector<64x32xbf16>, vector<32x16xbf16>, vector<64x16xf32> -> vector<64x16xf32>
    %77 = arith.addf %71, %76 : vector<64x16xf32>
    %c8_54 = arith.constant 8 : index
    %c0_55 = arith.constant 0 : index
    %78 = vector.load %arg14[%c8_54, %c0_55] : memref<80x32xf32, #tpu.memory_space<vmem>>, vector<64x32xf32>
    %79 = arith.truncf %78 : vector<64x32xf32> to vector<64x32xbf16>
    %c7_56 = arith.constant 7 : index
    %c0_57 = arith.constant 0 : index
    %c0_58 = arith.constant 0 : index
    %80 = vector.load %arg3[%c7_56, %c0_57, %c0_58] : memref<16x32x16xbf16, #tpu.memory_space<vmem>>, vector<1x32x16xbf16>
    %81 = vector.shape_cast %80 : vector<1x32x16xbf16> to vector<32x16xbf16>
    %cst_59 = arith.constant dense<0.000000e+00> : vector<64x16xf32>
    %82 = tpu.matmul %79, %81, %cst_59 {dimension_numbers = #tpu.dot_dimension_numbers<[1], [0], [0], [1], [0, 0, 1, 1], [], []>} : vector<64x32xbf16>, vector<32x16xbf16>, vector<64x16xf32> -> vector<64x16xf32>
    %83 = arith.addf %77, %82 : vector<64x16xf32>
    %c9 = arith.constant 9 : index
    %c0_60 = arith.constant 0 : index
    %84 = vector.load %arg14[%c9, %c0_60] : memref<80x32xf32, #tpu.memory_space<vmem>>, vector<64x32xf32>
    %85 = arith.truncf %84 : vector<64x32xf32> to vector<64x32xbf16>
    %c8_61 = arith.constant 8 : index
    %c0_62 = arith.constant 0 : index
    %c0_63 = arith.constant 0 : index
    %86 = vector.load %arg3[%c8_61, %c0_62, %c0_63] : memref<16x32x16xbf16, #tpu.memory_space<vmem>>, vector<1x32x16xbf16>
    %87 = vector.shape_cast %86 : vector<1x32x16xbf16> to vector<32x16xbf16>
    %cst_64 = arith.constant dense<0.000000e+00> : vector<64x16xf32>
    %88 = tpu.matmul %85, %87, %cst_64 {dimension_numbers = #tpu.dot_dimension_numbers<[1], [0], [0], [1], [0, 0, 1, 1], [], []>} : vector<64x32xbf16>, vector<32x16xbf16>, vector<64x16xf32> -> vector<64x16xf32>
    %89 = arith.addf %83, %88 : vector<64x16xf32>
    %c10 = arith.constant 10 : index
    %c0_65 = arith.constant 0 : index
    %90 = vector.load %arg14[%c10, %c0_65] : memref<80x32xf32, #tpu.memory_space<vmem>>, vector<64x32xf32>
    %91 = arith.truncf %90 : vector<64x32xf32> to vector<64x32xbf16>
    %c9_66 = arith.constant 9 : index
    %c0_67 = arith.constant 0 : index
    %c0_68 = arith.constant 0 : index
    %92 = vector.load %arg3[%c9_66, %c0_67, %c0_68] : memref<16x32x16xbf16, #tpu.memory_space<vmem>>, vector<1x32x16xbf16>
    %93 = vector.shape_cast %92 : vector<1x32x16xbf16> to vector<32x16xbf16>
    %cst_69 = arith.constant dense<0.000000e+00> : vector<64x16xf32>
    %94 = tpu.matmul %91, %93, %cst_69 {dimension_numbers = #tpu.dot_dimension_numbers<[1], [0], [0], [1], [0, 0, 1, 1], [], []>} : vector<64x32xbf16>, vector<32x16xbf16>, vector<64x16xf32> -> vector<64x16xf32>
    %95 = arith.addf %89, %94 : vector<64x16xf32>
    %c11 = arith.constant 11 : index
    %c0_70 = arith.constant 0 : index
    %96 = vector.load %arg14[%c11, %c0_70] : memref<80x32xf32, #tpu.memory_space<vmem>>, vector<64x32xf32>
    %97 = arith.truncf %96 : vector<64x32xf32> to vector<64x32xbf16>
    %c10_71 = arith.constant 10 : index
    %c0_72 = arith.constant 0 : index
    %c0_73 = arith.constant 0 : index
    %98 = vector.load %arg3[%c10_71, %c0_72, %c0_73] : memref<16x32x16xbf16, #tpu.memory_space<vmem>>, vector<1x32x16xbf16>
    %99 = vector.shape_cast %98 : vector<1x32x16xbf16> to vector<32x16xbf16>
    %cst_74 = arith.constant dense<0.000000e+00> : vector<64x16xf32>
    %100 = tpu.matmul %97, %99, %cst_74 {dimension_numbers = #tpu.dot_dimension_numbers<[1], [0], [0], [1], [0, 0, 1, 1], [], []>} : vector<64x32xbf16>, vector<32x16xbf16>, vector<64x16xf32> -> vector<64x16xf32>
    %101 = arith.addf %95, %100 : vector<64x16xf32>
    %c12 = arith.constant 12 : index
    %c0_75 = arith.constant 0 : index
    %102 = vector.load %arg14[%c12, %c0_75] : memref<80x32xf32, #tpu.memory_space<vmem>>, vector<64x32xf32>
    %103 = arith.truncf %102 : vector<64x32xf32> to vector<64x32xbf16>
    %c11_76 = arith.constant 11 : index
    %c0_77 = arith.constant 0 : index
    %c0_78 = arith.constant 0 : index
    %104 = vector.load %arg3[%c11_76, %c0_77, %c0_78] : memref<16x32x16xbf16, #tpu.memory_space<vmem>>, vector<1x32x16xbf16>
    %105 = vector.shape_cast %104 : vector<1x32x16xbf16> to vector<32x16xbf16>
    %cst_79 = arith.constant dense<0.000000e+00> : vector<64x16xf32>
    %106 = tpu.matmul %103, %105, %cst_79 {dimension_numbers = #tpu.dot_dimension_numbers<[1], [0], [0], [1], [0, 0, 1, 1], [], []>} : vector<64x32xbf16>, vector<32x16xbf16>, vector<64x16xf32> -> vector<64x16xf32>
    %107 = arith.addf %101, %106 : vector<64x16xf32>
    %c13 = arith.constant 13 : index
    %c0_80 = arith.constant 0 : index
    %108 = vector.load %arg14[%c13, %c0_80] : memref<80x32xf32, #tpu.memory_space<vmem>>, vector<64x32xf32>
    %109 = arith.truncf %108 : vector<64x32xf32> to vector<64x32xbf16>
    %c12_81 = arith.constant 12 : index
    %c0_82 = arith.constant 0 : index
    %c0_83 = arith.constant 0 : index
    %110 = vector.load %arg3[%c12_81, %c0_82, %c0_83] : memref<16x32x16xbf16, #tpu.memory_space<vmem>>, vector<1x32x16xbf16>
    %111 = vector.shape_cast %110 : vector<1x32x16xbf16> to vector<32x16xbf16>
    %cst_84 = arith.constant dense<0.000000e+00> : vector<64x16xf32>
    %112 = tpu.matmul %109, %111, %cst_84 {dimension_numbers = #tpu.dot_dimension_numbers<[1], [0], [0], [1], [0, 0, 1, 1], [], []>} : vector<64x32xbf16>, vector<32x16xbf16>, vector<64x16xf32> -> vector<64x16xf32>
    %113 = arith.addf %107, %112 : vector<64x16xf32>
    %c14 = arith.constant 14 : index
    %c0_85 = arith.constant 0 : index
    %114 = vector.load %arg14[%c14, %c0_85] : memref<80x32xf32, #tpu.memory_space<vmem>>, vector<64x32xf32>
    %115 = arith.truncf %114 : vector<64x32xf32> to vector<64x32xbf16>
    %c13_86 = arith.constant 13 : index
    %c0_87 = arith.constant 0 : index
    %c0_88 = arith.constant 0 : index
    %116 = vector.load %arg3[%c13_86, %c0_87, %c0_88] : memref<16x32x16xbf16, #tpu.memory_space<vmem>>, vector<1x32x16xbf16>
    %117 = vector.shape_cast %116 : vector<1x32x16xbf16> to vector<32x16xbf16>
    %cst_89 = arith.constant dense<0.000000e+00> : vector<64x16xf32>
    %118 = tpu.matmul %115, %117, %cst_89 {dimension_numbers = #tpu.dot_dimension_numbers<[1], [0], [0], [1], [0, 0, 1, 1], [], []>} : vector<64x32xbf16>, vector<32x16xbf16>, vector<64x16xf32> -> vector<64x16xf32>
    %119 = arith.addf %113, %118 : vector<64x16xf32>
    %c15 = arith.constant 15 : index
    %c0_90 = arith.constant 0 : index
    %120 = vector.load %arg14[%c15, %c0_90] : memref<80x32xf32, #tpu.memory_space<vmem>>, vector<64x32xf32>
    %121 = arith.truncf %120 : vector<64x32xf32> to vector<64x32xbf16>
    %c14_91 = arith.constant 14 : index
    %c0_92 = arith.constant 0 : index
    %c0_93 = arith.constant 0 : index
    %122 = vector.load %arg3[%c14_91, %c0_92, %c0_93] : memref<16x32x16xbf16, #tpu.memory_space<vmem>>, vector<1x32x16xbf16>
    %123 = vector.shape_cast %122 : vector<1x32x16xbf16> to vector<32x16xbf16>
    %cst_94 = arith.constant dense<0.000000e+00> : vector<64x16xf32>
    %124 = tpu.matmul %121, %123, %cst_94 {dimension_numbers = #tpu.dot_dimension_numbers<[1], [0], [0], [1], [0, 0, 1, 1], [], []>} : vector<64x32xbf16>, vector<32x16xbf16>, vector<64x16xf32> -> vector<64x16xf32>
    %125 = arith.addf %119, %124 : vector<64x16xf32>
    %c16 = arith.constant 16 : index
    %c0_95 = arith.constant 0 : index
    %126 = vector.load %arg14[%c16, %c0_95] : memref<80x32xf32, #tpu.memory_space<vmem>>, vector<64x32xf32>
    %127 = arith.truncf %126 : vector<64x32xf32> to vector<64x32xbf16>
    %c15_96 = arith.constant 15 : index
    %c0_97 = arith.constant 0 : index
    %c0_98 = arith.constant 0 : index
    %128 = vector.load %arg3[%c15_96, %c0_97, %c0_98] : memref<16x32x16xbf16, #tpu.memory_space<vmem>>, vector<1x32x16xbf16>
    %129 = vector.shape_cast %128 : vector<1x32x16xbf16> to vector<32x16xbf16>
    %cst_99 = arith.constant dense<0.000000e+00> : vector<64x16xf32>
    %130 = tpu.matmul %127, %129, %cst_99 {dimension_numbers = #tpu.dot_dimension_numbers<[1], [0], [0], [1], [0, 0, 1, 1], [], []>} : vector<64x32xbf16>, vector<32x16xbf16>, vector<64x16xf32> -> vector<64x16xf32>
    %131 = arith.addf %125, %130 : vector<64x16xf32>
    %c1_100 = arith.constant 1 : index
    %c0_101 = arith.constant 0 : index
    %132 = vector.load %arg10[%c1_100, %c0_101] : memref<6x64xf32, #tpu.memory_space<vmem>>, vector<1x16xf32>
    %c1_102 = arith.constant 1 : index
    %c0_103 = arith.constant 0 : index
    %133 = vector.load %arg11[%c1_102, %c0_103] : memref<6x64xf32, #tpu.memory_space<vmem>>, vector<1x16xf32>
    %c1_104 = arith.constant 1 : index
    %c0_105 = arith.constant 0 : index
    %134 = vector.load %arg12[%c1_104, %c0_105] : memref<6x64xf32, #tpu.memory_space<vmem>>, vector<1x16xf32>
    %135 = vector.broadcast %132 : vector<1x16xf32> to vector<64x16xf32>
    %136 = arith.addf %131, %135 : vector<64x16xf32>
    %cst_106 = arith.constant 0.000000e+00 : f32
    %137 = vector.broadcast %cst_106 : f32 to vector<64x16xf32>
    %138 = arith.maximumf %136, %137 : vector<64x16xf32>
    %139 = vector.broadcast %133 : vector<1x16xf32> to vector<64x16xf32>
    %140 = arith.mulf %138, %139 : vector<64x16xf32>
    %141 = vector.broadcast %134 : vector<1x16xf32> to vector<64x16xf32>
    %142 = arith.addf %140, %141 : vector<64x16xf32>
    %143 = tpu.iota {dimensions = array<i32: 0>} : vector<32x64xi32>
    %144 = tpu.iota {dimensions = array<i32: 1>} : vector<32x64xi32>
    %c2_i32_107 = arith.constant 2 : i32
    %145 = vector.broadcast %c2_i32_107 : i32 to vector<32x64xi32>
    %146 = arith.muli %145, %143 : vector<32x64xi32>
    %147 = arith.cmpi eq, %144, %146 : vector<32x64xi32>
    %148 = arith.extui %147 : vector<32x64xi1> to vector<32x64xi32>
    %149 = arith.sitofp %148 : vector<32x64xi32> to vector<32x64xf32>
    %cst_108 = arith.constant dense<0.000000e+00> : vector<32x16xf32>
    %150 = tpu.matmul %149, %142, %cst_108 {dimension_numbers = #tpu.dot_dimension_numbers<[1], [0], [0], [1], [0, 0, 1, 1], [], []>} : vector<32x64xf32>, vector<64x16xf32>, vector<32x16xf32> -> vector<32x16xf32>
    %c2_i32_109 = arith.constant 2 : i32
    %151 = vector.broadcast %c2_i32_109 : i32 to vector<32x64xi32>
    %152 = arith.muli %151, %143 : vector<32x64xi32>
    %c1_i32_110 = arith.constant 1 : i32
    %153 = vector.broadcast %c1_i32_110 : i32 to vector<32x64xi32>
    %154 = arith.addi %152, %153 : vector<32x64xi32>
    %155 = arith.cmpi eq, %144, %154 : vector<32x64xi32>
    %156 = arith.extui %155 : vector<32x64xi1> to vector<32x64xi32>
    %157 = arith.sitofp %156 : vector<32x64xi32> to vector<32x64xf32>
    %cst_111 = arith.constant dense<0.000000e+00> : vector<32x16xf32>
    %158 = tpu.matmul %157, %142, %cst_111 {dimension_numbers = #tpu.dot_dimension_numbers<[1], [0], [0], [1], [0, 0, 1, 1], [], []>} : vector<32x64xf32>, vector<64x16xf32>, vector<32x16xf32> -> vector<32x16xf32>
    %159 = arith.maximumf %150, %158 : vector<32x16xf32>
    %cst_112 = arith.constant 0.000000e+00 : f32
    %160 = vector.broadcast %cst_112 : f32 to vector<48x16xf32>
    %c0_113 = arith.constant 0 : index
    %c0_114 = arith.constant 0 : index
    %161 = vector.load %arg15[%c0_113, %c0_114] : memref<48x16xf32, #tpu.memory_space<vmem>>, vector<48x16xf32>
    tpu.vector_store %arg15[%c0_113, %c0_114], %160 {strides = array<i32>} : memref<48x16xf32, #tpu.memory_space<vmem>>, vector<48x16xf32>,
    %c8_115 = arith.constant 8 : index
    %c0_116 = arith.constant 0 : index
    %162 = vector.load %arg15[%c8_115, %c0_116] : memref<48x16xf32, #tpu.memory_space<vmem>>, vector<32x16xf32>
    tpu.vector_store %arg15[%c8_115, %c0_116], %159 {strides = array<i32>} : memref<48x16xf32, #tpu.memory_space<vmem>>, vector<32x16xf32>,
    %cst_117 = arith.constant 0.000000e+00 : f32
    %163 = vector.broadcast %cst_117 : f32 to vector<32x16xf32>
    %c1_118 = arith.constant 1 : index
    %c0_119 = arith.constant 0 : index
    %164 = vector.load %arg15[%c1_118, %c0_119] : memref<48x16xf32, #tpu.memory_space<vmem>>, vector<32x16xf32>
    %165 = arith.truncf %164 : vector<32x16xf32> to vector<32x16xbf16>
    %c0_120 = arith.constant 0 : index
    %c0_121 = arith.constant 0 : index
    %c0_122 = arith.constant 0 : index
    %166 = vector.load %arg4[%c0_120, %c0_121, %c0_122] : memref<16x16x16xbf16, #tpu.memory_space<vmem>>, vector<1x16x16xbf16>
    %167 = vector.shape_cast %166 : vector<1x16x16xbf16> to vector<16x16xbf16>
    %cst_123 = arith.constant dense<0.000000e+00> : vector<32x16xf32>
    %168 = tpu.matmul %165, %167, %cst_123 {dimension_numbers = #tpu.dot_dimension_numbers<[1], [0], [0], [1], [0, 0, 1, 1], [], []>} : vector<32x16xbf16>, vector<16x16xbf16>, vector<32x16xf32> -> vector<32x16xf32>
    %169 = arith.addf %163, %168 : vector<32x16xf32>
    %c2_124 = arith.constant 2 : index
    %c0_125 = arith.constant 0 : index
    %170 = vector.load %arg15[%c2_124, %c0_125] : memref<48x16xf32, #tpu.memory_space<vmem>>, vector<32x16xf32>
    %171 = arith.truncf %170 : vector<32x16xf32> to vector<32x16xbf16>
    %c1_126 = arith.constant 1 : index
    %c0_127 = arith.constant 0 : index
    %c0_128 = arith.constant 0 : index
    %172 = vector.load %arg4[%c1_126, %c0_127, %c0_128] : memref<16x16x16xbf16, #tpu.memory_space<vmem>>, vector<1x16x16xbf16>
    %173 = vector.shape_cast %172 : vector<1x16x16xbf16> to vector<16x16xbf16>
    %cst_129 = arith.constant dense<0.000000e+00> : vector<32x16xf32>
    %174 = tpu.matmul %171, %173, %cst_129 {dimension_numbers = #tpu.dot_dimension_numbers<[1], [0], [0], [1], [0, 0, 1, 1], [], []>} : vector<32x16xbf16>, vector<16x16xbf16>, vector<32x16xf32> -> vector<32x16xf32>
    %175 = arith.addf %169, %174 : vector<32x16xf32>
    %c3_130 = arith.constant 3 : index
    %c0_131 = arith.constant 0 : index
    %176 = vector.load %arg15[%c3_130, %c0_131] : memref<48x16xf32, #tpu.memory_space<vmem>>, vector<32x16xf32>
    %177 = arith.truncf %176 : vector<32x16xf32> to vector<32x16xbf16>
    %c2_132 = arith.constant 2 : index
    %c0_133 = arith.constant 0 : index
    %c0_134 = arith.constant 0 : index
    %178 = vector.load %arg4[%c2_132, %c0_133, %c0_134] : memref<16x16x16xbf16, #tpu.memory_space<vmem>>, vector<1x16x16xbf16>
    %179 = vector.shape_cast %178 : vector<1x16x16xbf16> to vector<16x16xbf16>
    %cst_135 = arith.constant dense<0.000000e+00> : vector<32x16xf32>
    %180 = tpu.matmul %177, %179, %cst_135 {dimension_numbers = #tpu.dot_dimension_numbers<[1], [0], [0], [1], [0, 0, 1, 1], [], []>} : vector<32x16xbf16>, vector<16x16xbf16>, vector<32x16xf32> -> vector<32x16xf32>
    %181 = arith.addf %175, %180 : vector<32x16xf32>
    %c4_136 = arith.constant 4 : index
    %c0_137 = arith.constant 0 : index
    %182 = vector.load %arg15[%c4_136, %c0_137] : memref<48x16xf32, #tpu.memory_space<vmem>>, vector<32x16xf32>
    %183 = arith.truncf %182 : vector<32x16xf32> to vector<32x16xbf16>
    %c3_138 = arith.constant 3 : index
    %c0_139 = arith.constant 0 : index
    %c0_140 = arith.constant 0 : index
    %184 = vector.load %arg4[%c3_138, %c0_139, %c0_140] : memref<16x16x16xbf16, #tpu.memory_space<vmem>>, vector<1x16x16xbf16>
    %185 = vector.shape_cast %184 : vector<1x16x16xbf16> to vector<16x16xbf16>
    %cst_141 = arith.constant dense<0.000000e+00> : vector<32x16xf32>
    %186 = tpu.matmul %183, %185, %cst_141 {dimension_numbers = #tpu.dot_dimension_numbers<[1], [0], [0], [1], [0, 0, 1, 1], [], []>} : vector<32x16xbf16>, vector<16x16xbf16>, vector<32x16xf32> -> vector<32x16xf32>
    %187 = arith.addf %181, %186 : vector<32x16xf32>
    %c5_142 = arith.constant 5 : index
    %c0_143 = arith.constant 0 : index
    %188 = vector.load %arg15[%c5_142, %c0_143] : memref<48x16xf32, #tpu.memory_space<vmem>>, vector<32x16xf32>
    %189 = arith.truncf %188 : vector<32x16xf32> to vector<32x16xbf16>
    %c4_144 = arith.constant 4 : index
    %c0_145 = arith.constant 0 : index
    %c0_146 = arith.constant 0 : index
    %190 = vector.load %arg4[%c4_144, %c0_145, %c0_146] : memref<16x16x16xbf16, #tpu.memory_space<vmem>>, vector<1x16x16xbf16>
    %191 = vector.shape_cast %190 : vector<1x16x16xbf16> to vector<16x16xbf16>
    %cst_147 = arith.constant dense<0.000000e+00> : vector<32x16xf32>
    %192 = tpu.matmul %189, %191, %cst_147 {dimension_numbers = #tpu.dot_dimension_numbers<[1], [0], [0], [1], [0, 0, 1, 1], [], []>} : vector<32x16xbf16>, vector<16x16xbf16>, vector<32x16xf32> -> vector<32x16xf32>
    %193 = arith.addf %187, %192 : vector<32x16xf32>
    %c6_148 = arith.constant 6 : index
    %c0_149 = arith.constant 0 : index
    %194 = vector.load %arg15[%c6_148, %c0_149] : memref<48x16xf32, #tpu.memory_space<vmem>>, vector<32x16xf32>
    %195 = arith.truncf %194 : vector<32x16xf32> to vector<32x16xbf16>
    %c5_150 = arith.constant 5 : index
    %c0_151 = arith.constant 0 : index
    %c0_152 = arith.constant 0 : index
    %196 = vector.load %arg4[%c5_150, %c0_151, %c0_152] : memref<16x16x16xbf16, #tpu.memory_space<vmem>>, vector<1x16x16xbf16>
    %197 = vector.shape_cast %196 : vector<1x16x16xbf16> to vector<16x16xbf16>
    %cst_153 = arith.constant dense<0.000000e+00> : vector<32x16xf32>
    %198 = tpu.matmul %195, %197, %cst_153 {dimension_numbers = #tpu.dot_dimension_numbers<[1], [0], [0], [1], [0, 0, 1, 1], [], []>} : vector<32x16xbf16>, vector<16x16xbf16>, vector<32x16xf32> -> vector<32x16xf32>
    %199 = arith.addf %193, %198 : vector<32x16xf32>
    %c7_154 = arith.constant 7 : index
    %c0_155 = arith.constant 0 : index
    %200 = vector.load %arg15[%c7_154, %c0_155] : memref<48x16xf32, #tpu.memory_space<vmem>>, vector<32x16xf32>
    %201 = arith.truncf %200 : vector<32x16xf32> to vector<32x16xbf16>
    %c6_156 = arith.constant 6 : index
    %c0_157 = arith.constant 0 : index
    %c0_158 = arith.constant 0 : index
    %202 = vector.load %arg4[%c6_156, %c0_157, %c0_158] : memref<16x16x16xbf16, #tpu.memory_space<vmem>>, vector<1x16x16xbf16>
    %203 = vector.shape_cast %202 : vector<1x16x16xbf16> to vector<16x16xbf16>
    %cst_159 = arith.constant dense<0.000000e+00> : vector<32x16xf32>
    %204 = tpu.matmul %201, %203, %cst_159 {dimension_numbers = #tpu.dot_dimension_numbers<[1], [0], [0], [1], [0, 0, 1, 1], [], []>} : vector<32x16xbf16>, vector<16x16xbf16>, vector<32x16xf32> -> vector<32x16xf32>
    %205 = arith.addf %199, %204 : vector<32x16xf32>
    %c8_160 = arith.constant 8 : index
    %c0_161 = arith.constant 0 : index
    %206 = vector.load %arg15[%c8_160, %c0_161] : memref<48x16xf32, #tpu.memory_space<vmem>>, vector<32x16xf32>
    %207 = arith.truncf %206 : vector<32x16xf32> to vector<32x16xbf16>
    %c7_162 = arith.constant 7 : index
    %c0_163 = arith.constant 0 : index
    %c0_164 = arith.constant 0 : index
    %208 = vector.load %arg4[%c7_162, %c0_163, %c0_164] : memref<16x16x16xbf16, #tpu.memory_space<vmem>>, vector<1x16x16xbf16>
    %209 = vector.shape_cast %208 : vector<1x16x16xbf16> to vector<16x16xbf16>
    %cst_165 = arith.constant dense<0.000000e+00> : vector<32x16xf32>
    %210 = tpu.matmul %207, %209, %cst_165 {dimension_numbers = #tpu.dot_dimension_numbers<[1], [0], [0], [1], [0, 0, 1, 1], [], []>} : vector<32x16xbf16>, vector<16x16xbf16>, vector<32x16xf32> -> vector<32x16xf32>
    %211 = arith.addf %205, %210 : vector<32x16xf32>
    %c9_166 = arith.constant 9 : index
    %c0_167 = arith.constant 0 : index
    %212 = vector.load %arg15[%c9_166, %c0_167] : memref<48x16xf32, #tpu.memory_space<vmem>>, vector<32x16xf32>
    %213 = arith.truncf %212 : vector<32x16xf32> to vector<32x16xbf16>
    %c8_168 = arith.constant 8 : index
    %c0_169 = arith.constant 0 : index
    %c0_170 = arith.constant 0 : index
    %214 = vector.load %arg4[%c8_168, %c0_169, %c0_170] : memref<16x16x16xbf16, #tpu.memory_space<vmem>>, vector<1x16x16xbf16>
    %215 = vector.shape_cast %214 : vector<1x16x16xbf16> to vector<16x16xbf16>
    %cst_171 = arith.constant dense<0.000000e+00> : vector<32x16xf32>
    %216 = tpu.matmul %213, %215, %cst_171 {dimension_numbers = #tpu.dot_dimension_numbers<[1], [0], [0], [1], [0, 0, 1, 1], [], []>} : vector<32x16xbf16>, vector<16x16xbf16>, vector<32x16xf32> -> vector<32x16xf32>
    %217 = arith.addf %211, %216 : vector<32x16xf32>
    %c10_172 = arith.constant 10 : index
    %c0_173 = arith.constant 0 : index
    %218 = vector.load %arg15[%c10_172, %c0_173] : memref<48x16xf32, #tpu.memory_space<vmem>>, vector<32x16xf32>
    %219 = arith.truncf %218 : vector<32x16xf32> to vector<32x16xbf16>
    %c9_174 = arith.constant 9 : index
    %c0_175 = arith.constant 0 : index
    %c0_176 = arith.constant 0 : index
    %220 = vector.load %arg4[%c9_174, %c0_175, %c0_176] : memref<16x16x16xbf16, #tpu.memory_space<vmem>>, vector<1x16x16xbf16>
    %221 = vector.shape_cast %220 : vector<1x16x16xbf16> to vector<16x16xbf16>
    %cst_177 = arith.constant dense<0.000000e+00> : vector<32x16xf32>
    %222 = tpu.matmul %219, %221, %cst_177 {dimension_numbers = #tpu.dot_dimension_numbers<[1], [0], [0], [1], [0, 0, 1, 1], [], []>} : vector<32x16xbf16>, vector<16x16xbf16>, vector<32x16xf32> -> vector<32x16xf32>
    %223 = arith.addf %217, %222 : vector<32x16xf32>
    %c11_178 = arith.constant 11 : index
    %c0_179 = arith.constant 0 : index
    %224 = vector.load %arg15[%c11_178, %c0_179] : memref<48x16xf32, #tpu.memory_space<vmem>>, vector<32x16xf32>
    %225 = arith.truncf %224 : vector<32x16xf32> to vector<32x16xbf16>
    %c10_180 = arith.constant 10 : index
    %c0_181 = arith.constant 0 : index
    %c0_182 = arith.constant 0 : index
    %226 = vector.load %arg4[%c10_180, %c0_181, %c0_182] : memref<16x16x16xbf16, #tpu.memory_space<vmem>>, vector<1x16x16xbf16>
    %227 = vector.shape_cast %226 : vector<1x16x16xbf16> to vector<16x16xbf16>
    %cst_183 = arith.constant dense<0.000000e+00> : vector<32x16xf32>
    %228 = tpu.matmul %225, %227, %cst_183 {dimension_numbers = #tpu.dot_dimension_numbers<[1], [0], [0], [1], [0, 0, 1, 1], [], []>} : vector<32x16xbf16>, vector<16x16xbf16>, vector<32x16xf32> -> vector<32x16xf32>
    %229 = arith.addf %223, %228 : vector<32x16xf32>
    %c12_184 = arith.constant 12 : index
    %c0_185 = arith.constant 0 : index
    %230 = vector.load %arg15[%c12_184, %c0_185] : memref<48x16xf32, #tpu.memory_space<vmem>>, vector<32x16xf32>
    %231 = arith.truncf %230 : vector<32x16xf32> to vector<32x16xbf16>
    %c11_186 = arith.constant 11 : index
    %c0_187 = arith.constant 0 : index
    %c0_188 = arith.constant 0 : index
    %232 = vector.load %arg4[%c11_186, %c0_187, %c0_188] : memref<16x16x16xbf16, #tpu.memory_space<vmem>>, vector<1x16x16xbf16>
    %233 = vector.shape_cast %232 : vector<1x16x16xbf16> to vector<16x16xbf16>
    %cst_189 = arith.constant dense<0.000000e+00> : vector<32x16xf32>
    %234 = tpu.matmul %231, %233, %cst_189 {dimension_numbers = #tpu.dot_dimension_numbers<[1], [0], [0], [1], [0, 0, 1, 1], [], []>} : vector<32x16xbf16>, vector<16x16xbf16>, vector<32x16xf32> -> vector<32x16xf32>
    %235 = arith.addf %229, %234 : vector<32x16xf32>
    %c13_190 = arith.constant 13 : index
    %c0_191 = arith.constant 0 : index
    %236 = vector.load %arg15[%c13_190, %c0_191] : memref<48x16xf32, #tpu.memory_space<vmem>>, vector<32x16xf32>
    %237 = arith.truncf %236 : vector<32x16xf32> to vector<32x16xbf16>
    %c12_192 = arith.constant 12 : index
    %c0_193 = arith.constant 0 : index
    %c0_194 = arith.constant 0 : index
    %238 = vector.load %arg4[%c12_192, %c0_193, %c0_194] : memref<16x16x16xbf16, #tpu.memory_space<vmem>>, vector<1x16x16xbf16>
    %239 = vector.shape_cast %238 : vector<1x16x16xbf16> to vector<16x16xbf16>
    %cst_195 = arith.constant dense<0.000000e+00> : vector<32x16xf32>
    %240 = tpu.matmul %237, %239, %cst_195 {dimension_numbers = #tpu.dot_dimension_numbers<[1], [0], [0], [1], [0, 0, 1, 1], [], []>} : vector<32x16xbf16>, vector<16x16xbf16>, vector<32x16xf32> -> vector<32x16xf32>
    %241 = arith.addf %235, %240 : vector<32x16xf32>
    %c14_196 = arith.constant 14 : index
    %c0_197 = arith.constant 0 : index
    %242 = vector.load %arg15[%c14_196, %c0_197] : memref<48x16xf32, #tpu.memory_space<vmem>>, vector<32x16xf32>
    %243 = arith.truncf %242 : vector<32x16xf32> to vector<32x16xbf16>
    %c13_198 = arith.constant 13 : index
    %c0_199 = arith.constant 0 : index
    %c0_200 = arith.constant 0 : index
    %244 = vector.load %arg4[%c13_198, %c0_199, %c0_200] : memref<16x16x16xbf16, #tpu.memory_space<vmem>>, vector<1x16x16xbf16>
    %245 = vector.shape_cast %244 : vector<1x16x16xbf16> to vector<16x16xbf16>
    %cst_201 = arith.constant dense<0.000000e+00> : vector<32x16xf32>
    %246 = tpu.matmul %243, %245, %cst_201 {dimension_numbers = #tpu.dot_dimension_numbers<[1], [0], [0], [1], [0, 0, 1, 1], [], []>} : vector<32x16xbf16>, vector<16x16xbf16>, vector<32x16xf32> -> vector<32x16xf32>
    %247 = arith.addf %241, %246 : vector<32x16xf32>
    %c15_202 = arith.constant 15 : index
    %c0_203 = arith.constant 0 : index
    %248 = vector.load %arg15[%c15_202, %c0_203] : memref<48x16xf32, #tpu.memory_space<vmem>>, vector<32x16xf32>
    %249 = arith.truncf %248 : vector<32x16xf32> to vector<32x16xbf16>
    %c14_204 = arith.constant 14 : index
    %c0_205 = arith.constant 0 : index
    %c0_206 = arith.constant 0 : index
    %250 = vector.load %arg4[%c14_204, %c0_205, %c0_206] : memref<16x16x16xbf16, #tpu.memory_space<vmem>>, vector<1x16x16xbf16>
    %251 = vector.shape_cast %250 : vector<1x16x16xbf16> to vector<16x16xbf16>
    %cst_207 = arith.constant dense<0.000000e+00> : vector<32x16xf32>
    %252 = tpu.matmul %249, %251, %cst_207 {dimension_numbers = #tpu.dot_dimension_numbers<[1], [0], [0], [1], [0, 0, 1, 1], [], []>} : vector<32x16xbf16>, vector<16x16xbf16>, vector<32x16xf32> -> vector<32x16xf32>
    %253 = arith.addf %247, %252 : vector<32x16xf32>
    %c16_208 = arith.constant 16 : index
    %c0_209 = arith.constant 0 : index
    %254 = vector.load %arg15[%c16_208, %c0_209] : memref<48x16xf32, #tpu.memory_space<vmem>>, vector<32x16xf32>
    %255 = arith.truncf %254 : vector<32x16xf32> to vector<32x16xbf16>
    %c15_210 = arith.constant 15 : index
    %c0_211 = arith.constant 0 : index
    %c0_212 = arith.constant 0 : index
    %256 = vector.load %arg4[%c15_210, %c0_211, %c0_212] : memref<16x16x16xbf16, #tpu.memory_space<vmem>>, vector<1x16x16xbf16>
    %257 = vector.shape_cast %256 : vector<1x16x16xbf16> to vector<16x16xbf16>
    %cst_213 = arith.constant dense<0.000000e+00> : vector<32x16xf32>
    %258 = tpu.matmul %255, %257, %cst_213 {dimension_numbers = #tpu.dot_dimension_numbers<[1], [0], [0], [1], [0, 0, 1, 1], [], []>} : vector<32x16xbf16>, vector<16x16xbf16>, vector<32x16xf32> -> vector<32x16xf32>
    %259 = arith.addf %253, %258 : vector<32x16xf32>
    %c2_214 = arith.constant 2 : index
    %c0_215 = arith.constant 0 : index
    %260 = vector.load %arg10[%c2_214, %c0_215] : memref<6x64xf32, #tpu.memory_space<vmem>>, vector<1x16xf32>
    %c2_216 = arith.constant 2 : index
    %c0_217 = arith.constant 0 : index
    %261 = vector.load %arg11[%c2_216, %c0_217] : memref<6x64xf32, #tpu.memory_space<vmem>>, vector<1x16xf32>
    %c2_218 = arith.constant 2 : index
    %c0_219 = arith.constant 0 : index
    %262 = vector.load %arg12[%c2_218, %c0_219] : memref<6x64xf32, #tpu.memory_space<vmem>>, vector<1x16xf32>
    %263 = vector.broadcast %260 : vector<1x16xf32> to vector<32x16xf32>
    %264 = arith.addf %259, %263 : vector<32x16xf32>
    %cst_220 = arith.constant 0.000000e+00 : f32
    %265 = vector.broadcast %cst_220 : f32 to vector<32x16xf32>
    %266 = arith.maximumf %264, %265 : vector<32x16xf32>
    %267 = vector.broadcast %261 : vector<1x16xf32> to vector<32x16xf32>
    %268 = arith.mulf %266, %267 : vector<32x16xf32>
    %269 = vector.broadcast %262 : vector<1x16xf32> to vector<32x16xf32>
    %270 = arith.addf %268, %269 : vector<32x16xf32>
    %271 = tpu.iota {dimensions = array<i32: 0>} : vector<16x32xi32>
    %272 = tpu.iota {dimensions = array<i32: 1>} : vector<16x32xi32>
    %c2_i32_221 = arith.constant 2 : i32
    %273 = vector.broadcast %c2_i32_221 : i32 to vector<16x32xi32>
    %274 = arith.muli %273, %271 : vector<16x32xi32>
    %275 = arith.cmpi eq, %272, %274 : vector<16x32xi32>
    %276 = arith.extui %275 : vector<16x32xi1> to vector<16x32xi32>
    %277 = arith.sitofp %276 : vector<16x32xi32> to vector<16x32xf32>
    %cst_222 = arith.constant dense<0.000000e+00> : vector<16x16xf32>
    %278 = tpu.matmul %277, %270, %cst_222 {dimension_numbers = #tpu.dot_dimension_numbers<[1], [0], [0], [1], [0, 0, 1, 1], [], []>} : vector<16x32xf32>, vector<32x16xf32>, vector<16x16xf32> -> vector<16x16xf32>
    %c2_i32_223 = arith.constant 2 : i32
    %279 = vector.broadcast %c2_i32_223 : i32 to vector<16x32xi32>
    %280 = arith.muli %279, %271 : vector<16x32xi32>
    %c1_i32_224 = arith.constant 1 : i32
    %281 = vector.broadcast %c1_i32_224 : i32 to vector<16x32xi32>
    %282 = arith.addi %280, %281 : vector<16x32xi32>
    %283 = arith.cmpi eq, %272, %282 : vector<16x32xi32>
    %284 = arith.extui %283 : vector<16x32xi1> to vector<16x32xi32>
    %285 = arith.sitofp %284 : vector<16x32xi32> to vector<16x32xf32>
    %cst_225 = arith.constant dense<0.000000e+00> : vector<16x16xf32>
    %286 = tpu.matmul %285, %270, %cst_225 {dimension_numbers = #tpu.dot_dimension_numbers<[1], [0], [0], [1], [0, 0, 1, 1], [], []>} : vector<16x32xf32>, vector<32x16xf32>, vector<16x16xf32> -> vector<16x16xf32>
    %287 = arith.maximumf %278, %286 : vector<16x16xf32>
    %cst_226 = arith.constant 0.000000e+00 : f32
    %288 = vector.broadcast %cst_226 : f32 to vector<32x16xf32>
    %c0_227 = arith.constant 0 : index
    %c0_228 = arith.constant 0 : index
    %289 = vector.load %arg16[%c0_227, %c0_228] : memref<32x16xf32, #tpu.memory_space<vmem>>, vector<32x16xf32>
    tpu.vector_store %arg16[%c0_227, %c0_228], %288 {strides = array<i32>} : memref<32x16xf32, #tpu.memory_space<vmem>>, vector<32x16xf32>,
    %c8_229 = arith.constant 8 : index
    %c0_230 = arith.constant 0 : index
    %290 = vector.load %arg16[%c8_229, %c0_230] : memref<32x16xf32, #tpu.memory_space<vmem>>, vector<16x16xf32>
    tpu.vector_store %arg16[%c8_229, %c0_230], %287 {strides = array<i32>} : memref<32x16xf32, #tpu.memory_space<vmem>>, vector<16x16xf32>,
    %cst_231 = arith.constant 0.000000e+00 : f32
    %291 = vector.broadcast %cst_231 : f32 to vector<16x16xf32>
    %c1_232 = arith.constant 1 : index
    %c0_233 = arith.constant 0 : index
    %292 = vector.load %arg16[%c1_232, %c0_233] : memref<32x16xf32, #tpu.memory_space<vmem>>, vector<16x16xf32>
    %293 = arith.truncf %292 : vector<16x16xf32> to vector<16x16xbf16>
    %c0_234 = arith.constant 0 : index
    %c0_235 = arith.constant 0 : index
    %c0_236 = arith.constant 0 : index
    %294 = vector.load %arg5[%c0_234, %c0_235, %c0_236] : memref<16x16x16xbf16, #tpu.memory_space<vmem>>, vector<1x16x16xbf16>
    %295 = vector.shape_cast %294 : vector<1x16x16xbf16> to vector<16x16xbf16>
    %cst_237 = arith.constant dense<0.000000e+00> : vector<16x16xf32>
    %296 = tpu.matmul %293, %295, %cst_237 {dimension_numbers = #tpu.dot_dimension_numbers<[1], [0], [0], [1], [0, 0, 1, 1], [], []>} : vector<16x16xbf16>, vector<16x16xbf16>, vector<16x16xf32> -> vector<16x16xf32>
    %297 = arith.addf %291, %296 : vector<16x16xf32>
    %c2_238 = arith.constant 2 : index
    %c0_239 = arith.constant 0 : index
    %298 = vector.load %arg16[%c2_238, %c0_239] : memref<32x16xf32, #tpu.memory_space<vmem>>, vector<16x16xf32>
    %299 = arith.truncf %298 : vector<16x16xf32> to vector<16x16xbf16>
    %c1_240 = arith.constant 1 : index
    %c0_241 = arith.constant 0 : index
    %c0_242 = arith.constant 0 : index
    %300 = vector.load %arg5[%c1_240, %c0_241, %c0_242] : memref<16x16x16xbf16, #tpu.memory_space<vmem>>, vector<1x16x16xbf16>
    %301 = vector.shape_cast %300 : vector<1x16x16xbf16> to vector<16x16xbf16>
    %cst_243 = arith.constant dense<0.000000e+00> : vector<16x16xf32>
    %302 = tpu.matmul %299, %301, %cst_243 {dimension_numbers = #tpu.dot_dimension_numbers<[1], [0], [0], [1], [0, 0, 1, 1], [], []>} : vector<16x16xbf16>, vector<16x16xbf16>, vector<16x16xf32> -> vector<16x16xf32>
    %303 = arith.addf %297, %302 : vector<16x16xf32>
    %c3_244 = arith.constant 3 : index
    %c0_245 = arith.constant 0 : index
    %304 = vector.load %arg16[%c3_244, %c0_245] : memref<32x16xf32, #tpu.memory_space<vmem>>, vector<16x16xf32>
    %305 = arith.truncf %304 : vector<16x16xf32> to vector<16x16xbf16>
    %c2_246 = arith.constant 2 : index
    %c0_247 = arith.constant 0 : index
    %c0_248 = arith.constant 0 : index
    %306 = vector.load %arg5[%c2_246, %c0_247, %c0_248] : memref<16x16x16xbf16, #tpu.memory_space<vmem>>, vector<1x16x16xbf16>
    %307 = vector.shape_cast %306 : vector<1x16x16xbf16> to vector<16x16xbf16>
    %cst_249 = arith.constant dense<0.000000e+00> : vector<16x16xf32>
    %308 = tpu.matmul %305, %307, %cst_249 {dimension_numbers = #tpu.dot_dimension_numbers<[1], [0], [0], [1], [0, 0, 1, 1], [], []>} : vector<16x16xbf16>, vector<16x16xbf16>, vector<16x16xf32> -> vector<16x16xf32>
    %309 = arith.addf %303, %308 : vector<16x16xf32>
    %c4_250 = arith.constant 4 : index
    %c0_251 = arith.constant 0 : index
    %310 = vector.load %arg16[%c4_250, %c0_251] : memref<32x16xf32, #tpu.memory_space<vmem>>, vector<16x16xf32>
    %311 = arith.truncf %310 : vector<16x16xf32> to vector<16x16xbf16>
    %c3_252 = arith.constant 3 : index
    %c0_253 = arith.constant 0 : index
    %c0_254 = arith.constant 0 : index
    %312 = vector.load %arg5[%c3_252, %c0_253, %c0_254] : memref<16x16x16xbf16, #tpu.memory_space<vmem>>, vector<1x16x16xbf16>
    %313 = vector.shape_cast %312 : vector<1x16x16xbf16> to vector<16x16xbf16>
    %cst_255 = arith.constant dense<0.000000e+00> : vector<16x16xf32>
    %314 = tpu.matmul %311, %313, %cst_255 {dimension_numbers = #tpu.dot_dimension_numbers<[1], [0], [0], [1], [0, 0, 1, 1], [], []>} : vector<16x16xbf16>, vector<16x16xbf16>, vector<16x16xf32> -> vector<16x16xf32>
    %315 = arith.addf %309, %314 : vector<16x16xf32>
    %c5_256 = arith.constant 5 : index
    %c0_257 = arith.constant 0 : index
    %316 = vector.load %arg16[%c5_256, %c0_257] : memref<32x16xf32, #tpu.memory_space<vmem>>, vector<16x16xf32>
    %317 = arith.truncf %316 : vector<16x16xf32> to vector<16x16xbf16>
    %c4_258 = arith.constant 4 : index
    %c0_259 = arith.constant 0 : index
    %c0_260 = arith.constant 0 : index
    %318 = vector.load %arg5[%c4_258, %c0_259, %c0_260] : memref<16x16x16xbf16, #tpu.memory_space<vmem>>, vector<1x16x16xbf16>
    %319 = vector.shape_cast %318 : vector<1x16x16xbf16> to vector<16x16xbf16>
    %cst_261 = arith.constant dense<0.000000e+00> : vector<16x16xf32>
    %320 = tpu.matmul %317, %319, %cst_261 {dimension_numbers = #tpu.dot_dimension_numbers<[1], [0], [0], [1], [0, 0, 1, 1], [], []>} : vector<16x16xbf16>, vector<16x16xbf16>, vector<16x16xf32> -> vector<16x16xf32>
    %321 = arith.addf %315, %320 : vector<16x16xf32>
    %c6_262 = arith.constant 6 : index
    %c0_263 = arith.constant 0 : index
    %322 = vector.load %arg16[%c6_262, %c0_263] : memref<32x16xf32, #tpu.memory_space<vmem>>, vector<16x16xf32>
    %323 = arith.truncf %322 : vector<16x16xf32> to vector<16x16xbf16>
    %c5_264 = arith.constant 5 : index
    %c0_265 = arith.constant 0 : index
    %c0_266 = arith.constant 0 : index
    %324 = vector.load %arg5[%c5_264, %c0_265, %c0_266] : memref<16x16x16xbf16, #tpu.memory_space<vmem>>, vector<1x16x16xbf16>
    %325 = vector.shape_cast %324 : vector<1x16x16xbf16> to vector<16x16xbf16>
    %cst_267 = arith.constant dense<0.000000e+00> : vector<16x16xf32>
    %326 = tpu.matmul %323, %325, %cst_267 {dimension_numbers = #tpu.dot_dimension_numbers<[1], [0], [0], [1], [0, 0, 1, 1], [], []>} : vector<16x16xbf16>, vector<16x16xbf16>, vector<16x16xf32> -> vector<16x16xf32>
    %327 = arith.addf %321, %326 : vector<16x16xf32>
    %c7_268 = arith.constant 7 : index
    %c0_269 = arith.constant 0 : index
    %328 = vector.load %arg16[%c7_268, %c0_269] : memref<32x16xf32, #tpu.memory_space<vmem>>, vector<16x16xf32>
    %329 = arith.truncf %328 : vector<16x16xf32> to vector<16x16xbf16>
    %c6_270 = arith.constant 6 : index
    %c0_271 = arith.constant 0 : index
    %c0_272 = arith.constant 0 : index
    %330 = vector.load %arg5[%c6_270, %c0_271, %c0_272] : memref<16x16x16xbf16, #tpu.memory_space<vmem>>, vector<1x16x16xbf16>
    %331 = vector.shape_cast %330 : vector<1x16x16xbf16> to vector<16x16xbf16>
    %cst_273 = arith.constant dense<0.000000e+00> : vector<16x16xf32>
    %332 = tpu.matmul %329, %331, %cst_273 {dimension_numbers = #tpu.dot_dimension_numbers<[1], [0], [0], [1], [0, 0, 1, 1], [], []>} : vector<16x16xbf16>, vector<16x16xbf16>, vector<16x16xf32> -> vector<16x16xf32>
    %333 = arith.addf %327, %332 : vector<16x16xf32>
    %c8_274 = arith.constant 8 : index
    %c0_275 = arith.constant 0 : index
    %334 = vector.load %arg16[%c8_274, %c0_275] : memref<32x16xf32, #tpu.memory_space<vmem>>, vector<16x16xf32>
    %335 = arith.truncf %334 : vector<16x16xf32> to vector<16x16xbf16>
    %c7_276 = arith.constant 7 : index
    %c0_277 = arith.constant 0 : index
    %c0_278 = arith.constant 0 : index
    %336 = vector.load %arg5[%c7_276, %c0_277, %c0_278] : memref<16x16x16xbf16, #tpu.memory_space<vmem>>, vector<1x16x16xbf16>
    %337 = vector.shape_cast %336 : vector<1x16x16xbf16> to vector<16x16xbf16>
    %cst_279 = arith.constant dense<0.000000e+00> : vector<16x16xf32>
    %338 = tpu.matmul %335, %337, %cst_279 {dimension_numbers = #tpu.dot_dimension_numbers<[1], [0], [0], [1], [0, 0, 1, 1], [], []>} : vector<16x16xbf16>, vector<16x16xbf16>, vector<16x16xf32> -> vector<16x16xf32>
    %339 = arith.addf %333, %338 : vector<16x16xf32>
    %c9_280 = arith.constant 9 : index
    %c0_281 = arith.constant 0 : index
    %340 = vector.load %arg16[%c9_280, %c0_281] : memref<32x16xf32, #tpu.memory_space<vmem>>, vector<16x16xf32>
    %341 = arith.truncf %340 : vector<16x16xf32> to vector<16x16xbf16>
    %c8_282 = arith.constant 8 : index
    %c0_283 = arith.constant 0 : index
    %c0_284 = arith.constant 0 : index
    %342 = vector.load %arg5[%c8_282, %c0_283, %c0_284] : memref<16x16x16xbf16, #tpu.memory_space<vmem>>, vector<1x16x16xbf16>
    %343 = vector.shape_cast %342 : vector<1x16x16xbf16> to vector<16x16xbf16>
    %cst_285 = arith.constant dense<0.000000e+00> : vector<16x16xf32>
    %344 = tpu.matmul %341, %343, %cst_285 {dimension_numbers = #tpu.dot_dimension_numbers<[1], [0], [0], [1], [0, 0, 1, 1], [], []>} : vector<16x16xbf16>, vector<16x16xbf16>, vector<16x16xf32> -> vector<16x16xf32>
    %345 = arith.addf %339, %344 : vector<16x16xf32>
    %c10_286 = arith.constant 10 : index
    %c0_287 = arith.constant 0 : index
    %346 = vector.load %arg16[%c10_286, %c0_287] : memref<32x16xf32, #tpu.memory_space<vmem>>, vector<16x16xf32>
    %347 = arith.truncf %346 : vector<16x16xf32> to vector<16x16xbf16>
    %c9_288 = arith.constant 9 : index
    %c0_289 = arith.constant 0 : index
    %c0_290 = arith.constant 0 : index
    %348 = vector.load %arg5[%c9_288, %c0_289, %c0_290] : memref<16x16x16xbf16, #tpu.memory_space<vmem>>, vector<1x16x16xbf16>
    %349 = vector.shape_cast %348 : vector<1x16x16xbf16> to vector<16x16xbf16>
    %cst_291 = arith.constant dense<0.000000e+00> : vector<16x16xf32>
    %350 = tpu.matmul %347, %349, %cst_291 {dimension_numbers = #tpu.dot_dimension_numbers<[1], [0], [0], [1], [0, 0, 1, 1], [], []>} : vector<16x16xbf16>, vector<16x16xbf16>, vector<16x16xf32> -> vector<16x16xf32>
    %351 = arith.addf %345, %350 : vector<16x16xf32>
    %c11_292 = arith.constant 11 : index
    %c0_293 = arith.constant 0 : index
    %352 = vector.load %arg16[%c11_292, %c0_293] : memref<32x16xf32, #tpu.memory_space<vmem>>, vector<16x16xf32>
    %353 = arith.truncf %352 : vector<16x16xf32> to vector<16x16xbf16>
    %c10_294 = arith.constant 10 : index
    %c0_295 = arith.constant 0 : index
    %c0_296 = arith.constant 0 : index
    %354 = vector.load %arg5[%c10_294, %c0_295, %c0_296] : memref<16x16x16xbf16, #tpu.memory_space<vmem>>, vector<1x16x16xbf16>
    %355 = vector.shape_cast %354 : vector<1x16x16xbf16> to vector<16x16xbf16>
    %cst_297 = arith.constant dense<0.000000e+00> : vector<16x16xf32>
    %356 = tpu.matmul %353, %355, %cst_297 {dimension_numbers = #tpu.dot_dimension_numbers<[1], [0], [0], [1], [0, 0, 1, 1], [], []>} : vector<16x16xbf16>, vector<16x16xbf16>, vector<16x16xf32> -> vector<16x16xf32>
    %357 = arith.addf %351, %356 : vector<16x16xf32>
    %c12_298 = arith.constant 12 : index
    %c0_299 = arith.constant 0 : index
    %358 = vector.load %arg16[%c12_298, %c0_299] : memref<32x16xf32, #tpu.memory_space<vmem>>, vector<16x16xf32>
    %359 = arith.truncf %358 : vector<16x16xf32> to vector<16x16xbf16>
    %c11_300 = arith.constant 11 : index
    %c0_301 = arith.constant 0 : index
    %c0_302 = arith.constant 0 : index
    %360 = vector.load %arg5[%c11_300, %c0_301, %c0_302] : memref<16x16x16xbf16, #tpu.memory_space<vmem>>, vector<1x16x16xbf16>
    %361 = vector.shape_cast %360 : vector<1x16x16xbf16> to vector<16x16xbf16>
    %cst_303 = arith.constant dense<0.000000e+00> : vector<16x16xf32>
    %362 = tpu.matmul %359, %361, %cst_303 {dimension_numbers = #tpu.dot_dimension_numbers<[1], [0], [0], [1], [0, 0, 1, 1], [], []>} : vector<16x16xbf16>, vector<16x16xbf16>, vector<16x16xf32> -> vector<16x16xf32>
    %363 = arith.addf %357, %362 : vector<16x16xf32>
    %c13_304 = arith.constant 13 : index
    %c0_305 = arith.constant 0 : index
    %364 = vector.load %arg16[%c13_304, %c0_305] : memref<32x16xf32, #tpu.memory_space<vmem>>, vector<16x16xf32>
    %365 = arith.truncf %364 : vector<16x16xf32> to vector<16x16xbf16>
    %c12_306 = arith.constant 12 : index
    %c0_307 = arith.constant 0 : index
    %c0_308 = arith.constant 0 : index
    %366 = vector.load %arg5[%c12_306, %c0_307, %c0_308] : memref<16x16x16xbf16, #tpu.memory_space<vmem>>, vector<1x16x16xbf16>
    %367 = vector.shape_cast %366 : vector<1x16x16xbf16> to vector<16x16xbf16>
    %cst_309 = arith.constant dense<0.000000e+00> : vector<16x16xf32>
    %368 = tpu.matmul %365, %367, %cst_309 {dimension_numbers = #tpu.dot_dimension_numbers<[1], [0], [0], [1], [0, 0, 1, 1], [], []>} : vector<16x16xbf16>, vector<16x16xbf16>, vector<16x16xf32> -> vector<16x16xf32>
    %369 = arith.addf %363, %368 : vector<16x16xf32>
    %c14_310 = arith.constant 14 : index
    %c0_311 = arith.constant 0 : index
    %370 = vector.load %arg16[%c14_310, %c0_311] : memref<32x16xf32, #tpu.memory_space<vmem>>, vector<16x16xf32>
    %371 = arith.truncf %370 : vector<16x16xf32> to vector<16x16xbf16>
    %c13_312 = arith.constant 13 : index
    %c0_313 = arith.constant 0 : index
    %c0_314 = arith.constant 0 : index
    %372 = vector.load %arg5[%c13_312, %c0_313, %c0_314] : memref<16x16x16xbf16, #tpu.memory_space<vmem>>, vector<1x16x16xbf16>
    %373 = vector.shape_cast %372 : vector<1x16x16xbf16> to vector<16x16xbf16>
    %cst_315 = arith.constant dense<0.000000e+00> : vector<16x16xf32>
    %374 = tpu.matmul %371, %373, %cst_315 {dimension_numbers = #tpu.dot_dimension_numbers<[1], [0], [0], [1], [0, 0, 1, 1], [], []>} : vector<16x16xbf16>, vector<16x16xbf16>, vector<16x16xf32> -> vector<16x16xf32>
    %375 = arith.addf %369, %374 : vector<16x16xf32>
    %c15_316 = arith.constant 15 : index
    %c0_317 = arith.constant 0 : index
    %376 = vector.load %arg16[%c15_316, %c0_317] : memref<32x16xf32, #tpu.memory_space<vmem>>, vector<16x16xf32>
    %377 = arith.truncf %376 : vector<16x16xf32> to vector<16x16xbf16>
    %c14_318 = arith.constant 14 : index
    %c0_319 = arith.constant 0 : index
    %c0_320 = arith.constant 0 : index
    %378 = vector.load %arg5[%c14_318, %c0_319, %c0_320] : memref<16x16x16xbf16, #tpu.memory_space<vmem>>, vector<1x16x16xbf16>
    %379 = vector.shape_cast %378 : vector<1x16x16xbf16> to vector<16x16xbf16>
    %cst_321 = arith.constant dense<0.000000e+00> : vector<16x16xf32>
    %380 = tpu.matmul %377, %379, %cst_321 {dimension_numbers = #tpu.dot_dimension_numbers<[1], [0], [0], [1], [0, 0, 1, 1], [], []>} : vector<16x16xbf16>, vector<16x16xbf16>, vector<16x16xf32> -> vector<16x16xf32>
    %381 = arith.addf %375, %380 : vector<16x16xf32>
    %c16_322 = arith.constant 16 : index
    %c0_323 = arith.constant 0 : index
    %382 = vector.load %arg16[%c16_322, %c0_323] : memref<32x16xf32, #tpu.memory_space<vmem>>, vector<16x16xf32>
    %383 = arith.truncf %382 : vector<16x16xf32> to vector<16x16xbf16>
    %c15_324 = arith.constant 15 : index
    %c0_325 = arith.constant 0 : index
    %c0_326 = arith.constant 0 : index
    %384 = vector.load %arg5[%c15_324, %c0_325, %c0_326] : memref<16x16x16xbf16, #tpu.memory_space<vmem>>, vector<1x16x16xbf16>
    %385 = vector.shape_cast %384 : vector<1x16x16xbf16> to vector<16x16xbf16>
    %cst_327 = arith.constant dense<0.000000e+00> : vector<16x16xf32>
    %386 = tpu.matmul %383, %385, %cst_327 {dimension_numbers = #tpu.dot_dimension_numbers<[1], [0], [0], [1], [0, 0, 1, 1], [], []>} : vector<16x16xbf16>, vector<16x16xbf16>, vector<16x16xf32> -> vector<16x16xf32>
    %387 = arith.addf %381, %386 : vector<16x16xf32>
    %c3_328 = arith.constant 3 : index
    %c0_329 = arith.constant 0 : index
    %388 = vector.load %arg10[%c3_328, %c0_329] : memref<6x64xf32, #tpu.memory_space<vmem>>, vector<1x16xf32>
    %c3_330 = arith.constant 3 : index
    %c0_331 = arith.constant 0 : index
    %389 = vector.load %arg11[%c3_330, %c0_331] : memref<6x64xf32, #tpu.memory_space<vmem>>, vector<1x16xf32>
    %c3_332 = arith.constant 3 : index
    %c0_333 = arith.constant 0 : index
    %390 = vector.load %arg12[%c3_332, %c0_333] : memref<6x64xf32, #tpu.memory_space<vmem>>, vector<1x16xf32>
    %391 = vector.broadcast %388 : vector<1x16xf32> to vector<16x16xf32>
    %392 = arith.addf %387, %391 : vector<16x16xf32>
    %cst_334 = arith.constant 0.000000e+00 : f32
    %393 = vector.broadcast %cst_334 : f32 to vector<16x16xf32>
    %394 = arith.maximumf %392, %393 : vector<16x16xf32>
    %395 = vector.broadcast %389 : vector<1x16xf32> to vector<16x16xf32>
    %396 = arith.mulf %394, %395 : vector<16x16xf32>
    %397 = vector.broadcast %390 : vector<1x16xf32> to vector<16x16xf32>
    %398 = arith.addf %396, %397 : vector<16x16xf32>
    %399 = tpu.iota {dimensions = array<i32: 0>} : vector<8x16xi32>
    %400 = tpu.iota {dimensions = array<i32: 1>} : vector<8x16xi32>
    %c2_i32_335 = arith.constant 2 : i32
    %401 = vector.broadcast %c2_i32_335 : i32 to vector<8x16xi32>
    %402 = arith.muli %401, %399 : vector<8x16xi32>
    %403 = arith.cmpi eq, %400, %402 : vector<8x16xi32>
    %404 = arith.extui %403 : vector<8x16xi1> to vector<8x16xi32>
    %405 = arith.sitofp %404 : vector<8x16xi32> to vector<8x16xf32>
    %cst_336 = arith.constant dense<0.000000e+00> : vector<8x16xf32>
    %406 = tpu.matmul %405, %398, %cst_336 {dimension_numbers = #tpu.dot_dimension_numbers<[1], [0], [0], [1], [0, 0, 1, 1], [], []>} : vector<8x16xf32>, vector<16x16xf32>, vector<8x16xf32> -> vector<8x16xf32>
    %c2_i32_337 = arith.constant 2 : i32
    %407 = vector.broadcast %c2_i32_337 : i32 to vector<8x16xi32>
    %408 = arith.muli %407, %399 : vector<8x16xi32>
    %c1_i32_338 = arith.constant 1 : i32
    %409 = vector.broadcast %c1_i32_338 : i32 to vector<8x16xi32>
    %410 = arith.addi %408, %409 : vector<8x16xi32>
    %411 = arith.cmpi eq, %400, %410 : vector<8x16xi32>
    %412 = arith.extui %411 : vector<8x16xi1> to vector<8x16xi32>
    %413 = arith.sitofp %412 : vector<8x16xi32> to vector<8x16xf32>
    %cst_339 = arith.constant dense<0.000000e+00> : vector<8x16xf32>
    %414 = tpu.matmul %413, %398, %cst_339 {dimension_numbers = #tpu.dot_dimension_numbers<[1], [0], [0], [1], [0, 0, 1, 1], [], []>} : vector<8x16xf32>, vector<16x16xf32>, vector<8x16xf32> -> vector<8x16xf32>
    %415 = arith.maximumf %406, %414 : vector<8x16xf32>
    %cst_340 = arith.constant 0.000000e+00 : f32
    %416 = vector.broadcast %cst_340 : f32 to vector<24x16xf32>
    %c0_341 = arith.constant 0 : index
    %c0_342 = arith.constant 0 : index
    %417 = vector.load %arg17[%c0_341, %c0_342] : memref<24x16xf32, #tpu.memory_space<vmem>>, vector<24x16xf32>
    tpu.vector_store %arg17[%c0_341, %c0_342], %416 {strides = array<i32>} : memref<24x16xf32, #tpu.memory_space<vmem>>, vector<24x16xf32>,
    %c8_343 = arith.constant 8 : index
    %c0_344 = arith.constant 0 : index
    %418 = vector.load %arg17[%c8_343, %c0_344] : memref<24x16xf32, #tpu.memory_space<vmem>>, vector<8x16xf32>
    tpu.vector_store %arg17[%c8_343, %c0_344], %415 {strides = array<i32>} : memref<24x16xf32, #tpu.memory_space<vmem>>, vector<8x16xf32>,
    %cst_345 = arith.constant 0.000000e+00 : f32
    %419 = vector.broadcast %cst_345 : f32 to vector<8x32xf32>
    %c1_346 = arith.constant 1 : index
    %c0_347 = arith.constant 0 : index
    %420 = vector.load %arg17[%c1_346, %c0_347] : memref<24x16xf32, #tpu.memory_space<vmem>>, vector<8x16xf32>
    %421 = arith.truncf %420 : vector<8x16xf32> to vector<8x16xbf16>
    %c0_348 = arith.constant 0 : index
    %c0_349 = arith.constant 0 : index
    %c0_350 = arith.constant 0 : index
    %422 = vector.load %arg6[%c0_348, %c0_349, %c0_350] : memref<16x16x32xbf16, #tpu.memory_space<vmem>>, vector<1x16x32xbf16>
    %423 = vector.shape_cast %422 : vector<1x16x32xbf16> to vector<16x32xbf16>
    %cst_351 = arith.constant dense<0.000000e+00> : vector<8x32xf32>
    %424 = tpu.matmul %421, %423, %cst_351 {dimension_numbers = #tpu.dot_dimension_numbers<[1], [0], [0], [1], [0, 0, 1, 1], [], []>} : vector<8x16xbf16>, vector<16x32xbf16>, vector<8x32xf32> -> vector<8x32xf32>
    %425 = arith.addf %419, %424 : vector<8x32xf32>
    %c2_352 = arith.constant 2 : index
    %c0_353 = arith.constant 0 : index
    %426 = vector.load %arg17[%c2_352, %c0_353] : memref<24x16xf32, #tpu.memory_space<vmem>>, vector<8x16xf32>
    %427 = arith.truncf %426 : vector<8x16xf32> to vector<8x16xbf16>
    %c1_354 = arith.constant 1 : index
    %c0_355 = arith.constant 0 : index
    %c0_356 = arith.constant 0 : index
    %428 = vector.load %arg6[%c1_354, %c0_355, %c0_356] : memref<16x16x32xbf16, #tpu.memory_space<vmem>>, vector<1x16x32xbf16>
    %429 = vector.shape_cast %428 : vector<1x16x32xbf16> to vector<16x32xbf16>
    %cst_357 = arith.constant dense<0.000000e+00> : vector<8x32xf32>
    %430 = tpu.matmul %427, %429, %cst_357 {dimension_numbers = #tpu.dot_dimension_numbers<[1], [0], [0], [1], [0, 0, 1, 1], [], []>} : vector<8x16xbf16>, vector<16x32xbf16>, vector<8x32xf32> -> vector<8x32xf32>
    %431 = arith.addf %425, %430 : vector<8x32xf32>
    %c3_358 = arith.constant 3 : index
    %c0_359 = arith.constant 0 : index
    %432 = vector.load %arg17[%c3_358, %c0_359] : memref<24x16xf32, #tpu.memory_space<vmem>>, vector<8x16xf32>
    %433 = arith.truncf %432 : vector<8x16xf32> to vector<8x16xbf16>
    %c2_360 = arith.constant 2 : index
    %c0_361 = arith.constant 0 : index
    %c0_362 = arith.constant 0 : index
    %434 = vector.load %arg6[%c2_360, %c0_361, %c0_362] : memref<16x16x32xbf16, #tpu.memory_space<vmem>>, vector<1x16x32xbf16>
    %435 = vector.shape_cast %434 : vector<1x16x32xbf16> to vector<16x32xbf16>
    %cst_363 = arith.constant dense<0.000000e+00> : vector<8x32xf32>
    %436 = tpu.matmul %433, %435, %cst_363 {dimension_numbers = #tpu.dot_dimension_numbers<[1], [0], [0], [1], [0, 0, 1, 1], [], []>} : vector<8x16xbf16>, vector<16x32xbf16>, vector<8x32xf32> -> vector<8x32xf32>
    %437 = arith.addf %431, %436 : vector<8x32xf32>
    %c4_364 = arith.constant 4 : index
    %c0_365 = arith.constant 0 : index
    %438 = vector.load %arg17[%c4_364, %c0_365] : memref<24x16xf32, #tpu.memory_space<vmem>>, vector<8x16xf32>
    %439 = arith.truncf %438 : vector<8x16xf32> to vector<8x16xbf16>
    %c3_366 = arith.constant 3 : index
    %c0_367 = arith.constant 0 : index
    %c0_368 = arith.constant 0 : index
    %440 = vector.load %arg6[%c3_366, %c0_367, %c0_368] : memref<16x16x32xbf16, #tpu.memory_space<vmem>>, vector<1x16x32xbf16>
    %441 = vector.shape_cast %440 : vector<1x16x32xbf16> to vector<16x32xbf16>
    %cst_369 = arith.constant dense<0.000000e+00> : vector<8x32xf32>
    %442 = tpu.matmul %439, %441, %cst_369 {dimension_numbers = #tpu.dot_dimension_numbers<[1], [0], [0], [1], [0, 0, 1, 1], [], []>} : vector<8x16xbf16>, vector<16x32xbf16>, vector<8x32xf32> -> vector<8x32xf32>
    %443 = arith.addf %437, %442 : vector<8x32xf32>
    %c5_370 = arith.constant 5 : index
    %c0_371 = arith.constant 0 : index
    %444 = vector.load %arg17[%c5_370, %c0_371] : memref<24x16xf32, #tpu.memory_space<vmem>>, vector<8x16xf32>
    %445 = arith.truncf %444 : vector<8x16xf32> to vector<8x16xbf16>
    %c4_372 = arith.constant 4 : index
    %c0_373 = arith.constant 0 : index
    %c0_374 = arith.constant 0 : index
    %446 = vector.load %arg6[%c4_372, %c0_373, %c0_374] : memref<16x16x32xbf16, #tpu.memory_space<vmem>>, vector<1x16x32xbf16>
    %447 = vector.shape_cast %446 : vector<1x16x32xbf16> to vector<16x32xbf16>
    %cst_375 = arith.constant dense<0.000000e+00> : vector<8x32xf32>
    %448 = tpu.matmul %445, %447, %cst_375 {dimension_numbers = #tpu.dot_dimension_numbers<[1], [0], [0], [1], [0, 0, 1, 1], [], []>} : vector<8x16xbf16>, vector<16x32xbf16>, vector<8x32xf32> -> vector<8x32xf32>
    %449 = arith.addf %443, %448 : vector<8x32xf32>
    %c6_376 = arith.constant 6 : index
    %c0_377 = arith.constant 0 : index
    %450 = vector.load %arg17[%c6_376, %c0_377] : memref<24x16xf32, #tpu.memory_space<vmem>>, vector<8x16xf32>
    %451 = arith.truncf %450 : vector<8x16xf32> to vector<8x16xbf16>
    %c5_378 = arith.constant 5 : index
    %c0_379 = arith.constant 0 : index
    %c0_380 = arith.constant 0 : index
    %452 = vector.load %arg6[%c5_378, %c0_379, %c0_380] : memref<16x16x32xbf16, #tpu.memory_space<vmem>>, vector<1x16x32xbf16>
    %453 = vector.shape_cast %452 : vector<1x16x32xbf16> to vector<16x32xbf16>
    %cst_381 = arith.constant dense<0.000000e+00> : vector<8x32xf32>
    %454 = tpu.matmul %451, %453, %cst_381 {dimension_numbers = #tpu.dot_dimension_numbers<[1], [0], [0], [1], [0, 0, 1, 1], [], []>} : vector<8x16xbf16>, vector<16x32xbf16>, vector<8x32xf32> -> vector<8x32xf32>
    %455 = arith.addf %449, %454 : vector<8x32xf32>
    %c7_382 = arith.constant 7 : index
    %c0_383 = arith.constant 0 : index
    %456 = vector.load %arg17[%c7_382, %c0_383] : memref<24x16xf32, #tpu.memory_space<vmem>>, vector<8x16xf32>
    %457 = arith.truncf %456 : vector<8x16xf32> to vector<8x16xbf16>
    %c6_384 = arith.constant 6 : index
    %c0_385 = arith.constant 0 : index
    %c0_386 = arith.constant 0 : index
    %458 = vector.load %arg6[%c6_384, %c0_385, %c0_386] : memref<16x16x32xbf16, #tpu.memory_space<vmem>>, vector<1x16x32xbf16>
    %459 = vector.shape_cast %458 : vector<1x16x32xbf16> to vector<16x32xbf16>
    %cst_387 = arith.constant dense<0.000000e+00> : vector<8x32xf32>
    %460 = tpu.matmul %457, %459, %cst_387 {dimension_numbers = #tpu.dot_dimension_numbers<[1], [0], [0], [1], [0, 0, 1, 1], [], []>} : vector<8x16xbf16>, vector<16x32xbf16>, vector<8x32xf32> -> vector<8x32xf32>
    %461 = arith.addf %455, %460 : vector<8x32xf32>
    %c8_388 = arith.constant 8 : index
    %c0_389 = arith.constant 0 : index
    %462 = vector.load %arg17[%c8_388, %c0_389] : memref<24x16xf32, #tpu.memory_space<vmem>>, vector<8x16xf32>
    %463 = arith.truncf %462 : vector<8x16xf32> to vector<8x16xbf16>
    %c7_390 = arith.constant 7 : index
    %c0_391 = arith.constant 0 : index
    %c0_392 = arith.constant 0 : index
    %464 = vector.load %arg6[%c7_390, %c0_391, %c0_392] : memref<16x16x32xbf16, #tpu.memory_space<vmem>>, vector<1x16x32xbf16>
    %465 = vector.shape_cast %464 : vector<1x16x32xbf16> to vector<16x32xbf16>
    %cst_393 = arith.constant dense<0.000000e+00> : vector<8x32xf32>
    %466 = tpu.matmul %463, %465, %cst_393 {dimension_numbers = #tpu.dot_dimension_numbers<[1], [0], [0], [1], [0, 0, 1, 1], [], []>} : vector<8x16xbf16>, vector<16x32xbf16>, vector<8x32xf32> -> vector<8x32xf32>
    %467 = arith.addf %461, %466 : vector<8x32xf32>
    %c9_394 = arith.constant 9 : index
    %c0_395 = arith.constant 0 : index
    %468 = vector.load %arg17[%c9_394, %c0_395] : memref<24x16xf32, #tpu.memory_space<vmem>>, vector<8x16xf32>
    %469 = arith.truncf %468 : vector<8x16xf32> to vector<8x16xbf16>
    %c8_396 = arith.constant 8 : index
    %c0_397 = arith.constant 0 : index
    %c0_398 = arith.constant 0 : index
    %470 = vector.load %arg6[%c8_396, %c0_397, %c0_398] : memref<16x16x32xbf16, #tpu.memory_space<vmem>>, vector<1x16x32xbf16>
    %471 = vector.shape_cast %470 : vector<1x16x32xbf16> to vector<16x32xbf16>
    %cst_399 = arith.constant dense<0.000000e+00> : vector<8x32xf32>
    %472 = tpu.matmul %469, %471, %cst_399 {dimension_numbers = #tpu.dot_dimension_numbers<[1], [0], [0], [1], [0, 0, 1, 1], [], []>} : vector<8x16xbf16>, vector<16x32xbf16>, vector<8x32xf32> -> vector<8x32xf32>
    %473 = arith.addf %467, %472 : vector<8x32xf32>
    %c10_400 = arith.constant 10 : index
    %c0_401 = arith.constant 0 : index
    %474 = vector.load %arg17[%c10_400, %c0_401] : memref<24x16xf32, #tpu.memory_space<vmem>>, vector<8x16xf32>
    %475 = arith.truncf %474 : vector<8x16xf32> to vector<8x16xbf16>
    %c9_402 = arith.constant 9 : index
    %c0_403 = arith.constant 0 : index
    %c0_404 = arith.constant 0 : index
    %476 = vector.load %arg6[%c9_402, %c0_403, %c0_404] : memref<16x16x32xbf16, #tpu.memory_space<vmem>>, vector<1x16x32xbf16>
    %477 = vector.shape_cast %476 : vector<1x16x32xbf16> to vector<16x32xbf16>
    %cst_405 = arith.constant dense<0.000000e+00> : vector<8x32xf32>
    %478 = tpu.matmul %475, %477, %cst_405 {dimension_numbers = #tpu.dot_dimension_numbers<[1], [0], [0], [1], [0, 0, 1, 1], [], []>} : vector<8x16xbf16>, vector<16x32xbf16>, vector<8x32xf32> -> vector<8x32xf32>
    %479 = arith.addf %473, %478 : vector<8x32xf32>
    %c11_406 = arith.constant 11 : index
    %c0_407 = arith.constant 0 : index
    %480 = vector.load %arg17[%c11_406, %c0_407] : memref<24x16xf32, #tpu.memory_space<vmem>>, vector<8x16xf32>
    %481 = arith.truncf %480 : vector<8x16xf32> to vector<8x16xbf16>
    %c10_408 = arith.constant 10 : index
    %c0_409 = arith.constant 0 : index
    %c0_410 = arith.constant 0 : index
    %482 = vector.load %arg6[%c10_408, %c0_409, %c0_410] : memref<16x16x32xbf16, #tpu.memory_space<vmem>>, vector<1x16x32xbf16>
    %483 = vector.shape_cast %482 : vector<1x16x32xbf16> to vector<16x32xbf16>
    %cst_411 = arith.constant dense<0.000000e+00> : vector<8x32xf32>
    %484 = tpu.matmul %481, %483, %cst_411 {dimension_numbers = #tpu.dot_dimension_numbers<[1], [0], [0], [1], [0, 0, 1, 1], [], []>} : vector<8x16xbf16>, vector<16x32xbf16>, vector<8x32xf32> -> vector<8x32xf32>
    %485 = arith.addf %479, %484 : vector<8x32xf32>
    %c12_412 = arith.constant 12 : index
    %c0_413 = arith.constant 0 : index
    %486 = vector.load %arg17[%c12_412, %c0_413] : memref<24x16xf32, #tpu.memory_space<vmem>>, vector<8x16xf32>
    %487 = arith.truncf %486 : vector<8x16xf32> to vector<8x16xbf16>
    %c11_414 = arith.constant 11 : index
    %c0_415 = arith.constant 0 : index
    %c0_416 = arith.constant 0 : index
    %488 = vector.load %arg6[%c11_414, %c0_415, %c0_416] : memref<16x16x32xbf16, #tpu.memory_space<vmem>>, vector<1x16x32xbf16>
    %489 = vector.shape_cast %488 : vector<1x16x32xbf16> to vector<16x32xbf16>
    %cst_417 = arith.constant dense<0.000000e+00> : vector<8x32xf32>
    %490 = tpu.matmul %487, %489, %cst_417 {dimension_numbers = #tpu.dot_dimension_numbers<[1], [0], [0], [1], [0, 0, 1, 1], [], []>} : vector<8x16xbf16>, vector<16x32xbf16>, vector<8x32xf32> -> vector<8x32xf32>
    %491 = arith.addf %485, %490 : vector<8x32xf32>
    %c13_418 = arith.constant 13 : index
    %c0_419 = arith.constant 0 : index
    %492 = vector.load %arg17[%c13_418, %c0_419] : memref<24x16xf32, #tpu.memory_space<vmem>>, vector<8x16xf32>
    %493 = arith.truncf %492 : vector<8x16xf32> to vector<8x16xbf16>
    %c12_420 = arith.constant 12 : index
    %c0_421 = arith.constant 0 : index
    %c0_422 = arith.constant 0 : index
    %494 = vector.load %arg6[%c12_420, %c0_421, %c0_422] : memref<16x16x32xbf16, #tpu.memory_space<vmem>>, vector<1x16x32xbf16>
    %495 = vector.shape_cast %494 : vector<1x16x32xbf16> to vector<16x32xbf16>
    %cst_423 = arith.constant dense<0.000000e+00> : vector<8x32xf32>
    %496 = tpu.matmul %493, %495, %cst_423 {dimension_numbers = #tpu.dot_dimension_numbers<[1], [0], [0], [1], [0, 0, 1, 1], [], []>} : vector<8x16xbf16>, vector<16x32xbf16>, vector<8x32xf32> -> vector<8x32xf32>
    %497 = arith.addf %491, %496 : vector<8x32xf32>
    %c14_424 = arith.constant 14 : index
    %c0_425 = arith.constant 0 : index
    %498 = vector.load %arg17[%c14_424, %c0_425] : memref<24x16xf32, #tpu.memory_space<vmem>>, vector<8x16xf32>
    %499 = arith.truncf %498 : vector<8x16xf32> to vector<8x16xbf16>
    %c13_426 = arith.constant 13 : index
    %c0_427 = arith.constant 0 : index
    %c0_428 = arith.constant 0 : index
    %500 = vector.load %arg6[%c13_426, %c0_427, %c0_428] : memref<16x16x32xbf16, #tpu.memory_space<vmem>>, vector<1x16x32xbf16>
    %501 = vector.shape_cast %500 : vector<1x16x32xbf16> to vector<16x32xbf16>
    %cst_429 = arith.constant dense<0.000000e+00> : vector<8x32xf32>
    %502 = tpu.matmul %499, %501, %cst_429 {dimension_numbers = #tpu.dot_dimension_numbers<[1], [0], [0], [1], [0, 0, 1, 1], [], []>} : vector<8x16xbf16>, vector<16x32xbf16>, vector<8x32xf32> -> vector<8x32xf32>
    %503 = arith.addf %497, %502 : vector<8x32xf32>
    %c15_430 = arith.constant 15 : index
    %c0_431 = arith.constant 0 : index
    %504 = vector.load %arg17[%c15_430, %c0_431] : memref<24x16xf32, #tpu.memory_space<vmem>>, vector<8x16xf32>
    %505 = arith.truncf %504 : vector<8x16xf32> to vector<8x16xbf16>
    %c14_432 = arith.constant 14 : index
    %c0_433 = arith.constant 0 : index
    %c0_434 = arith.constant 0 : index
    %506 = vector.load %arg6[%c14_432, %c0_433, %c0_434] : memref<16x16x32xbf16, #tpu.memory_space<vmem>>, vector<1x16x32xbf16>
    %507 = vector.shape_cast %506 : vector<1x16x32xbf16> to vector<16x32xbf16>
    %cst_435 = arith.constant dense<0.000000e+00> : vector<8x32xf32>
    %508 = tpu.matmul %505, %507, %cst_435 {dimension_numbers = #tpu.dot_dimension_numbers<[1], [0], [0], [1], [0, 0, 1, 1], [], []>} : vector<8x16xbf16>, vector<16x32xbf16>, vector<8x32xf32> -> vector<8x32xf32>
    %509 = arith.addf %503, %508 : vector<8x32xf32>
    %c16_436 = arith.constant 16 : index
    %c0_437 = arith.constant 0 : index
    %510 = vector.load %arg17[%c16_436, %c0_437] : memref<24x16xf32, #tpu.memory_space<vmem>>, vector<8x16xf32>
    %511 = arith.truncf %510 : vector<8x16xf32> to vector<8x16xbf16>
    %c15_438 = arith.constant 15 : index
    %c0_439 = arith.constant 0 : index
    %c0_440 = arith.constant 0 : index
    %512 = vector.load %arg6[%c15_438, %c0_439, %c0_440] : memref<16x16x32xbf16, #tpu.memory_space<vmem>>, vector<1x16x32xbf16>
    %513 = vector.shape_cast %512 : vector<1x16x32xbf16> to vector<16x32xbf16>
    %cst_441 = arith.constant dense<0.000000e+00> : vector<8x32xf32>
    %514 = tpu.matmul %511, %513, %cst_441 {dimension_numbers = #tpu.dot_dimension_numbers<[1], [0], [0], [1], [0, 0, 1, 1], [], []>} : vector<8x16xbf16>, vector<16x32xbf16>, vector<8x32xf32> -> vector<8x32xf32>
    %515 = arith.addf %509, %514 : vector<8x32xf32>
    %c4_442 = arith.constant 4 : index
    %c0_443 = arith.constant 0 : index
    %516 = vector.load %arg10[%c4_442, %c0_443] : memref<6x64xf32, #tpu.memory_space<vmem>>, vector<1x32xf32>
    %c4_444 = arith.constant 4 : index
    %c0_445 = arith.constant 0 : index
    %517 = vector.load %arg11[%c4_444, %c0_445] : memref<6x64xf32, #tpu.memory_space<vmem>>, vector<1x32xf32>
    %c4_446 = arith.constant 4 : index
    %c0_447 = arith.constant 0 : index
    %518 = vector.load %arg12[%c4_446, %c0_447] : memref<6x64xf32, #tpu.memory_space<vmem>>, vector<1x32xf32>
    %519 = vector.broadcast %516 : vector<1x32xf32> to vector<8x32xf32>
    %520 = arith.addf %515, %519 : vector<8x32xf32>
    %cst_448 = arith.constant 0.000000e+00 : f32
    %521 = vector.broadcast %cst_448 : f32 to vector<8x32xf32>
    %522 = arith.maximumf %520, %521 : vector<8x32xf32>
    %523 = vector.broadcast %517 : vector<1x32xf32> to vector<8x32xf32>
    %524 = arith.mulf %522, %523 : vector<8x32xf32>
    %525 = vector.broadcast %518 : vector<1x32xf32> to vector<8x32xf32>
    %526 = arith.addf %524, %525 : vector<8x32xf32>
    %527 = tpu.iota {dimensions = array<i32: 0>} : vector<4x8xi32>
    %528 = tpu.iota {dimensions = array<i32: 1>} : vector<4x8xi32>
    %c2_i32_449 = arith.constant 2 : i32
    %529 = vector.broadcast %c2_i32_449 : i32 to vector<4x8xi32>
    %530 = arith.muli %529, %527 : vector<4x8xi32>
    %531 = arith.cmpi eq, %528, %530 : vector<4x8xi32>
    %532 = arith.extui %531 : vector<4x8xi1> to vector<4x8xi32>
    %533 = arith.sitofp %532 : vector<4x8xi32> to vector<4x8xf32>
    %cst_450 = arith.constant dense<0.000000e+00> : vector<4x32xf32>
    %534 = tpu.matmul %533, %526, %cst_450 {dimension_numbers = #tpu.dot_dimension_numbers<[1], [0], [0], [1], [0, 0, 1, 1], [], []>} : vector<4x8xf32>, vector<8x32xf32>, vector<4x32xf32> -> vector<4x32xf32>
    %c2_i32_451 = arith.constant 2 : i32
    %535 = vector.broadcast %c2_i32_451 : i32 to vector<4x8xi32>
    %536 = arith.muli %535, %527 : vector<4x8xi32>
    %c1_i32_452 = arith.constant 1 : i32
    %537 = vector.broadcast %c1_i32_452 : i32 to vector<4x8xi32>
    %538 = arith.addi %536, %537 : vector<4x8xi32>
    %539 = arith.cmpi eq, %528, %538 : vector<4x8xi32>
    %540 = arith.extui %539 : vector<4x8xi1> to vector<4x8xi32>
    %541 = arith.sitofp %540 : vector<4x8xi32> to vector<4x8xf32>
    %cst_453 = arith.constant dense<0.000000e+00> : vector<4x32xf32>
    %542 = tpu.matmul %541, %526, %cst_453 {dimension_numbers = #tpu.dot_dimension_numbers<[1], [0], [0], [1], [0, 0, 1, 1], [], []>} : vector<4x8xf32>, vector<8x32xf32>, vector<4x32xf32> -> vector<4x32xf32>
    %543 = arith.maximumf %534, %542 : vector<4x32xf32>
    %cst_454 = arith.constant 0.000000e+00 : f32
    %544 = vector.broadcast %cst_454 : f32 to vector<20x32xf32>
    %c0_455 = arith.constant 0 : index
    %c0_456 = arith.constant 0 : index
    %545 = vector.load %arg18[%c0_455, %c0_456] : memref<20x32xf32, #tpu.memory_space<vmem>>, vector<20x32xf32>
    tpu.vector_store %arg18[%c0_455, %c0_456], %544 {strides = array<i32>} : memref<20x32xf32, #tpu.memory_space<vmem>>, vector<20x32xf32>,
    %c8_457 = arith.constant 8 : index
    %c0_458 = arith.constant 0 : index
    %546 = vector.load %arg18[%c8_457, %c0_458] : memref<20x32xf32, #tpu.memory_space<vmem>>, vector<4x32xf32>
    tpu.vector_store %arg18[%c8_457, %c0_458], %543 {strides = array<i32>} : memref<20x32xf32, #tpu.memory_space<vmem>>, vector<4x32xf32>,
    %cst_459 = arith.constant 0.000000e+00 : f32
    %547 = vector.broadcast %cst_459 : f32 to vector<4x64xf32>
    %c1_460 = arith.constant 1 : index
    %c0_461 = arith.constant 0 : index
    %548 = vector.load %arg18[%c1_460, %c0_461] : memref<20x32xf32, #tpu.memory_space<vmem>>, vector<4x32xf32>
    %549 = arith.truncf %548 : vector<4x32xf32> to vector<4x32xbf16>
    %c0_462 = arith.constant 0 : index
    %c0_463 = arith.constant 0 : index
    %c0_464 = arith.constant 0 : index
    %550 = vector.load %arg7[%c0_462, %c0_463, %c0_464] : memref<16x32x64xbf16, #tpu.memory_space<vmem>>, vector<1x32x64xbf16>
    %551 = vector.shape_cast %550 : vector<1x32x64xbf16> to vector<32x64xbf16>
    %cst_465 = arith.constant dense<0.000000e+00> : vector<4x64xf32>
    %552 = tpu.matmul %549, %551, %cst_465 {dimension_numbers = #tpu.dot_dimension_numbers<[1], [0], [0], [1], [0, 0, 1, 1], [], []>} : vector<4x32xbf16>, vector<32x64xbf16>, vector<4x64xf32> -> vector<4x64xf32>
    %553 = arith.addf %547, %552 : vector<4x64xf32>
    %c2_466 = arith.constant 2 : index
    %c0_467 = arith.constant 0 : index
    %554 = vector.load %arg18[%c2_466, %c0_467] : memref<20x32xf32, #tpu.memory_space<vmem>>, vector<4x32xf32>
    %555 = arith.truncf %554 : vector<4x32xf32> to vector<4x32xbf16>
    %c1_468 = arith.constant 1 : index
    %c0_469 = arith.constant 0 : index
    %c0_470 = arith.constant 0 : index
    %556 = vector.load %arg7[%c1_468, %c0_469, %c0_470] : memref<16x32x64xbf16, #tpu.memory_space<vmem>>, vector<1x32x64xbf16>
    %557 = vector.shape_cast %556 : vector<1x32x64xbf16> to vector<32x64xbf16>
    %cst_471 = arith.constant dense<0.000000e+00> : vector<4x64xf32>
    %558 = tpu.matmul %555, %557, %cst_471 {dimension_numbers = #tpu.dot_dimension_numbers<[1], [0], [0], [1], [0, 0, 1, 1], [], []>} : vector<4x32xbf16>, vector<32x64xbf16>, vector<4x64xf32> -> vector<4x64xf32>
    %559 = arith.addf %553, %558 : vector<4x64xf32>
    %c3_472 = arith.constant 3 : index
    %c0_473 = arith.constant 0 : index
    %560 = vector.load %arg18[%c3_472, %c0_473] : memref<20x32xf32, #tpu.memory_space<vmem>>, vector<4x32xf32>
    %561 = arith.truncf %560 : vector<4x32xf32> to vector<4x32xbf16>
    %c2_474 = arith.constant 2 : index
    %c0_475 = arith.constant 0 : index
    %c0_476 = arith.constant 0 : index
    %562 = vector.load %arg7[%c2_474, %c0_475, %c0_476] : memref<16x32x64xbf16, #tpu.memory_space<vmem>>, vector<1x32x64xbf16>
    %563 = vector.shape_cast %562 : vector<1x32x64xbf16> to vector<32x64xbf16>
    %cst_477 = arith.constant dense<0.000000e+00> : vector<4x64xf32>
    %564 = tpu.matmul %561, %563, %cst_477 {dimension_numbers = #tpu.dot_dimension_numbers<[1], [0], [0], [1], [0, 0, 1, 1], [], []>} : vector<4x32xbf16>, vector<32x64xbf16>, vector<4x64xf32> -> vector<4x64xf32>
    %565 = arith.addf %559, %564 : vector<4x64xf32>
    %c4_478 = arith.constant 4 : index
    %c0_479 = arith.constant 0 : index
    %566 = vector.load %arg18[%c4_478, %c0_479] : memref<20x32xf32, #tpu.memory_space<vmem>>, vector<4x32xf32>
    %567 = arith.truncf %566 : vector<4x32xf32> to vector<4x32xbf16>
    %c3_480 = arith.constant 3 : index
    %c0_481 = arith.constant 0 : index
    %c0_482 = arith.constant 0 : index
    %568 = vector.load %arg7[%c3_480, %c0_481, %c0_482] : memref<16x32x64xbf16, #tpu.memory_space<vmem>>, vector<1x32x64xbf16>
    %569 = vector.shape_cast %568 : vector<1x32x64xbf16> to vector<32x64xbf16>
    %cst_483 = arith.constant dense<0.000000e+00> : vector<4x64xf32>
    %570 = tpu.matmul %567, %569, %cst_483 {dimension_numbers = #tpu.dot_dimension_numbers<[1], [0], [0], [1], [0, 0, 1, 1], [], []>} : vector<4x32xbf16>, vector<32x64xbf16>, vector<4x64xf32> -> vector<4x64xf32>
    %571 = arith.addf %565, %570 : vector<4x64xf32>
    %c5_484 = arith.constant 5 : index
    %c0_485 = arith.constant 0 : index
    %572 = vector.load %arg18[%c5_484, %c0_485] : memref<20x32xf32, #tpu.memory_space<vmem>>, vector<4x32xf32>
    %573 = arith.truncf %572 : vector<4x32xf32> to vector<4x32xbf16>
    %c4_486 = arith.constant 4 : index
    %c0_487 = arith.constant 0 : index
    %c0_488 = arith.constant 0 : index
    %574 = vector.load %arg7[%c4_486, %c0_487, %c0_488] : memref<16x32x64xbf16, #tpu.memory_space<vmem>>, vector<1x32x64xbf16>
    %575 = vector.shape_cast %574 : vector<1x32x64xbf16> to vector<32x64xbf16>
    %cst_489 = arith.constant dense<0.000000e+00> : vector<4x64xf32>
    %576 = tpu.matmul %573, %575, %cst_489 {dimension_numbers = #tpu.dot_dimension_numbers<[1], [0], [0], [1], [0, 0, 1, 1], [], []>} : vector<4x32xbf16>, vector<32x64xbf16>, vector<4x64xf32> -> vector<4x64xf32>
    %577 = arith.addf %571, %576 : vector<4x64xf32>
    %c6_490 = arith.constant 6 : index
    %c0_491 = arith.constant 0 : index
    %578 = vector.load %arg18[%c6_490, %c0_491] : memref<20x32xf32, #tpu.memory_space<vmem>>, vector<4x32xf32>
    %579 = arith.truncf %578 : vector<4x32xf32> to vector<4x32xbf16>
    %c5_492 = arith.constant 5 : index
    %c0_493 = arith.constant 0 : index
    %c0_494 = arith.constant 0 : index
    %580 = vector.load %arg7[%c5_492, %c0_493, %c0_494] : memref<16x32x64xbf16, #tpu.memory_space<vmem>>, vector<1x32x64xbf16>
    %581 = vector.shape_cast %580 : vector<1x32x64xbf16> to vector<32x64xbf16>
    %cst_495 = arith.constant dense<0.000000e+00> : vector<4x64xf32>
    %582 = tpu.matmul %579, %581, %cst_495 {dimension_numbers = #tpu.dot_dimension_numbers<[1], [0], [0], [1], [0, 0, 1, 1], [], []>} : vector<4x32xbf16>, vector<32x64xbf16>, vector<4x64xf32> -> vector<4x64xf32>
    %583 = arith.addf %577, %582 : vector<4x64xf32>
    %c7_496 = arith.constant 7 : index
    %c0_497 = arith.constant 0 : index
    %584 = vector.load %arg18[%c7_496, %c0_497] : memref<20x32xf32, #tpu.memory_space<vmem>>, vector<4x32xf32>
    %585 = arith.truncf %584 : vector<4x32xf32> to vector<4x32xbf16>
    %c6_498 = arith.constant 6 : index
    %c0_499 = arith.constant 0 : index
    %c0_500 = arith.constant 0 : index
    %586 = vector.load %arg7[%c6_498, %c0_499, %c0_500] : memref<16x32x64xbf16, #tpu.memory_space<vmem>>, vector<1x32x64xbf16>
    %587 = vector.shape_cast %586 : vector<1x32x64xbf16> to vector<32x64xbf16>
    %cst_501 = arith.constant dense<0.000000e+00> : vector<4x64xf32>
    %588 = tpu.matmul %585, %587, %cst_501 {dimension_numbers = #tpu.dot_dimension_numbers<[1], [0], [0], [1], [0, 0, 1, 1], [], []>} : vector<4x32xbf16>, vector<32x64xbf16>, vector<4x64xf32> -> vector<4x64xf32>
    %589 = arith.addf %583, %588 : vector<4x64xf32>
    %c8_502 = arith.constant 8 : index
    %c0_503 = arith.constant 0 : index
    %590 = vector.load %arg18[%c8_502, %c0_503] : memref<20x32xf32, #tpu.memory_space<vmem>>, vector<4x32xf32>
    %591 = arith.truncf %590 : vector<4x32xf32> to vector<4x32xbf16>
    %c7_504 = arith.constant 7 : index
    %c0_505 = arith.constant 0 : index
    %c0_506 = arith.constant 0 : index
    %592 = vector.load %arg7[%c7_504, %c0_505, %c0_506] : memref<16x32x64xbf16, #tpu.memory_space<vmem>>, vector<1x32x64xbf16>
    %593 = vector.shape_cast %592 : vector<1x32x64xbf16> to vector<32x64xbf16>
    %cst_507 = arith.constant dense<0.000000e+00> : vector<4x64xf32>
    %594 = tpu.matmul %591, %593, %cst_507 {dimension_numbers = #tpu.dot_dimension_numbers<[1], [0], [0], [1], [0, 0, 1, 1], [], []>} : vector<4x32xbf16>, vector<32x64xbf16>, vector<4x64xf32> -> vector<4x64xf32>
    %595 = arith.addf %589, %594 : vector<4x64xf32>
    %c9_508 = arith.constant 9 : index
    %c0_509 = arith.constant 0 : index
    %596 = vector.load %arg18[%c9_508, %c0_509] : memref<20x32xf32, #tpu.memory_space<vmem>>, vector<4x32xf32>
    %597 = arith.truncf %596 : vector<4x32xf32> to vector<4x32xbf16>
    %c8_510 = arith.constant 8 : index
    %c0_511 = arith.constant 0 : index
    %c0_512 = arith.constant 0 : index
    %598 = vector.load %arg7[%c8_510, %c0_511, %c0_512] : memref<16x32x64xbf16, #tpu.memory_space<vmem>>, vector<1x32x64xbf16>
    %599 = vector.shape_cast %598 : vector<1x32x64xbf16> to vector<32x64xbf16>
    %cst_513 = arith.constant dense<0.000000e+00> : vector<4x64xf32>
    %600 = tpu.matmul %597, %599, %cst_513 {dimension_numbers = #tpu.dot_dimension_numbers<[1], [0], [0], [1], [0, 0, 1, 1], [], []>} : vector<4x32xbf16>, vector<32x64xbf16>, vector<4x64xf32> -> vector<4x64xf32>
    %601 = arith.addf %595, %600 : vector<4x64xf32>
    %c10_514 = arith.constant 10 : index
    %c0_515 = arith.constant 0 : index
    %602 = vector.load %arg18[%c10_514, %c0_515] : memref<20x32xf32, #tpu.memory_space<vmem>>, vector<4x32xf32>
    %603 = arith.truncf %602 : vector<4x32xf32> to vector<4x32xbf16>
    %c9_516 = arith.constant 9 : index
    %c0_517 = arith.constant 0 : index
    %c0_518 = arith.constant 0 : index
    %604 = vector.load %arg7[%c9_516, %c0_517, %c0_518] : memref<16x32x64xbf16, #tpu.memory_space<vmem>>, vector<1x32x64xbf16>
    %605 = vector.shape_cast %604 : vector<1x32x64xbf16> to vector<32x64xbf16>
    %cst_519 = arith.constant dense<0.000000e+00> : vector<4x64xf32>
    %606 = tpu.matmul %603, %605, %cst_519 {dimension_numbers = #tpu.dot_dimension_numbers<[1], [0], [0], [1], [0, 0, 1, 1], [], []>} : vector<4x32xbf16>, vector<32x64xbf16>, vector<4x64xf32> -> vector<4x64xf32>
    %607 = arith.addf %601, %606 : vector<4x64xf32>
    %c11_520 = arith.constant 11 : index
    %c0_521 = arith.constant 0 : index
    %608 = vector.load %arg18[%c11_520, %c0_521] : memref<20x32xf32, #tpu.memory_space<vmem>>, vector<4x32xf32>
    %609 = arith.truncf %608 : vector<4x32xf32> to vector<4x32xbf16>
    %c10_522 = arith.constant 10 : index
    %c0_523 = arith.constant 0 : index
    %c0_524 = arith.constant 0 : index
    %610 = vector.load %arg7[%c10_522, %c0_523, %c0_524] : memref<16x32x64xbf16, #tpu.memory_space<vmem>>, vector<1x32x64xbf16>
    %611 = vector.shape_cast %610 : vector<1x32x64xbf16> to vector<32x64xbf16>
    %cst_525 = arith.constant dense<0.000000e+00> : vector<4x64xf32>
    %612 = tpu.matmul %609, %611, %cst_525 {dimension_numbers = #tpu.dot_dimension_numbers<[1], [0], [0], [1], [0, 0, 1, 1], [], []>} : vector<4x32xbf16>, vector<32x64xbf16>, vector<4x64xf32> -> vector<4x64xf32>
    %613 = arith.addf %607, %612 : vector<4x64xf32>
    %c12_526 = arith.constant 12 : index
    %c0_527 = arith.constant 0 : index
    %614 = vector.load %arg18[%c12_526, %c0_527] : memref<20x32xf32, #tpu.memory_space<vmem>>, vector<4x32xf32>
    %615 = arith.truncf %614 : vector<4x32xf32> to vector<4x32xbf16>
    %c11_528 = arith.constant 11 : index
    %c0_529 = arith.constant 0 : index
    %c0_530 = arith.constant 0 : index
    %616 = vector.load %arg7[%c11_528, %c0_529, %c0_530] : memref<16x32x64xbf16, #tpu.memory_space<vmem>>, vector<1x32x64xbf16>
    %617 = vector.shape_cast %616 : vector<1x32x64xbf16> to vector<32x64xbf16>
    %cst_531 = arith.constant dense<0.000000e+00> : vector<4x64xf32>
    %618 = tpu.matmul %615, %617, %cst_531 {dimension_numbers = #tpu.dot_dimension_numbers<[1], [0], [0], [1], [0, 0, 1, 1], [], []>} : vector<4x32xbf16>, vector<32x64xbf16>, vector<4x64xf32> -> vector<4x64xf32>
    %619 = arith.addf %613, %618 : vector<4x64xf32>
    %c13_532 = arith.constant 13 : index
    %c0_533 = arith.constant 0 : index
    %620 = vector.load %arg18[%c13_532, %c0_533] : memref<20x32xf32, #tpu.memory_space<vmem>>, vector<4x32xf32>
    %621 = arith.truncf %620 : vector<4x32xf32> to vector<4x32xbf16>
    %c12_534 = arith.constant 12 : index
    %c0_535 = arith.constant 0 : index
    %c0_536 = arith.constant 0 : index
    %622 = vector.load %arg7[%c12_534, %c0_535, %c0_536] : memref<16x32x64xbf16, #tpu.memory_space<vmem>>, vector<1x32x64xbf16>
    %623 = vector.shape_cast %622 : vector<1x32x64xbf16> to vector<32x64xbf16>
    %cst_537 = arith.constant dense<0.000000e+00> : vector<4x64xf32>
    %624 = tpu.matmul %621, %623, %cst_537 {dimension_numbers = #tpu.dot_dimension_numbers<[1], [0], [0], [1], [0, 0, 1, 1], [], []>} : vector<4x32xbf16>, vector<32x64xbf16>, vector<4x64xf32> -> vector<4x64xf32>
    %625 = arith.addf %619, %624 : vector<4x64xf32>
    %c14_538 = arith.constant 14 : index
    %c0_539 = arith.constant 0 : index
    %626 = vector.load %arg18[%c14_538, %c0_539] : memref<20x32xf32, #tpu.memory_space<vmem>>, vector<4x32xf32>
    %627 = arith.truncf %626 : vector<4x32xf32> to vector<4x32xbf16>
    %c13_540 = arith.constant 13 : index
    %c0_541 = arith.constant 0 : index
    %c0_542 = arith.constant 0 : index
    %628 = vector.load %arg7[%c13_540, %c0_541, %c0_542] : memref<16x32x64xbf16, #tpu.memory_space<vmem>>, vector<1x32x64xbf16>
    %629 = vector.shape_cast %628 : vector<1x32x64xbf16> to vector<32x64xbf16>
    %cst_543 = arith.constant dense<0.000000e+00> : vector<4x64xf32>
    %630 = tpu.matmul %627, %629, %cst_543 {dimension_numbers = #tpu.dot_dimension_numbers<[1], [0], [0], [1], [0, 0, 1, 1], [], []>} : vector<4x32xbf16>, vector<32x64xbf16>, vector<4x64xf32> -> vector<4x64xf32>
    %631 = arith.addf %625, %630 : vector<4x64xf32>
    %c15_544 = arith.constant 15 : index
    %c0_545 = arith.constant 0 : index
    %632 = vector.load %arg18[%c15_544, %c0_545] : memref<20x32xf32, #tpu.memory_space<vmem>>, vector<4x32xf32>
    %633 = arith.truncf %632 : vector<4x32xf32> to vector<4x32xbf16>
    %c14_546 = arith.constant 14 : index
    %c0_547 = arith.constant 0 : index
    %c0_548 = arith.constant 0 : index
    %634 = vector.load %arg7[%c14_546, %c0_547, %c0_548] : memref<16x32x64xbf16, #tpu.memory_space<vmem>>, vector<1x32x64xbf16>
    %635 = vector.shape_cast %634 : vector<1x32x64xbf16> to vector<32x64xbf16>
    %cst_549 = arith.constant dense<0.000000e+00> : vector<4x64xf32>
    %636 = tpu.matmul %633, %635, %cst_549 {dimension_numbers = #tpu.dot_dimension_numbers<[1], [0], [0], [1], [0, 0, 1, 1], [], []>} : vector<4x32xbf16>, vector<32x64xbf16>, vector<4x64xf32> -> vector<4x64xf32>
    %637 = arith.addf %631, %636 : vector<4x64xf32>
    %c16_550 = arith.constant 16 : index
    %c0_551 = arith.constant 0 : index
    %638 = vector.load %arg18[%c16_550, %c0_551] : memref<20x32xf32, #tpu.memory_space<vmem>>, vector<4x32xf32>
    %639 = arith.truncf %638 : vector<4x32xf32> to vector<4x32xbf16>
    %c15_552 = arith.constant 15 : index
    %c0_553 = arith.constant 0 : index
    %c0_554 = arith.constant 0 : index
    %640 = vector.load %arg7[%c15_552, %c0_553, %c0_554] : memref<16x32x64xbf16, #tpu.memory_space<vmem>>, vector<1x32x64xbf16>
    %641 = vector.shape_cast %640 : vector<1x32x64xbf16> to vector<32x64xbf16>
    %cst_555 = arith.constant dense<0.000000e+00> : vector<4x64xf32>
    %642 = tpu.matmul %639, %641, %cst_555 {dimension_numbers = #tpu.dot_dimension_numbers<[1], [0], [0], [1], [0, 0, 1, 1], [], []>} : vector<4x32xbf16>, vector<32x64xbf16>, vector<4x64xf32> -> vector<4x64xf32>
    %643 = arith.addf %637, %642 : vector<4x64xf32>
    %c5_556 = arith.constant 5 : index
    %c0_557 = arith.constant 0 : index
    %644 = vector.load %arg10[%c5_556, %c0_557] : memref<6x64xf32, #tpu.memory_space<vmem>>, vector<1x64xf32>
    %c5_558 = arith.constant 5 : index
    %c0_559 = arith.constant 0 : index
    %645 = vector.load %arg11[%c5_558, %c0_559] : memref<6x64xf32, #tpu.memory_space<vmem>>, vector<1x64xf32>
    %c5_560 = arith.constant 5 : index
    %c0_561 = arith.constant 0 : index
    %646 = vector.load %arg12[%c5_560, %c0_561] : memref<6x64xf32, #tpu.memory_space<vmem>>, vector<1x64xf32>
    %647 = vector.broadcast %644 : vector<1x64xf32> to vector<4x64xf32>
    %648 = arith.addf %643, %647 : vector<4x64xf32>
    %cst_562 = arith.constant 0.000000e+00 : f32
    %649 = vector.broadcast %cst_562 : f32 to vector<4x64xf32>
    %650 = arith.maximumf %648, %649 : vector<4x64xf32>
    %651 = vector.broadcast %645 : vector<1x64xf32> to vector<4x64xf32>
    %652 = arith.mulf %650, %651 : vector<4x64xf32>
    %653 = vector.broadcast %646 : vector<1x64xf32> to vector<4x64xf32>
    %654 = arith.addf %652, %653 : vector<4x64xf32>
    %655 = tpu.iota {dimensions = array<i32: 0>} : vector<2x4xi32>
    %656 = tpu.iota {dimensions = array<i32: 1>} : vector<2x4xi32>
    %c2_i32_563 = arith.constant 2 : i32
    %657 = vector.broadcast %c2_i32_563 : i32 to vector<2x4xi32>
    %658 = arith.muli %657, %655 : vector<2x4xi32>
    %659 = arith.cmpi eq, %656, %658 : vector<2x4xi32>
    %660 = arith.extui %659 : vector<2x4xi1> to vector<2x4xi32>
    %661 = arith.sitofp %660 : vector<2x4xi32> to vector<2x4xf32>
    %cst_564 = arith.constant dense<0.000000e+00> : vector<2x64xf32>
    %662 = tpu.matmul %661, %654, %cst_564 {dimension_numbers = #tpu.dot_dimension_numbers<[1], [0], [0], [1], [0, 0, 1, 1], [], []>} : vector<2x4xf32>, vector<4x64xf32>, vector<2x64xf32> -> vector<2x64xf32>
    %c2_i32_565 = arith.constant 2 : i32
    %663 = vector.broadcast %c2_i32_565 : i32 to vector<2x4xi32>
    %664 = arith.muli %663, %655 : vector<2x4xi32>
    %c1_i32_566 = arith.constant 1 : i32
    %665 = vector.broadcast %c1_i32_566 : i32 to vector<2x4xi32>
    %666 = arith.addi %664, %665 : vector<2x4xi32>
    %667 = arith.cmpi eq, %656, %666 : vector<2x4xi32>
    %668 = arith.extui %667 : vector<2x4xi1> to vector<2x4xi32>
    %669 = arith.sitofp %668 : vector<2x4xi32> to vector<2x4xf32>
    %cst_567 = arith.constant dense<0.000000e+00> : vector<2x64xf32>
    %670 = tpu.matmul %669, %654, %cst_567 {dimension_numbers = #tpu.dot_dimension_numbers<[1], [0], [0], [1], [0, 0, 1, 1], [], []>} : vector<2x4xf32>, vector<4x64xf32>, vector<2x64xf32> -> vector<2x64xf32>
    %671 = arith.maximumf %662, %670 : vector<2x64xf32>
    %672 = tpu.iota {dimensions = array<i32: 1>} : vector<1x2xi32>
    %c0_i32 = arith.constant 0 : i32
    %673 = vector.broadcast %c0_i32 : i32 to vector<1x2xi32>
    %674 = arith.cmpi eq, %672, %673 : vector<1x2xi32>
    %675 = arith.extui %674 : vector<1x2xi1> to vector<1x2xi32>
    %676 = arith.sitofp %675 : vector<1x2xi32> to vector<1x2xf32>
    %cst_568 = arith.constant dense<0.000000e+00> : vector<1x64xf32>
    %677 = tpu.matmul %676, %671, %cst_568 {dimension_numbers = #tpu.dot_dimension_numbers<[1], [0], [0], [1], [0, 0, 1, 1], [], []>} : vector<1x2xf32>, vector<2x64xf32>, vector<1x64xf32> -> vector<1x64xf32>
    %c1_i32_569 = arith.constant 1 : i32
    %678 = vector.broadcast %c1_i32_569 : i32 to vector<1x2xi32>
    %679 = arith.cmpi eq, %672, %678 : vector<1x2xi32>
    %680 = arith.extui %679 : vector<1x2xi1> to vector<1x2xi32>
    %681 = arith.sitofp %680 : vector<1x2xi32> to vector<1x2xf32>
    %cst_570 = arith.constant dense<0.000000e+00> : vector<1x64xf32>
    %682 = tpu.matmul %681, %671, %cst_570 {dimension_numbers = #tpu.dot_dimension_numbers<[1], [0], [0], [1], [0, 0, 1, 1], [], []>} : vector<1x2xf32>, vector<2x64xf32>, vector<1x64xf32> -> vector<1x64xf32>
    %683 = arith.truncf %677 : vector<1x64xf32> to vector<1x64xbf16>
    %c0_571 = arith.constant 0 : index
    %c0_572 = arith.constant 0 : index
    %684 = vector.load %arg8[%c0_571, %c0_572] : memref<128x360xbf16, #tpu.memory_space<vmem>>, vector<64x360xbf16>
    %cst_573 = arith.constant dense<0.000000e+00> : vector<1x360xf32>
    %685 = tpu.matmul %683, %684, %cst_573 {dimension_numbers = #tpu.dot_dimension_numbers<[1], [0], [0], [1], [0, 0, 1, 1], [], []>} : vector<1x64xbf16>, vector<64x360xbf16>, vector<1x360xf32> -> vector<1x360xf32>
    %686 = arith.truncf %682 : vector<1x64xf32> to vector<1x64xbf16>
    %c64 = arith.constant 64 : index
    %c0_574 = arith.constant 0 : index
    %687 = vector.load %arg8[%c64, %c0_574] : memref<128x360xbf16, #tpu.memory_space<vmem>>, vector<64x360xbf16>
    %cst_575 = arith.constant dense<0.000000e+00> : vector<1x360xf32>
    %688 = tpu.matmul %686, %687, %cst_575 {dimension_numbers = #tpu.dot_dimension_numbers<[1], [0], [0], [1], [0, 0, 1, 1], [], []>} : vector<1x64xbf16>, vector<64x360xbf16>, vector<1x360xf32> -> vector<1x360xf32>
    %689 = arith.addf %685, %688 : vector<1x360xf32>
    %c0_576 = arith.constant 0 : index
    %c0_577 = arith.constant 0 : index
    %690 = vector.load %arg9[%c0_576, %c0_577] : memref<1x360xf32, #tpu.memory_space<vmem>>, vector<1x360xf32>
    %691 = arith.addf %689, %690 : vector<1x360xf32>
    %692 = arith.negf %691 : vector<1x360xf32>
    %693 = math.exp %692 : vector<1x360xf32>
    %cst_578 = arith.constant 1.000000e+00 : f32
    %694 = vector.broadcast %cst_578 : f32 to vector<1x360xf32>
    %695 = arith.addf %694, %693 : vector<1x360xf32>
    %696 = arith.divf %694, %695 : vector<1x360xf32>
    %697 = tpu.iota {dimensions = array<i32: 1>} : vector<1x360xi32>
    %c39_i32 = arith.constant 39 : i32
    %698 = vector.broadcast %c39_i32 : i32 to vector<1x360xi32>
    %699 = arith.cmpi sge, %697, %698 : vector<1x360xi32>
    %c308_i32 = arith.constant 308 : i32
    %700 = vector.broadcast %c308_i32 : i32 to vector<1x360xi32>
    %701 = arith.cmpi slt, %697, %700 : vector<1x360xi32>
    %702 = arith.andi %699, %701 : vector<1x360xi1>
    %cst_579 = arith.constant 0xFF800000 : f32
    %703 = vector.broadcast %cst_579 : f32 to vector<1x360xf32>
    %704 = arith.select %702, %696, %703 : vector<1x360xi1>, vector<1x360xf32>
    %cst_580 = arith.constant dense<0xFF800000> : vector<1xf32>
    %705 = vector.multi_reduction <maximumf>, %704, %cst_580 [1] : vector<1x360xf32> to vector<1xf32>
    %706 = vector.shape_cast %705 : vector<1xf32> to vector<1x1xf32>
    %707 = vector.broadcast %706 : vector<1x1xf32> to vector<1x360xf32>
    %708 = arith.cmpf oeq, %704, %707 : vector<1x360xf32>
    %c1073741824_i32 = arith.constant 1073741824 : i32
    %709 = vector.broadcast %c1073741824_i32 : i32 to vector<1x360xi32>
    %710 = arith.select %708, %697, %709 : vector<1x360xi1>, vector<1x360xi32>
    %cst_581 = arith.constant dense<2147483647> : vector<1xi32>
    %711 = vector.multi_reduction <minsi>, %710, %cst_581 [1] : vector<1x360xi32> to vector<1xi32>
    %712 = vector.shape_cast %711 : vector<1xi32> to vector<1x1xi32>
    %713 = arith.sitofp %712 : vector<1x1xi32> to vector<1x1xf32>
    %cst_582 = arith.constant 2.000000e+01 : f32
    %714 = vector.broadcast %cst_582 : f32 to vector<1x1xf32>
    %715 = arith.mulf %714, %713 : vector<1x1xf32>
    %cst_583 = arith.constant 1997.37939 : f32
    %716 = vector.broadcast %cst_583 : f32 to vector<1x1xf32>
    %717 = arith.addf %715, %716 : vector<1x1xf32>
    %cst_584 = arith.constant 5.77622675E-4 : f32
    %718 = vector.broadcast %cst_584 : f32 to vector<1x1xf32>
    %719 = arith.mulf %717, %718 : vector<1x1xf32>
    %720 = math.exp %719 : vector<1x1xf32>
    %cst_585 = arith.constant 1.000000e+01 : f32
    %721 = vector.broadcast %cst_585 : f32 to vector<1x1xf32>
    %722 = arith.mulf %721, %720 : vector<1x1xf32>
    %723 = tpu.iota {dimensions = array<i32: 1>} : vector<1x128xi32>
    %c0_i32_586 = arith.constant 0 : i32
    %724 = vector.broadcast %c0_i32_586 : i32 to vector<1x128xi32>
    %725 = arith.cmpi eq, %723, %724 : vector<1x128xi32>
    %c1_i32_587 = arith.constant 1 : i32
    %726 = vector.broadcast %c1_i32_587 : i32 to vector<1x128xi32>
    %727 = arith.cmpi eq, %723, %726 : vector<1x128xi32>
    %cst_588 = arith.constant 0.000000e+00 : f32
    %728 = vector.shape_cast %706 : vector<1x1xf32> to vector<1x1xf32>
    %729 = vector.broadcast %728 : vector<1x1xf32> to vector<1x128xf32>
    %730 = vector.broadcast %cst_588 : f32 to vector<1x128xf32>
    %731 = arith.select %727, %729, %730 : vector<1x128xi1>, vector<1x128xf32>
    %732 = vector.shape_cast %722 : vector<1x1xf32> to vector<1x1xf32>
    %733 = vector.broadcast %732 : vector<1x1xf32> to vector<1x128xf32>
    %734 = arith.select %725, %733, %731 : vector<1x128xi1>, vector<1x128xf32>
    %c0_589 = arith.constant 0 : index
    %c0_590 = arith.constant 0 : index
    %c0_591 = arith.constant 0 : index
    %735 = vector.load %arg13[%c0_589, %c0_590, %c0_591] : memref<1x1x128xf32, #tpu.memory_space<vmem>>, vector<1x1x128xf32>
    %736 = vector.shape_cast %735 : vector<1x1x128xf32> to vector<1x128xf32>
    %737 = vector.shape_cast %734 : vector<1x128xf32> to vector<1x1x128xf32>
    tpu.vector_store %arg13[%c0_589, %c0_590, %c0_591], %737 {strides = array<i32>} : memref<1x1x128xf32, #tpu.memory_space<vmem>>, vector<1x1x128xf32>,
    return
  }
  func.func @transform_0(%arg0: i32) -> (i32, i32, i32) {
    %c0_i32 = arith.constant 0 : i32
    %c0_i32_0 = arith.constant 0 : i32
    %c0_i32_1 = arith.constant 0 : i32
    return %arg0, %c0_i32, %c0_i32_0 : i32, i32, i32
  }
  func.func @transform_1(%arg0: i32) -> (i32, i32) {
    %c0_i32 = arith.constant 0 : i32
    %c0_i32_0 = arith.constant 0 : i32
    %c0_i32_1 = arith.constant 0 : i32
    return %c0_i32, %c0_i32_0 : i32, i32
  }
  func.func @transform_2(%arg0: i32) -> (i32, i32, i32) {
    %c0_i32 = arith.constant 0 : i32
    %c0_i32_0 = arith.constant 0 : i32
    %c0_i32_1 = arith.constant 0 : i32
    %c0_i32_2 = arith.constant 0 : i32
    return %c0_i32, %c0_i32_0, %c0_i32_1 : i32, i32, i32
  }
  func.func @transform_3(%arg0: i32) -> (i32, i32, i32) {
    %c0_i32 = arith.constant 0 : i32
    %c0_i32_0 = arith.constant 0 : i32
    %c0_i32_1 = arith.constant 0 : i32
    %c0_i32_2 = arith.constant 0 : i32
    return %c0_i32, %c0_i32_0, %c0_i32_1 : i32, i32, i32
  }
  func.func @transform_4(%arg0: i32) -> (i32, i32, i32) {
    %c0_i32 = arith.constant 0 : i32
    %c0_i32_0 = arith.constant 0 : i32
    %c0_i32_1 = arith.constant 0 : i32
    %c0_i32_2 = arith.constant 0 : i32
    return %c0_i32, %c0_i32_0, %c0_i32_1 : i32, i32, i32
  }
  func.func @transform_5(%arg0: i32) -> (i32, i32, i32) {
    %c0_i32 = arith.constant 0 : i32
    %c0_i32_0 = arith.constant 0 : i32
    %c0_i32_1 = arith.constant 0 : i32
    %c0_i32_2 = arith.constant 0 : i32
    return %c0_i32, %c0_i32_0, %c0_i32_1 : i32, i32, i32
  }
  func.func @transform_6(%arg0: i32) -> (i32, i32, i32) {
    %c0_i32 = arith.constant 0 : i32
    %c0_i32_0 = arith.constant 0 : i32
    %c0_i32_1 = arith.constant 0 : i32
    %c0_i32_2 = arith.constant 0 : i32
    return %c0_i32, %c0_i32_0, %c0_i32_1 : i32, i32, i32
  }
  func.func @transform_7(%arg0: i32) -> (i32, i32) {
    %c0_i32 = arith.constant 0 : i32
    %c0_i32_0 = arith.constant 0 : i32
    %c0_i32_1 = arith.constant 0 : i32
    return %c0_i32, %c0_i32_0 : i32, i32
  }
  func.func @transform_8(%arg0: i32) -> (i32, i32) {
    %c0_i32 = arith.constant 0 : i32
    %c0_i32_0 = arith.constant 0 : i32
    %c0_i32_1 = arith.constant 0 : i32
    return %c0_i32, %c0_i32_0 : i32, i32
  }
  func.func @transform_9(%arg0: i32) -> (i32, i32) {
    %c0_i32 = arith.constant 0 : i32
    %c0_i32_0 = arith.constant 0 : i32
    %c0_i32_1 = arith.constant 0 : i32
    return %c0_i32, %c0_i32_0 : i32, i32
  }
  func.func @transform_10(%arg0: i32) -> (i32, i32) {
    %c0_i32 = arith.constant 0 : i32
    %c0_i32_0 = arith.constant 0 : i32
    %c0_i32_1 = arith.constant 0 : i32
    return %c0_i32, %c0_i32_0 : i32, i32
  }
  func.func @transform_11(%arg0: i32) -> (i32, i32) {
    %c0_i32 = arith.constant 0 : i32
    %c0_i32_0 = arith.constant 0 : i32
    %c0_i32_1 = arith.constant 0 : i32
    return %c0_i32, %c0_i32_0 : i32, i32
  }
  func.func @transform_12(%arg0: i32) -> (i32, i32, i32) {
    %c0_i32 = arith.constant 0 : i32
    %c0_i32_0 = arith.constant 0 : i32
    %c0_i32_1 = arith.constant 0 : i32
    return %arg0, %c0_i32, %c0_i32_0 : i32, i32, i32
  }
}

</mosaic_0001>

<bundles_post_ra>
// kernel: crepe_test_forward.1
= control target key start
LH: loop header
LB: loop body
LE: loop exit
PB: predicated region body
PF: predicated region fallthrough
CT: control target
= control target key end

     0   :  { %s10475_s21 = smov 0   ;;  %s12151_s0 = inlined_call_operand.vmem [shape: bf16[11,128,64], index: 0, kind: input, shape index: {}]   ;;  %s12152_s1 = inlined_call_operand.vmem [shape: bf16[64,32], index: 1, kind: input, shape index: {}]   ;;  %s12153_s2 = inlined_call_operand.vmem [shape: bf16[16,32,16], index: 2, kind: input, shape index: {}]   ;;  %s12154_s3 = inlined_call_operand.vmem [shape: bf16[16,16,16], index: 3, kind: input, shape index: {}]   ;;  %s12155_s4 = inlined_call_operand.vmem [shape: bf16[16,16,16], index: 4, kind: input, shape index: {}]   ;;  %s12156_s5 = inlined_call_operand.vmem [shape: bf16[16,16,32], index: 5, kind: input, shape index: {}]   ;;  %s12157_s6 = inlined_call_operand.vmem [shape: bf16[16,32,64], index: 6, kind: input, shape index: {}]   ;;  %s12158_s7 = inlined_call_operand.vmem [shape: bf16[128,360], index: 7, kind: input, shape index: {}]   ;;  %s12159_s8 = inlined_call_operand.vmem [shape: f32[1,360], index: 8, kind: input, shape index: {}]   ;;  %s12160_s9 = inlined_call_operand.vmem [shape: f32[6,64], index: 9, kind: input, shape index: {}]   ;;  %s12161_s10 = inlined_call_operand.vmem [shape: f32[6,64], index: 10, kind: input, shape index: {}]   ;;  %s12162_s11 = inlined_call_operand.vmem [shape: f32[6,64], index: 11, kind: input, shape index: {}]   ;;  %s12163_s12 = inlined_call_operand.vmem [shape: f32[11,1,128], index: 12, kind: output, shape index: {}]  }
   0x1 LB: > { %s8379_s22 = sadd.s32 4294967295, %s10404_s21   ;;  %p8383_p0 = scmp.ge.s32.totalorder %s10404_s21, 1  ;;  %s10404_s21 = sphi %s10475_s21, %s22_s21  }
   0x2   : > { %p362_p1 = scmp.lt.s32.totalorder %s10404_s21, 12 }
   0x4   : > { %p363_p2 = pnand %p8383_p0, %p362_p1 }
   0x6   : > { %366 = sbr.rel (%p363_p2) target bundleno = 3830 (0xef6), region = 68 }
   0xb   : > { %v10228_v0 = vld [vmem:[%s12152_s1 + $0x18] sm:$0xff]   ;;  %p402_p3 = scmp.lt.s32.totalorder %s8379_s22, 10  ;;  %v10229_v1 = vld [vmem:[%s12152_s1 + $0x10] sm:$0xff]   ;;  %v10230_v2 = vld [vmem:[%s12152_s1 + $0x8] sm:$0xff]   ;;  %vm506_vm0 = vcmask 523264   ;;  %v684_v12 = vlaneseq  ;;  %v12186_v17 = vmov 0 }
   0xc   : > { %9362 = vmatprep.subr.bf16.mxu0 %v10228_v0  ;;  %v10231_v4 = vld [vmem:[%s12152_s1] sm:$0xff]   ;;  %v10406_v18 = vmov 1.0  }
   0xd   : > { %s12235_s22 = smov (!%p402_p3, %s8379_s22), 10  ;;  %9363 = vmatpush3.bf16.msra.mxu0 %v10228_v0  ;;  %v10509_v13 = vshrl.u32 %v684_v12, 7  ;;  %v10512_v15 = vand.u32 127, %v684_v12  ;;  %v10543_v31 = vld [vmem:[%s12160_s9] ss:$0 sm:$0xff] }
   0xe   : > { %9364 = vmatprep.subr.bf16.mxu0 %v10229_v1  ;;  %s8981_s29 = sshll.u32 %s12235_s22, 6  ;;  %v10553_v43 = vld [vmem:[%s12161_s10] ss:$0 sm:$0xff]  ;;  %s409_s27 = scalar_lea.vmem %s12163_s12, %s12235_s22 }
   0xf   : > { %s406_s14 = scalar_lea.vmem %s12151_s0, %s8981_s29  ;;  %12183 = vst [vmem:[#allocation7_spill] sm:$0xff] %v10509_v13  ;;  %v695_v14 = vmul.u32 2, %v10509_v13  ;;  %12184 = vst [vmem:[#allocation8_spill] sm:$0xff] %v10512_v15  ;;  %v10561_v49 = vld [vmem:[%s12162_s11] ss:$0 sm:$0xff] }
  0x10   : > { %v10232_v3 = vld [vmem:[%s406_s14] sm:$0xff]   ;;  %v10233_v5 = vld [vmem:[%s406_s14 + $0x8] sm:$0xff]   ;;  %v10234_v6 = vld [vmem:[%s406_s14 + $0x10] sm:$0xff]  }
  0x11   : > { %9365 = vmatpush3.bf16.msra.mxu0 %v10229_v1  ;;  %9370 = vmatprep.mubr.msk.bf16.mxu0 %vm506_vm0, %v10232_v3  ;;  %v10235_v7 = vld [vmem:[%s406_s14 + $0x18] sm:$0xff]   ;;  %v10236_v8 = vld [vmem:[%s406_s14 + $0x20] sm:$0xff]   ;;  %v10237_v9 = vld [vmem:[%s406_s14 + $0x28] sm:$0xff]   ;;  %v10514_v16 = vadd.s32 1, %v695_v14  ;;  %vm10517_vm1 = vcmp.eq.s32.totalorder %v10512_v15, %v695_v14 }
  0x12   : > { %9366 = vmatprep.subr.bf16.mxu0 %v10230_v2  ;;  %v10238_v10 = vld [vmem:[%s406_s14 + $0x30] sm:$0xff]   ;;  %v10239_v11 = vld [vmem:[%s406_s14 + $0x38] sm:$0xff]   ;;  %v12187_v17 = vsel %vm10517_vm1, 4294967295, %v12186_v17  ;;  %9418 = vmatprep.mubr.msk.f32.mxu1 %vm10517_vm1, %v10406_v18 }
  0x13   : > { %12185 = vst [vmem:[#allocation9_spill] sm:$0xff] %v10514_v16  ;;  %12188 = vst [vmem:[#allocation10_spill] sm:$0xff] %v12187_v17  ;;  %vm840_vm2 = vcmp.eq.s32.totalorder %v10512_v15, %v10514_v16 }
  0x15   : > { %9367 = vmatpush3.bf16.msra.mxu0 %v10230_v2 }
  0x16   : > { %9368 = vmatprep.subr.bf16.mxu0 %v10231_v4 }
  0x19   : > { %9369 = vmatpush3.bf16.msra.mxu0 %v10231_v4 }
  0x1c   : > { %9371 = vmatmul.mubr.msk.bf16.vlgmr.msra.gmra.mxu0 %vm506_vm0, %v10233_v5 }
  0x1d   : > { %9374 = vmatprep.mubr.msk.bf16.mxu0 %vm506_vm0, %v10234_v6 }
  0x24   : > { %9375 = vmatmul.mubr.msk.bf16.gmra.mxu0 %vm506_vm0, %v10235_v7 }
  0x25   : > { %9378 = vmatprep.mubr.msk.bf16.mxu0 %vm506_vm0, %v10236_v8 }
  0x2c   : > { %9379 = vmatmul.mubr.msk.bf16.gmra.mxu0 %vm506_vm0, %v10237_v9 }
  0x2d   : > { %9382 = vmatprep.mubr.msk.bf16.mxu0 %vm506_vm0, %v10238_v10 }
  0x34   : > { %9383 = vmatmul.mubr.msk.bf16.gmra.mxu0 %vm506_vm0, %v10239_v11 }
  0x35   : > { %9462 = vmatprep.mubr.msk.f32.mxu0 %vm840_vm2, %v10406_v18 }
  0xdc   : > { %v10530_v19 = vpop.f32.mrf.mxu0 }
  0xde   : > { %v10532_v20 = vpop.f32.mrf.mxu0 }
  0xe0   : > { %v10534_v21 = vpop.f32.mrf.mxu0 }
  0xe1   : > { %v577_v10 = vadd.f32 %v10534_v21, %v10543_v31 }
  0xe2   : > { %v10536_v22 = vpop.f32.mrf.mxu0 }
  0xe3   : > { %v631_v21 = vmax.f32 %v577_v10, 0.0 }
  0xe4   : > { %v9376_v23 = vpop.f32.mrf.mxu0 }
  0xe5   : > { %v590_v62 = vadd.f32 %v9376_v23, %v10543_v31  ;;  %v574_v23 = vadd.f32 %v10530_v19, %v10543_v31 }
  0xe6   : > { %v10538_v24 = vpop.f32.mrf.mxu0 }
  0xe7   : > { %v634_v6 = vmax.f32 %v590_v62, 0.0  ;;  %v582_v7 = vadd.f32 %v10543_v31, %v10538_v24  ;;  %v630_v19 = vmax.f32 %v574_v23, 0.0  ;;  %v12198_v62 = vmov 0 }
  0xe8   : > { %v9377_v25 = vpop.f32.mrf.mxu0 }
  0xe9   : > { %v593_v58 = vadd.f32 %v9377_v25, %v10543_v31  ;;  %v654_v24 = vmul.f32 %v10553_v43, %v634_v6  ;;  %v632_v25 = vmax.f32 %v582_v7, 0.0  ;;  %v10243_v6 = vld [vmem:[%s12153_s2] sm:$0xff]   ;;  %v10244_v7 = vld [vmem:[%s12153_s2 + $0x28] sm:$0xff]  }
  0xea   : > { %v584_v26 = vpop.f32.mrf.mxu0 }
  0xeb   : > { %v635_v2 = vmax.f32 %v593_v58, 0.0  ;;  %v585_v3 = vadd.f32 %v10543_v31, %v584_v26 }
  0xec   : > { %v9380_v27 = vpop.f32.mrf.mxu0 }
  0xed   : > { %v606_v44 = vadd.f32 %v9380_v27, %v10543_v31  ;;  %v655_v11 = vmul.f32 %v10553_v43, %v635_v2  ;;  %v633_v12 = vmax.f32 %v585_v3, 0.0  ;;  %v569_v27 = vadd.f32 %v10543_v31, %v10536_v22 }
  0xee   : > { %v597_v28 = vpop.f32.mrf.mxu0  ;;  %v686_v22 = vadd.s32 8, %v10509_v13  ;;  %v12164_v3 = vmov 0.0  }
  0xef   : > { %v638_v54 = vmax.f32 %v606_v44, 0.0  ;;  %v598_v55 = vadd.f32 %v10543_v31, %v597_v28  ;;  %v675_v28 = vadd.f32 %v10561_v49, %v655_v11 }
  0xf0   : > { %v9381_v29 = vpop.f32.mrf.mxu0 }
  0xf1   : > { %v609_v40 = vadd.f32 %v9381_v29, %v10543_v31  ;;  %v658_v63 = vmul.f32 %v10553_v43, %v638_v54  ;;  %v636_v0 = vmax.f32 %v598_v55, 0.0  ;;  %v653_v29 = vmul.f32 %v10553_v43, %v633_v12 }
  0xf2   : > { %v600_v30 = vpop.f32.mrf.mxu0  ;;  %v691_v55 = vadd.s32 48, %v10509_v13 }
  0xf3   : > { %v639_v50 = vmax.f32 %v609_v40, 0.0  ;;  %v601_v51 = vadd.f32 %v10543_v31, %v600_v30  ;;  %v678_v8 = vadd.f32 %v10561_v49, %v658_v63  ;;  %v656_v9 = vmul.f32 %v10553_v43, %v636_v0 }
  0xf4   : > { %v9384_v32 = vpop.f32.mrf.mxu0  ;;  %v566_v30 = vadd.f32 %v10543_v31, %v10532_v20  ;;  %v650_v20 = vmul.f32 %v10553_v43, %v630_v19  ;;  %v688_v40 = vadd.s32 24, %v10509_v13 }
  0xf5   : > { %v622_v33 = vadd.f32 %v9384_v32, %v10543_v31  ;;  %v659_v59 = vmul.f32 %v10553_v43, %v639_v50  ;;  %v637_v60 = vmax.f32 %v601_v51, 0.0  ;;  %v676_v26 = vadd.f32 %v10561_v49, %v656_v9 }
  0xf6   : > { %v613_v34 = vpop.f32.mrf.mxu0  ;;  %v674_v32 = vadd.f32 %v10561_v49, %v654_v24  ;;  %v698_v50 = vmul.u32 2, %v688_v40  ;;  %v690_v51 = vadd.s32 40, %v10509_v13 }
  0xf7   : > { %v642_v36 = vmax.f32 %v622_v33, 0.0  ;;  %v614_v37 = vadd.f32 %v10543_v31, %v613_v34  ;;  %v679_v4 = vadd.f32 %v10561_v49, %v659_v59  ;;  %v657_v5 = vmul.f32 %v10553_v43, %v637_v60 }
  0xf8   : > { %v9385_v35 = vpop.f32.mrf.mxu0  ;;  %v652_v33 = vmul.f32 %v10553_v43, %v632_v25  ;;  %v651_v34 = vmul.f32 %v10553_v43, %v631_v21  ;;  %v700_v58 = vmul.u32 2, %v690_v51  ;;  %v692_v59 = vadd.s32 56, %v10509_v13 }
  0xf9   : > { %v625_v38 = vadd.f32 %v9385_v35, %v10543_v31  ;;  %v662_v45 = vmul.f32 %v10553_v43, %v642_v36  ;;  %v640_v46 = vmax.f32 %v614_v37, 0.0  ;;  %v677_v14 = vadd.f32 %v10561_v49, %v657_v5  ;;  %v10242_v5 = vld [vmem:[%s12153_s2 + $0x10] sm:$0xff]  }
  0xfa   : > { %v616_v39 = vpop.f32.mrf.mxu0  ;;  %v629_v35 = vmax.f32 %v569_v27, 0.0  ;;  %v673_v36 = vadd.f32 %v10561_v49, %v653_v29  ;;  %v687_v37 = vadd.s32 16, %v10509_v13  ;;  %vm10650_vm7 = vcmp.eq.s32.totalorder %v10512_v15, %v698_v50 }
  0xfb   : > { %v643_v41 = vmax.f32 %v625_v38, 0.0  ;;  %v617_v42 = vadd.f32 %v10543_v31, %v616_v39  ;;  %v682_v56 = vadd.f32 %v10561_v49, %v662_v45  ;;  %v660_v57 = vmul.f32 %v10553_v43, %v640_v46 }
  0xfc   : > { %v628_v31 = vmax.f32 %v566_v30, 0.0  ;;  %v672_v38 = vadd.f32 %v10561_v49, %v652_v33  ;;  %v696_v39 = vmul.u32 2, %v686_v22  ;;  %v697_v44 = vmul.u32 2, %v687_v37 }
  0xfd   : > { %v663_v47 = vmul.f32 %v10553_v43, %v643_v41  ;;  %v641_v48 = vmax.f32 %v617_v42, 0.0  ;;  %v680_v1 = vadd.f32 %v10561_v49, %v660_v57  ;;  %v671_v41 = vadd.f32 %v10561_v49, %v651_v34 }
  0xfe   : > { %v649_v42 = vmul.f32 %v10553_v43, %v629_v35  ;;  %v689_v45 = vadd.s32 32, %v10509_v13  ;;  %v670_v46 = vadd.f32 %v10561_v49, %v650_v20  ;;  %vm10619_vm3 = vcmp.eq.s32.totalorder %v10512_v15, %v696_v39 }
  0xff   : > { %v683_v52 = vadd.f32 %v10561_v49, %v663_v47  ;;  %v661_v53 = vmul.f32 %v10553_v43, %v641_v48  ;;  %v648_v47 = vmul.f32 %v10553_v43, %v628_v31  ;;  %v10610_v48 = vadd.s32 1, %v696_v39 }
 0x100   : > { %v699_v54 = vmul.u32 2, %v689_v45  ;;  %v10625_v57 = vadd.s32 1, %v698_v50  ;;  %vm10629_vm5 = vcmp.eq.s32.totalorder %v10512_v15, %v697_v44  ;;  %v12199_v62 = vsel %vm10650_vm7, 4294967295, %v12198_v62 }
 0x101   : > { %9386 = vmatprep.subr.mxu1 %v683_v52  ;;  %9430 = vmatprep.subr.mxu0 %v683_v52  ;;  %v681_v61 = vadd.f32 %v10561_v49, %v661_v53  ;;  %12189 = vst [vmem:[#allocation11_spill] sm:$0xff] %v10610_v48  ;;  %v10614_v53 = vadd.s32 1, %v697_v44  ;;  %v668_v43 = vadd.f32 %v10561_v49, %v648_v47  ;;  %12200 = vst [vmem:[#allocation16_spill] sm:$0xff] %v12199_v62 }
 0x102   : > { %9387 = vmatpush3.msra.mxu1 %v683_v52  ;;  %9431 = vmatpush3.msra.mxu0 %v683_v52  ;;  %v669_v52 = vadd.f32 %v10561_v49, %v649_v42  ;;  %vm841_vm4 = vcmp.eq.s32.totalorder %v10512_v15, %v10610_v48  ;;  %12194 = vst [vmem:[#allocation14_spill] sm:$0xff] %v10625_v57  ;;  %v12195_v49 = vmov 0  ;;  %v836_v60 = vadd.s32 1, %v699_v54  ;;  %v10259_v48 = vld [vmem:[%s12153_s2 + $0x90] sm:$0xff]  }
 0x103   : > { %9388 = vmatprep.subr.mxu1 %v682_v56  ;;  %9432 = vmatprep.subr.mxu0 %v682_v56  ;;  %12190 = vst [vmem:[#allocation12_spill] sm:$0xff] %v10614_v53  ;;  %v12196_v49 = vsel %vm10629_vm5, 4294967295, %v12195_v49  ;;  %vm842_vm6 = vcmp.eq.s32.totalorder %v10512_v15, %v10614_v53  ;;  %vm843_vm8 = vcmp.eq.s32.totalorder %v10512_v15, %v10625_v57  ;;  %v837_v63 = vadd.s32 1, %v700_v58  ;;  %v10258_v53 = vld [vmem:[%s12153_s2 + $0x80] sm:$0xff]  }
 0x104   : > { %9389 = vmatpush3.msra.mxu1 %v682_v56  ;;  %9433 = vmatpush3.msra.mxu0 %v682_v56  ;;  %v12191_v56 = vmov 0  ;;  %12197 = vst [vmem:[#allocation15_spill] sm:$0xff] %v12196_v49  ;;  %v702_v0 = vmul.u32 2, %v692_v59  ;;  %vm707_vm9 = vcmp.eq.s32.totalorder %v10512_v15, %v699_v54  ;;  %vm844_vm10 = vcmp.eq.s32.totalorder %v10512_v15, %v836_v60 }
 0x105   : > { %9390 = vmatprep.subr.mxu1 %v681_v61  ;;  %9434 = vmatprep.subr.mxu0 %v681_v61  ;;  %v12192_v56 = vsel %vm10619_vm3, 4294967295, %v12191_v56  ;;  %vm708_vm11 = vcmp.eq.s32.totalorder %v10512_v15, %v700_v58  ;;  %vm845_vm12 = vcmp.eq.s32.totalorder %v10512_v15, %v837_v63  ;;  %v10248_v63 = vld [vmem:[%s12153_s2 + $0x48] sm:$0xff]  }
 0x106   : > { %9391 = vmatpush3.msra.mxu1 %v681_v61  ;;  %9435 = vmatpush3.msra.mxu0 %v681_v61  ;;  %12193 = vst [vmem:[#allocation13_spill] sm:$0xff] %v12192_v56  ;;  %v701_v61 = vmul.u32 2, %v691_v55  ;;  %v839_v2 = vadd.s32 1, %v702_v0  ;;  %vm710_vm15 = vcmp.eq.s32.totalorder %v10512_v15, %v702_v0  ;;  %v10247_v55 = vld [vmem:[%s12153_s2 + $0x30] sm:$0xff]  }
 0x107   : > { %9392 = vmatprep.subr.mxu1 %v680_v1  ;;  %9436 = vmatprep.subr.mxu0 %v680_v1 }
 0x108   : > { %9393 = vmatpush3.msra.mxu1 %v680_v1  ;;  %9437 = vmatpush3.msra.mxu0 %v680_v1  ;;  %v838_v1 = vadd.s32 1, %v701_v61  ;;  %vm709_vm13 = vcmp.eq.s32.totalorder %v10512_v15, %v701_v61 }
 0x109   : > { %9394 = vmatprep.subr.mxu1 %v679_v4  ;;  %9438 = vmatprep.subr.mxu0 %v679_v4 }
 0x10a   : > { %9395 = vmatpush3.msra.mxu1 %v679_v4  ;;  %9439 = vmatpush3.msra.mxu0 %v679_v4  ;;  %vm846_vm14 = vcmp.eq.s32.totalorder %v10512_v15, %v838_v1  ;;  %v10241_v4 = vld [vmem:[%s12153_s2 + $0x8] sm:$0xff]  }
 0x10b   : > { %9396 = vmatprep.subr.mxu1 %v678_v8  ;;  %9440 = vmatprep.subr.mxu0 %v678_v8 }
 0x10c   : > { %9397 = vmatpush3.msra.mxu1 %v678_v8  ;;  %9441 = vmatpush3.msra.mxu0 %v678_v8  ;;  %v10245_v8 = vld [vmem:[%s12153_s2 + $0x38] sm:$0xff]  }
 0x10d   : > { %9398 = vmatprep.subr.mxu1 %v677_v14  ;;  %9442 = vmatprep.subr.mxu0 %v677_v14 }
 0x10e   : > { %9399 = vmatpush3.msra.mxu1 %v677_v14  ;;  %9443 = vmatpush3.msra.mxu0 %v677_v14 }
 0x10f   : > { %9400 = vmatprep.subr.mxu1 %v676_v26  ;;  %9444 = vmatprep.subr.mxu0 %v676_v26 }
 0x110   : > { %9401 = vmatpush3.msra.mxu1 %v676_v26  ;;  %9445 = vmatpush3.msra.mxu0 %v676_v26 }
 0x111   : > { %9402 = vmatprep.subr.mxu1 %v675_v28  ;;  %9446 = vmatprep.subr.mxu0 %v675_v28 }
 0x112   : > { %9403 = vmatpush3.msra.mxu1 %v675_v28  ;;  %9447 = vmatpush3.msra.mxu0 %v675_v28 }
 0x113   : > { %9404 = vmatprep.subr.mxu1 %v674_v32  ;;  %9448 = vmatprep.subr.mxu0 %v674_v32 }
 0x114   : > { %9405 = vmatpush3.msra.mxu1 %v674_v32  ;;  %9449 = vmatpush3.msra.mxu0 %v674_v32 }
 0x115   : > { %9406 = vmatprep.subr.mxu1 %v673_v36  ;;  %9450 = vmatprep.subr.mxu0 %v673_v36 }
 0x116   : > { %9407 = vmatpush3.msra.mxu1 %v673_v36  ;;  %9451 = vmatpush3.msra.mxu0 %v673_v36 }
 0x117   : > { %9408 = vmatprep.subr.mxu1 %v672_v38  ;;  %9452 = vmatprep.subr.mxu0 %v672_v38 }
 0x118   : > { %9409 = vmatpush3.msra.mxu1 %v672_v38  ;;  %9453 = vmatpush3.msra.mxu0 %v672_v38 }
 0x119   : > { %9410 = vmatprep.subr.mxu1 %v671_v41  ;;  %9454 = vmatprep.subr.mxu0 %v671_v41 }
 0x11a   : > { %9411 = vmatpush3.msra.mxu1 %v671_v41  ;;  %9455 = vmatpush3.msra.mxu0 %v671_v41 }
 0x11b   : > { %9412 = vmatprep.subr.mxu1 %v670_v46  ;;  %9456 = vmatprep.subr.mxu0 %v670_v46 }
 0x11c   : > { %9413 = vmatpush3.msra.mxu1 %v670_v46  ;;  %9457 = vmatpush3.msra.mxu0 %v670_v46 }
 0x11d   : > { %9414 = vmatprep.subr.mxu1 %v669_v52  ;;  %9458 = vmatprep.subr.mxu0 %v669_v52 }
 0x11e   : > { %9415 = vmatpush3.msra.mxu1 %v669_v52  ;;  %9459 = vmatpush3.msra.mxu0 %v669_v52  ;;  %v10246_v52 = vld [vmem:[%s12153_s2 + $0x20] sm:$0xff]  }
 0x11f   : > { %9416 = vmatprep.subr.mxu1 %v668_v43  ;;  %9460 = vmatprep.subr.mxu0 %v668_v43 }
 0x120   : > { %9417 = vmatpush3.msra.mxu1 %v668_v43  ;;  %9461 = vmatpush3.msra.mxu0 %v668_v43 }
 0x121   : > { %9419 = vmatmul.mubr.msk.f32.vlgmr.msra.gmra.mxu1 %vm10619_vm3, %v10406_v18  ;;  %9463 = vmatmul.mubr.msk.f32.vlgmr.msra.gmra.mxu0 %vm841_vm4, %v10406_v18 }
 0x122   : > { %9421 = vmatprep.mubr.msk.f32.mxu1 %vm10629_vm5, %v10406_v18  ;;  %9465 = vmatprep.mubr.msk.f32.mxu0 %vm842_vm6, %v10406_v18 }
 0x123   : > { %9486 = vmatprep.subr.bf16.mxu0 %v10241_v4 }
 0x124   : > { %9487 = vmatpush3.bf16.msra.mxu0 %v10241_v4 }
 0x125   : > { %9422 = vmatmul.mubr.msk.f32.gmra.mxu1 %vm10650_vm7, %v10406_v18  ;;  %9466 = vmatmul.mubr.msk.f32.gmra.mxu0 %vm843_vm8, %v10406_v18 }
 0x126   : > { %9424 = vmatprep.mubr.msk.f32.mxu1 %vm707_vm9, %v10406_v18  ;;  %9468 = vmatprep.mubr.msk.f32.mxu0 %vm844_vm10, %v10406_v18  ;;  %vm847_vm9 = vcmp.eq.s32.totalorder %v10512_v15, %v839_v2  ;;  %vm977_vm10 = vcmask 261120   ;;  %v10249_v2 = vld [vmem:[%s12153_s2 + $0x58] sm:$0xff]  }
 0x127   : > { %980 = vst.msk [vmem:[#allocation2 + $0x10] sm:$0xff] %vm977_vm10, %v12164_v3  ;;  %978 = vst.msk [vmem:[#allocation2] sm:$0xff] %vm977_vm10, %v12164_v3  ;;  %9488 = vmatprep.subr.bf16.mxu0 %v10243_v6 }
 0x128   : > { %979 = vst.msk [vmem:[#allocation2 + $0x8] sm:$0xff] %vm977_vm10, %v12164_v3  ;;  %981 = vst.msk [vmem:[#allocation2 + $0x18] sm:$0xff] %vm977_vm10, %v12164_v3  ;;  %9489 = vmatpush3.bf16.msra.mxu0 %v10243_v6 }
 0x129   : > { %9425 = vmatmul.mubr.msk.f32.gmra.mxu1 %vm708_vm11, %v10406_v18  ;;  %9469 = vmatmul.mubr.msk.f32.gmra.mxu0 %vm845_vm12, %v10406_v18  ;;  %982 = vst.msk [vmem:[#allocation2 + $0x20] sm:$0xff] %vm977_vm10, %v12164_v3  ;;  %983 = vst.msk [vmem:[#allocation2 + $0x28] sm:$0xff] %vm977_vm10, %v12164_v3  ;;  %vm7754_vm11 = vcmask 1041408   ;;  %vm7750_vm12 = vcmask 15360  }
 0x12a   : > { %9427 = vmatprep.mubr.msk.f32.mxu1 %vm709_vm13, %v10406_v18  ;;  %9471 = vmatprep.mubr.msk.f32.mxu0 %vm846_vm14, %v10406_v18  ;;  %984 = vst.msk [vmem:[#allocation2 + $0x30] sm:$0xff] %vm977_vm10, %v12164_v3  ;;  %985 = vst.msk [vmem:[#allocation2 + $0x38] sm:$0xff] %vm977_vm10, %v12164_v3  ;;  %vm8286_vm14 = vcmask 1040384  }
 0x12b   : > { %986 = vst.msk [vmem:[#allocation2 + $0x40] sm:$0xff] %vm977_vm10, %v12164_v3  ;;  %987 = vst.msk [vmem:[#allocation2 + $0x48] sm:$0xff] %vm977_vm10, %v12164_v3  ;;  %9510 = vmatprep.subr.bf16.mxu0 %v10245_v8 }
 0x12c   : > { %6568 = vst.msk [vmem:[#allocation6] sm:$0xff] %vm977_vm10, %v12164_v3  ;;  %6569 = vst.msk [vmem:[#allocation6 + $0x8] sm:$0xff] %vm977_vm10, %v12164_v3 }
 0x12d   : > { %9428 = vmatmul.mubr.msk.f32.gmra.mxu1 %vm710_vm15, %v10406_v18  ;;  %9472 = vmatmul.mubr.msk.f32.gmra.mxu0 %vm847_vm9, %v10406_v18  ;;  %v10240_v18 = vld [vmem:[%s12153_s2 + $0x18] sm:$0xff]   ;;  %vm8289_vm15 = vcmask 843776  }
 0x12e   : > { %9474 = vmatprep.subr.bf16.mxu1 %v10240_v18 }
 0x12f   : > { %9475 = vmatpush3.bf16.msra.mxu1 %v10240_v18 }
 0x130   : > { %9476 = vmatprep.subr.bf16.mxu1 %v10242_v5 }
 0x133   : > { %9477 = vmatpush3.bf16.msra.mxu1 %v10242_v5 }
 0x134   : > { %9498 = vmatprep.subr.bf16.mxu1 %v10244_v7 }
 0x1e1   : > { %v9420_v9 = vpop.f32.mrf.mxu1  ;;  %v9464_v10 = vpop.f32.mrf.mxu0 }
 0x1e2   : > { %v970_v11 = vmax.f32 %v9420_v9, %v9464_v10 }
 0x1e3   : > { %v793_v12 = vpop.f32.mrf.mxu1  ;;  %v930_v14 = vpop.f32.mrf.mxu0 }
 0x1e4   : > { %989 = vst.msk [vmem:[#allocation2 + $0x10] sm:$0xff] %vm977_vm10, %v970_v11  ;;  %v969_v23 = vmax.f32 %v793_v12, %v930_v14 }
 0x1e5   : > { %v9423_v24 = vpop.f32.mrf.mxu1  ;;  %v9467_v25 = vpop.f32.mrf.mxu0 }
 0x1e6   : > { %988 = vst.msk [vmem:[#allocation2 + $0x8] sm:$0xff] %vm977_vm10, %v969_v23  ;;  %v972_v26 = vmax.f32 %v9423_v24, %v9467_v25 }
 0x1e7   : > { %v803_v21 = vpop.f32.mrf.mxu1  ;;  %v940_v27 = vpop.f32.mrf.mxu0 }
 0x1e8   : > { %991 = vst.msk [vmem:[#allocation2 + $0x20] sm:$0xff] %vm977_vm10, %v972_v26  ;;  %v971_v28 = vmax.f32 %v803_v21, %v940_v27 }
 0x1e9   : > { %v9426_v29 = vpop.f32.mrf.mxu1  ;;  %v9470_v19 = vpop.f32.mrf.mxu0 }
 0x1ea   : > { %990 = vst.msk [vmem:[#allocation2 + $0x18] sm:$0xff] %vm977_vm10, %v971_v28  ;;  %v974_v30 = vmax.f32 %v9426_v29, %v9470_v19 }
 0x1eb   : > { %v813_v32 = vpop.f32.mrf.mxu1  ;;  %v950_v33 = vpop.f32.mrf.mxu0  ;;  %v10916_v3 = vld [vmem:[#allocation2 + $0x10] sm:$0xff] }
 0x1ec   : > { %993 = vst.msk [vmem:[#allocation2 + $0x30] sm:$0xff] %vm977_vm10, %v974_v30  ;;  %v973_v22 = vmax.f32 %v813_v32, %v950_v33  ;;  %v10250_v33 = vld [vmem:[%s12153_s2 + $0x40] sm:$0xff]  }
 0x1ed   : > { %v9429_v34 = vpop.f32.mrf.mxu1  ;;  %v9473_v35 = vpop.f32.mrf.mxu0  ;;  %v1012_v36 = vld [vmem:[#allocation2 + $0x2] sm:$0xff]  ;;  %v10726_v37 = vld [vmem:[#allocation2 + $0xa] sm:$0xff] }
 0x1ee   : > { %v996_v20 = vld [vmem:[#allocation2 + $0x1] sm:$0xff]  ;;  %992 = vst.msk [vmem:[#allocation2 + $0x28] sm:$0xff] %vm977_vm10, %v973_v22  ;;  %v976_v31 = vmax.f32 %v9429_v34, %v9473_v35  ;;  %v1020_v38 = vpack.c.bf16 %v10726_v37, %v1012_v36  ;;  %v10730_v39 = vld [vmem:[#allocation2 + $0x9] sm:$0xff]  ;;  %v10253_v36 = vld [vmem:[%s12153_s2 + $0x78] sm:$0xff]  }
 0x1ef   : > { %v823_v40 = vpop.f32.mrf.mxu1  ;;  %v960_v41 = vpop.f32.mrf.mxu0  ;;  %v1004_v42 = vpack.c.bf16 %v10730_v39, %v996_v20  ;;  %v1207_v1 = vld [vmem:[#allocation2 + $0x3] sm:$0xff]  ;;  %v10776_v18 = vld [vmem:[#allocation2 + $0xb] sm:$0xff] }
 0x1f0   : > { %995 = vst.msk [vmem:[#allocation2 + $0x40] sm:$0xff] %vm977_vm10, %v976_v31  ;;  %v975_v44 = vmax.f32 %v823_v40, %v960_v41  ;;  %9478 = vmatprep.mubr.msk.bf16.mxu1 %vm977_vm10, %v1020_v38  ;;  %v1321_v4 = vld [vmem:[#allocation2 + $0x4] sm:$0xff]  ;;  %v10778_v5 = vld [vmem:[#allocation2 + $0xc] sm:$0xff]  ;;  %v1215_v12 = vpack.c.bf16 %v10776_v18, %v1207_v1 }
 0x1f1   : > { %9490 = vmatprep.mubr.msk.bf16.mxu0 %vm977_vm10, %v1004_v42  ;;  %v10736_v45 = vld [vmem:[#allocation2 + $0x12] sm:$0xff]  ;;  %v10738_v46 = vld [vmem:[#allocation2 + $0x1a] sm:$0xff]  ;;  %v1329_v14 = vpack.c.bf16 %v10778_v5, %v1321_v4  ;;  %v10252_v35 = vld [vmem:[%s12153_s2 + $0x68] sm:$0xff]  }
 0x1f2   : > { %v10740_v47 = vld [vmem:[#allocation2 + $0x11] sm:$0xff]  ;;  %994 = vst.msk [vmem:[#allocation2 + $0x38] sm:$0xff] %vm977_vm10, %v975_v44  ;;  %v1021_v50 = vpack.c.bf16 %v10738_v46, %v10736_v45  ;;  %v10745_v51 = vld [vmem:[#allocation2 + $0x19] sm:$0xff]  ;;  %v1435_v38 = vld [vmem:[#allocation2 + $0x5] sm:$0xff]  ;;  %v2013_v17 = vpack.c.bf16 %v10736_v45, %v10726_v37 }
 0x1f3   : > { %v1005_v54 = vpack.c.bf16 %v10745_v51, %v10740_v47  ;;  %v10799_v23 = vld [vmem:[#allocation2 + $0x13] sm:$0xff]  ;;  %v10801_v24 = vld [vmem:[#allocation2 + $0x1b] sm:$0xff]  ;;  %v1549_v44 = vld [vmem:[#allocation2 + $0x6] sm:$0xff] }
 0x1f4   : > { %9479 = vmatmul.mubr.msk.bf16.vlgmr.msra.gmra.mxu1 %vm977_vm10, %v1021_v50  ;;  %v10803_v25 = vld [vmem:[#allocation2 + $0x14] sm:$0xff]  ;;  %v10805_v26 = vld [vmem:[#allocation2 + $0x1c] sm:$0xff]  ;;  %v1216_v19 = vpack.c.bf16 %v10801_v24, %v10799_v23 }
 0x1f5   : > { %9491 = vmatmul.mubr.msk.bf16.vlgmr.msra.gmra.mxu0 %vm977_vm10, %v1005_v54  ;;  %v10757_v43 = vld [vmem:[#allocation2 + $0x22] sm:$0xff]  ;;  %v10759_v58 = vld [vmem:[#allocation2 + $0x2a] sm:$0xff]  ;;  %9499 = vmatpush3.bf16.msra.mxu1 %v10244_v7  ;;  %v1330_v30 = vpack.c.bf16 %v10805_v26, %v10803_v25  ;;  %v10865_v1 = vld [vmem:[#allocation2 + $0x16] sm:$0xff] }
 0x1f6   : > { %v10761_v59 = vld [vmem:[#allocation2 + $0x21] sm:$0xff]  ;;  %v1022_v60 = vpack.c.bf16 %v10759_v58, %v10757_v43  ;;  %v10765_v61 = vld [vmem:[#allocation2 + $0x29] sm:$0xff]  ;;  %9511 = vmatpush3.bf16.msra.mxu0 %v10245_v8  ;;  %9500 = vmatprep.subr.bf16.mxu1 %v10246_v52 }
 0x1f7   : > { %v1006_v0 = vpack.c.bf16 %v10765_v61, %v10761_v59  ;;  %9512 = vmatprep.subr.bf16.mxu0 %v10247_v55  ;;  %v10807_v21 = vld [vmem:[#allocation2 + $0x23] sm:$0xff]  ;;  %v10809_v27 = vld [vmem:[#allocation2 + $0x2b] sm:$0xff] }
 0x1f8   : > { %9482 = vmatprep.mubr.msk.bf16.mxu1 %vm977_vm10, %v1022_v60  ;;  %v10811_v28 = vld [vmem:[#allocation2 + $0x24] sm:$0xff]  ;;  %v10813_v29 = vld [vmem:[#allocation2 + $0x2c] sm:$0xff]  ;;  %v1217_v32 = vpack.c.bf16 %v10809_v27, %v10807_v21 }
 0x1f9   : > { %9494 = vmatprep.mubr.msk.bf16.mxu0 %vm977_vm10, %v1006_v0  ;;  %v10781_v6 = vld [vmem:[#allocation2 + $0x32] sm:$0xff]  ;;  %v10783_v7 = vld [vmem:[#allocation2 + $0x3a] sm:$0xff]  ;;  %9501 = vmatpush3.bf16.msra.mxu1 %v10246_v52  ;;  %v1331_v22 = vpack.c.bf16 %v10813_v29, %v10811_v28  ;;  %v10869_v4 = vld [vmem:[#allocation2 + $0x25] sm:$0xff] }
 0x1fa   : > { %v10785_v8 = vld [vmem:[#allocation2 + $0x31] sm:$0xff]  ;;  %v1023_v9 = vpack.c.bf16 %v10783_v7, %v10781_v6  ;;  %v10789_v10 = vld [vmem:[#allocation2 + $0x39] sm:$0xff]  ;;  %9513 = vmatpush3.bf16.msra.mxu0 %v10247_v55  ;;  %9522 = vmatprep.subr.bf16.mxu1 %v10248_v63  ;;  %v10929_v57 = vld [vmem:[#allocation2 + $0x27] sm:$0xff]  ;;  %v2015_v45 = vpack.c.bf16 %v10781_v6, %v10759_v58  ;;  %v2241_v6 = vpack.c.bf16 %v10803_v25, %v10778_v5 }
 0x1fb   : > { %v1007_v11 = vpack.c.bf16 %v10789_v10, %v10785_v8  ;;  %9534 = vmatprep.subr.bf16.mxu0 %v10249_v2  ;;  %v10251_v34 = vld [vmem:[%s12153_s2 + $0x50] sm:$0xff]   ;;  %v10841_v31 = vld [vmem:[#allocation2 + $0x3b] sm:$0xff] }
 0x1fc   : > { %9483 = vmatmul.mubr.msk.bf16.gmra.mxu1 %vm977_vm10, %v1023_v9  ;;  %v10839_v20 = vld [vmem:[#allocation2 + $0x33] sm:$0xff]  ;;  %v10845_v41 = vld [vmem:[#allocation2 + $0x3c] sm:$0xff] }
 0x1fd   : > { %9495 = vmatmul.mubr.msk.bf16.gmra.mxu0 %vm977_vm10, %v1007_v11  ;;  %9502 = vmatprep.mubr.msk.bf16.mxu1 %vm977_vm10, %v1215_v12  ;;  %v10843_v40 = vld [vmem:[#allocation2 + $0x34] sm:$0xff]  ;;  %v1218_v52 = vpack.c.bf16 %v10841_v31, %v10839_v20  ;;  %v10863_v0 = vld [vmem:[#allocation2 + $0x1d] sm:$0xff]  ;;  %v10873_v11 = vld [vmem:[#allocation2 + $0x26] sm:$0xff] }
 0x1fe   : > { %9514 = vmatprep.mubr.msk.bf16.mxu0 %vm977_vm10, %v1329_v14  ;;  %v10847_v42 = vld [vmem:[#allocation2 + $0xd] sm:$0xff]  ;;  %v1332_v54 = vpack.c.bf16 %v10845_v41, %v10843_v40  ;;  %v10925_v13 = vld [vmem:[#allocation2 + $0x1f] sm:$0xff]  ;;  %v10957_v56 = vld [vmem:[#allocation2 + $0x37] sm:$0xff] }
 0x1ff   : > { %v10849_v50 = vld [vmem:[#allocation2 + $0xe] sm:$0xff]  ;;  %v1443_v55 = vpack.c.bf16 %v10847_v42, %v1435_v38  ;;  %v10257_v38 = vld [vmem:[%s12153_s2 + $0x98] sm:$0xff]   ;;  %v10262_v37 = vld [vmem:[%s12153_s2 + $0xa0] sm:$0xff]  }
 0x200   : > { %v1557_v60 = vpack.c.bf16 %v10849_v50, %v1549_v44  ;;  %v10871_v9 = vld [vmem:[#allocation2 + $0x2d] sm:$0xff]  ;;  %v10901_v44 = vld [vmem:[#allocation2 + $0x35] sm:$0xff]  ;;  %v10959_v16 = vld [vmem:[#allocation2 + $0x3f] sm:$0xff] }
 0x201   : > { %v10875_v12 = vld [vmem:[#allocation2 + $0x2e] sm:$0xff]  ;;  %v10964_v15 = vld [vmem:[#allocation2 + $0x38] sm:$0xff]  ;;  %v2012_v58 = vld [vmem:[#allocation2 + $0x42] sm:$0xff] }
 0x202   : > { %v10943_v62 = vld [vmem:[#allocation2 + $0x30] sm:$0xff]  ;;  %v10266_v5 = vld [vmem:[%s12153_s2 + $0xc0] sm:$0xff]   ;;  %v10269_v25 = vld [vmem:[%s12153_s2 + $0xf8] sm:$0xff]  }
 0x204   : > { %9503 = vmatmul.mubr.msk.bf16.vlgmr.msra.gmra.mxu1 %vm977_vm10, %v1216_v19 }
 0x205   : > { %9515 = vmatmul.mubr.msk.bf16.vlgmr.msra.gmra.mxu0 %vm977_vm10, %v1330_v30  ;;  %9506 = vmatprep.mubr.msk.bf16.mxu1 %vm977_vm10, %v1217_v32  ;;  %v1445_v30 = vpack.c.bf16 %v10871_v9, %v10869_v4  ;;  %v10254_v32 = vld [vmem:[%s12153_s2 + $0x60] sm:$0xff]  }
 0x206   : > { %9518 = vmatprep.mubr.msk.bf16.mxu0 %vm977_vm10, %v1331_v22  ;;  %9523 = vmatpush3.bf16.msra.mxu1 %v10248_v63  ;;  %v10861_v63 = vld [vmem:[#allocation2 + $0x15] sm:$0xff] }
 0x207   : > { %9535 = vmatpush3.bf16.msra.mxu0 %v10249_v2  ;;  %9524 = vmatprep.subr.bf16.mxu1 %v10250_v33  ;;  %v10867_v2 = vld [vmem:[#allocation2 + $0x1e] sm:$0xff]  ;;  %v1444_v14 = vpack.c.bf16 %v10863_v0, %v10861_v63  ;;  %v10255_v22 = vld [vmem:[%s12153_s2 + $0x70] sm:$0xff]  }
 0x208   : > { %9536 = vmatprep.subr.bf16.mxu0 %v10251_v34  ;;  %v1558_v19 = vpack.c.bf16 %v10867_v2, %v10865_v1 }
 0x20a   : > { %9525 = vmatpush3.bf16.msra.mxu1 %v10250_v33  ;;  %v1559_v33 = vpack.c.bf16 %v10875_v12, %v10873_v11 }
 0x20b   : > { %9537 = vmatpush3.bf16.msra.mxu0 %v10251_v34  ;;  %9546 = vmatprep.subr.bf16.mxu1 %v10252_v35  ;;  %v10256_v34 = vld [vmem:[%s12153_s2 + $0x88] sm:$0xff]  }
 0x20c   : > { %9507 = vmatmul.mubr.msk.bf16.gmra.mxu1 %vm977_vm10, %v1218_v52  ;;  %9558 = vmatprep.subr.bf16.mxu0 %v10253_v36  ;;  %v10903_v52 = vld [vmem:[#allocation2 + $0x3d] sm:$0xff] }
 0x20d   : > { %9519 = vmatmul.mubr.msk.bf16.gmra.mxu0 %vm977_vm10, %v1332_v54  ;;  %9526 = vmatprep.mubr.msk.bf16.mxu1 %vm977_vm10, %v1443_v55  ;;  %v10905_v54 = vld [vmem:[#allocation2 + $0x36] sm:$0xff]  ;;  %v10907_v55 = vld [vmem:[#allocation2 + $0x3e] sm:$0xff] }
 0x20e   : > { %9538 = vmatprep.mubr.msk.bf16.mxu0 %vm977_vm10, %v1557_v60  ;;  %v1663_v60 = vld [vmem:[#allocation2 + $0x7] sm:$0xff] }
 0x214   : > { %9527 = vmatmul.mubr.msk.bf16.vlgmr.msra.gmra.mxu1 %vm977_vm10, %v1444_v14  ;;  %v1777_v14 = vld [vmem:[#allocation2 + $0x8] sm:$0xff] }
 0x215   : > { %9539 = vmatmul.mubr.msk.bf16.vlgmr.msra.gmra.mxu0 %vm977_vm10, %v1558_v19  ;;  %9530 = vmatprep.mubr.msk.bf16.mxu1 %vm977_vm10, %v1445_v30  ;;  %v1446_v19 = vpack.c.bf16 %v10903_v52, %v10901_v44  ;;  %v1560_v30 = vpack.c.bf16 %v10907_v55, %v10905_v54 }
 0x216   : > { %9542 = vmatprep.mubr.msk.bf16.mxu0 %vm977_vm10, %v1559_v33  ;;  %9547 = vmatpush3.bf16.msra.mxu1 %v10252_v35  ;;  %v10909_v35 = vld [vmem:[#allocation2 + $0xf] sm:$0xff] }
 0x217   : > { %9559 = vmatpush3.bf16.msra.mxu0 %v10253_v36  ;;  %9548 = vmatprep.subr.bf16.mxu1 %v10254_v32  ;;  %v1671_v33 = vpack.c.bf16 %v10909_v35, %v1663_v60  ;;  %v1785_v36 = vpack.c.bf16 %v10916_v3, %v1777_v14  ;;  %v10927_v60 = vld [vmem:[#allocation2 + $0x18] sm:$0xff] }
 0x218   : > { %9560 = vmatprep.subr.bf16.mxu0 %v10255_v22 }
 0x21a   : > { %9549 = vmatpush3.bf16.msra.mxu1 %v10254_v32  ;;  %v10923_v32 = vld [vmem:[#allocation2 + $0x17] sm:$0xff] }
 0x21b   : > { %9561 = vmatpush3.bf16.msra.mxu0 %v10255_v22  ;;  %9570 = vmatprep.subr.bf16.mxu1 %v10256_v34  ;;  %v10931_v22 = vld [vmem:[#allocation2 + $0x2f] sm:$0xff]  ;;  %v1672_v14 = vpack.c.bf16 %v10925_v13, %v10923_v32 }
 0x21c   : > { %9531 = vmatmul.mubr.msk.bf16.gmra.mxu1 %vm977_vm10, %v1446_v19  ;;  %9582 = vmatprep.subr.bf16.mxu0 %v10257_v38  ;;  %v10933_v19 = vld [vmem:[#allocation2 + $0x28] sm:$0xff] }
 0x21d   : > { %9543 = vmatmul.mubr.msk.bf16.gmra.mxu0 %vm977_vm10, %v1560_v30  ;;  %9550 = vmatprep.mubr.msk.bf16.mxu1 %vm977_vm10, %v1671_v33  ;;  %v10937_v30 = vld [vmem:[#allocation2 + $0x20] sm:$0xff]  ;;  %v1787_v49 = vpack.c.bf16 %v10943_v62, %v10933_v19 }
 0x21e   : > { %9562 = vmatprep.mubr.msk.bf16.mxu0 %vm977_vm10, %v1785_v36  ;;  %v1786_v33 = vpack.c.bf16 %v10937_v30, %v10927_v60  ;;  %v1673_v36 = vpack.c.bf16 %v10931_v22, %v10929_v57 }
 0x224   : > { %9551 = vmatmul.mubr.msk.bf16.vlgmr.msra.gmra.mxu1 %vm977_vm10, %v1672_v14  ;;  %v10260_v14 = vld [vmem:[%s12153_s2 + $0xa8] sm:$0xff]  }
 0x225   : > { %9563 = vmatmul.mubr.msk.bf16.vlgmr.msra.gmra.mxu0 %vm977_vm10, %v1786_v33  ;;  %9554 = vmatprep.mubr.msk.bf16.mxu1 %vm977_vm10, %v1673_v36  ;;  %v10261_v33 = vld [vmem:[%s12153_s2 + $0xb8] sm:$0xff]   ;;  %v1899_v36 = vpack.c.bf16 %v10740_v47, %v10730_v39  ;;  %v2014_v39 = vpack.c.bf16 %v10757_v43, %v10738_v46  ;;  %v10264_v46 = vld [vmem:[%s12153_s2 + $0xc8] sm:$0xff]  }
 0x226   : > { %9566 = vmatprep.mubr.msk.bf16.mxu0 %vm977_vm10, %v1787_v49  ;;  %9571 = vmatpush3.bf16.msra.mxu1 %v10256_v34  ;;  %v1674_v49 = vpack.c.bf16 %v10959_v16, %v10957_v56  ;;  %v10971_v34 = vld [vmem:[#allocation2 + $0x40] sm:$0xff]  ;;  %v10265_v47 = vld [vmem:[%s12153_s2 + $0xd8] sm:$0xff]  }
 0x227   : > { %9583 = vmatpush3.bf16.msra.mxu0 %v10257_v38  ;;  %9572 = vmatprep.subr.bf16.mxu1 %v10258_v53  ;;  %v1788_v38 = vpack.c.bf16 %v10971_v34, %v10964_v15 }
 0x228   : > { %9584 = vmatprep.subr.bf16.mxu0 %v10259_v48 }
 0x22a   : > { %9573 = vmatpush3.bf16.msra.mxu1 %v10258_v53  ;;  %v1900_v53 = vpack.c.bf16 %v10761_v59, %v10745_v51  ;;  %v1898_v51 = vld [vmem:[#allocation2 + $0x41] sm:$0xff]  ;;  %v2016_v59 = vpack.c.bf16 %v2012_v58, %v10783_v7  ;;  %v2128_v7 = vpack.c.bf16 %v10807_v21, %v10801_v24 }
 0x22b   : > { %9585 = vmatpush3.bf16.msra.mxu0 %v10259_v48  ;;  %9594 = vmatprep.subr.bf16.mxu1 %v10260_v14  ;;  %v1901_v48 = vpack.c.bf16 %v10785_v8, %v10765_v61  ;;  %v1902_v43 = vpack.c.bf16 %v1898_v51, %v10789_v10  ;;  %v2127_v61 = vpack.c.bf16 %v10799_v23, %v10776_v18  ;;  %v10267_v23 = vld [vmem:[%s12153_s2 + $0xd0] sm:$0xff]   ;;  %v10268_v24 = vld [vmem:[%s12153_s2 + $0xe8] sm:$0xff]  }
 0x22c   : > { %9555 = vmatmul.mubr.msk.bf16.gmra.mxu1 %vm977_vm10, %v1674_v49  ;;  %9606 = vmatprep.subr.bf16.mxu0 %v10261_v33  ;;  %v2242_v18 = vpack.c.bf16 %v10811_v28, %v10805_v26  ;;  %v2129_v8 = vpack.c.bf16 %v10839_v20, %v10809_v27  ;;  %v2243_v10 = vpack.c.bf16 %v10843_v40, %v10813_v29  ;;  %v2126_v26 = vld [vmem:[#allocation2 + $0x43] sm:$0xff] }
 0x22d   : > { %9567 = vmatmul.mubr.msk.bf16.gmra.mxu0 %vm977_vm10, %v1788_v38  ;;  %9574 = vmatprep.mubr.msk.bf16.mxu1 %vm977_vm10, %v1899_v36  ;;  %v2130_v21 = vpack.c.bf16 %v2126_v26, %v10841_v31  ;;  %v2240_v27 = vld [vmem:[#allocation2 + $0x44] sm:$0xff]  ;;  %v2355_v29 = vpack.c.bf16 %v10861_v63, %v10847_v42  ;;  %v2469_v20 = vpack.c.bf16 %v10865_v1, %v10849_v50  ;;  %v10271_v63 = vld [vmem:[%s12153_s2 + $0xf0] sm:$0xff]  }
 0x22e   : > { %9586 = vmatprep.mubr.msk.bf16.mxu0 %vm977_vm10, %v2013_v17  ;;  %v10263_v17 = vld [vmem:[%s12153_s2 + $0xb0] sm:$0xff]   ;;  %v2244_v28 = vpack.c.bf16 %v2240_v27, %v10845_v41  ;;  %v2356_v31 = vpack.c.bf16 %v10869_v4, %v10863_v0  ;;  %v2470_v40 = vpack.c.bf16 %v10873_v11, %v10867_v2  ;;  %v2357_v41 = vpack.c.bf16 %v10901_v44, %v10871_v9  ;;  %v10270_v42 = vld [vmem:[%s12153_s2 + $0xe0] sm:$0xff]  }
 0x22f   : > { %v2471_v50 = vpack.c.bf16 %v10905_v54, %v10875_v12  ;;  %v2354_v0 = vld [vmem:[#allocation2 + $0x45] sm:$0xff]  ;;  %v2583_v9 = vpack.c.bf16 %v10923_v32, %v10909_v35  ;;  %v2697_v11 = vpack.c.bf16 %v10927_v60, %v10916_v3  ;;  %v2584_v12 = vpack.c.bf16 %v10929_v57, %v10925_v13 }
 0x230   : > { %v2358_v1 = vpack.c.bf16 %v2354_v0, %v10903_v52  ;;  %v2468_v2 = vld [vmem:[#allocation2 + $0x46] sm:$0xff]  ;;  %v2698_v44 = vpack.c.bf16 %v10933_v19, %v10937_v30  ;;  %v2585_v52 = vpack.c.bf16 %v10957_v56, %v10931_v22  ;;  %v2699_v3 = vpack.c.bf16 %v10964_v15, %v10943_v62 }
 0x231   : > { %v2472_v4 = vpack.c.bf16 %v2468_v2, %v10907_v55  ;;  %v2696_v54 = vld [vmem:[#allocation2 + $0x48] sm:$0xff]  ;;  %v12201_v13 = vmov 0.0  }
 0x232   : > { %v2582_v55 = vld [vmem:[#allocation2 + $0x47] sm:$0xff]  ;;  %v11094_v35 = vsel %vm10517_vm1, 1.0, %v12201_v13  ;;  %v11101_v15 = vsel %vm840_vm2, 1.0, %v12201_v13  ;;  %v2700_v62 = vpack.c.bf16 %v2696_v54, %v10971_v34  ;;  %vm3048_vm1 = vcmask 130048  }
 0x233   : > { %12203 = vst [vmem:[#allocation10_spill] sm:$0xff] %v11094_v35  ;;  %v2586_v56 = vpack.c.bf16 %v2582_v55, %v10959_v16  ;;  %12206 = vst [vmem:[#allocation9_spill] sm:$0xff] %v11101_v15  ;;  %vm10408_vm2 = vmmov 0  }
 0x234   : > { %9575 = vmatmul.mubr.msk.bf16.vlgmr.msra.gmra.mxu1 %vm977_vm10, %v1900_v53 }
 0x235   : > { %9587 = vmatmul.mubr.msk.bf16.vlgmr.msra.gmra.mxu0 %vm977_vm10, %v2014_v39  ;;  %9578 = vmatprep.mubr.msk.bf16.mxu1 %vm977_vm10, %v1901_v48 }
 0x236   : > { %9590 = vmatprep.mubr.msk.bf16.mxu0 %vm977_vm10, %v2015_v45  ;;  %9595 = vmatpush3.bf16.msra.mxu1 %v10260_v14 }
 0x237   : > { %9607 = vmatpush3.bf16.msra.mxu0 %v10261_v33  ;;  %9596 = vmatprep.subr.bf16.mxu1 %v10262_v37 }
 0x238   : > { %9608 = vmatprep.subr.bf16.mxu0 %v10263_v17 }
 0x23a   : > { %9597 = vmatpush3.bf16.msra.mxu1 %v10262_v37 }
 0x23b   : > { %9609 = vmatpush3.bf16.msra.mxu0 %v10263_v17  ;;  %9618 = vmatprep.subr.bf16.mxu1 %v10264_v46 }
 0x23c   : > { %9579 = vmatmul.mubr.msk.bf16.gmra.mxu1 %vm977_vm10, %v1902_v43  ;;  %9630 = vmatprep.subr.bf16.mxu0 %v10265_v47 }
 0x23d   : > { %9591 = vmatmul.mubr.msk.bf16.gmra.mxu0 %vm977_vm10, %v2016_v59  ;;  %9598 = vmatprep.mubr.msk.bf16.mxu1 %vm977_vm10, %v2127_v61 }
 0x23e   : > { %9610 = vmatprep.mubr.msk.bf16.mxu0 %vm977_vm10, %v2241_v6 }
 0x244   : > { %9599 = vmatmul.mubr.msk.bf16.vlgmr.msra.gmra.mxu1 %vm977_vm10, %v2128_v7 }
 0x245   : > { %9611 = vmatmul.mubr.msk.bf16.vlgmr.msra.gmra.mxu0 %vm977_vm10, %v2242_v18  ;;  %9602 = vmatprep.mubr.msk.bf16.mxu1 %vm977_vm10, %v2129_v8 }
 0x246   : > { %9614 = vmatprep.mubr.msk.bf16.mxu0 %vm977_vm10, %v2243_v10  ;;  %9619 = vmatpush3.bf16.msra.mxu1 %v10264_v46 }
 0x247   : > { %9631 = vmatpush3.bf16.msra.mxu0 %v10265_v47  ;;  %9620 = vmatprep.subr.bf16.mxu1 %v10266_v5 }
 0x248   : > { %9632 = vmatprep.subr.bf16.mxu0 %v10267_v23 }
 0x24a   : > { %9621 = vmatpush3.bf16.msra.mxu1 %v10266_v5 }
 0x24b   : > { %9633 = vmatpush3.bf16.msra.mxu0 %v10267_v23  ;;  %9642 = vmatprep.subr.bf16.mxu1 %v10268_v24 }
 0x24c   : > { %9603 = vmatmul.mubr.msk.bf16.gmra.mxu1 %vm977_vm10, %v2130_v21  ;;  %9654 = vmatprep.subr.bf16.mxu0 %v10269_v25 }
 0x24d   : > { %9615 = vmatmul.mubr.msk.bf16.gmra.mxu0 %vm977_vm10, %v2244_v28  ;;  %9622 = vmatprep.mubr.msk.bf16.mxu1 %vm977_vm10, %v2355_v29 }
 0x24e   : > { %9634 = vmatprep.mubr.msk.bf16.mxu0 %vm977_vm10, %v2469_v20 }
 0x254   : > { %9623 = vmatmul.mubr.msk.bf16.vlgmr.msra.gmra.mxu1 %vm977_vm10, %v2356_v31 }
 0x255   : > { %9635 = vmatmul.mubr.msk.bf16.vlgmr.msra.gmra.mxu0 %vm977_vm10, %v2470_v40  ;;  %9626 = vmatprep.mubr.msk.bf16.mxu1 %vm977_vm10, %v2357_v41 }
 0x256   : > { %9638 = vmatprep.mubr.msk.bf16.mxu0 %vm977_vm10, %v2471_v50  ;;  %9643 = vmatpush3.bf16.msra.mxu1 %v10268_v24 }
 0x257   : > { %9655 = vmatpush3.bf16.msra.mxu0 %v10269_v25  ;;  %9644 = vmatprep.subr.bf16.mxu1 %v10270_v42 }
 0x258   : > { %9656 = vmatprep.subr.bf16.mxu0 %v10271_v63 }
 0x25a   : > { %9645 = vmatpush3.bf16.msra.mxu1 %v10270_v42 }
 0x25b   : > { %9657 = vmatpush3.bf16.msra.mxu0 %v10271_v63 }
 0x25c   : > { %9627 = vmatmul.mubr.msk.bf16.gmra.mxu1 %vm977_vm10, %v2358_v1 }
 0x25d   : > { %9639 = vmatmul.mubr.msk.bf16.gmra.mxu0 %vm977_vm10, %v2472_v4  ;;  %9646 = vmatprep.mubr.msk.bf16.mxu1 %vm977_vm10, %v2583_v9 }
 0x25e   : > { %9658 = vmatprep.mubr.msk.bf16.mxu0 %vm977_vm10, %v2697_v11 }
 0x264   : > { %9647 = vmatmul.mubr.msk.bf16.vlgmr.msra.gmra.mxu1 %vm977_vm10, %v2584_v12 }
 0x265   : > { %9659 = vmatmul.mubr.msk.bf16.vlgmr.msra.gmra.mxu0 %vm977_vm10, %v2698_v44  ;;  %9650 = vmatprep.mubr.msk.bf16.mxu1 %vm977_vm10, %v2585_v52 }
 0x266   : > { %9662 = vmatprep.mubr.msk.bf16.mxu0 %vm977_vm10, %v2699_v3 }
 0x26c   : > { %9651 = vmatmul.mubr.msk.bf16.gmra.mxu1 %vm977_vm10, %v2586_v56 }
 0x26d   : > { %9663 = vmatmul.mubr.msk.bf16.gmra.mxu0 %vm977_vm10, %v2700_v62  ;;  %9682 = vmatprep.mubr.msk.f32.mxu1 %vm506_vm0, %v11094_v35 }
 0x26e   : > { %9704 = vmatprep.mubr.msk.f32.mxu0 %vm506_vm0, %v11101_v15 }
 0x2b4   : > { %v9480_v22 = vpop.f32.mrf.mxu1 }
 0x2b5   : > { %v9492_v16 = vpop.f32.mrf.mxu0 }
 0x2b6   : > { %v1185_v19 = vadd.f32 %v9492_v16, %v9480_v22  ;;  %v11110_v30 = vpop.f32.mrf.mxu1 }
 0x2b7   : > { %v11112_v14 = vpop.f32.mrf.mxu0 }
 0x2b8   : > { %v9481_v33 = vpop.f32.mrf.mxu1  ;;  %v1177_v13 = vadd.f32 %v11112_v14, %v11110_v30 }
 0x2b9   : > { %v9493_v49 = vpop.f32.mrf.mxu0 }
 0x2ba   : > { %v1188_v34 = vadd.f32 %v9493_v49, %v9481_v33  ;;  %v1090_v38 = vpop.f32.mrf.mxu1 }
 0x2bb   : > { %v1179_v36 = vpop.f32.mrf.mxu0 }
 0x2bc   : > { %v1180_v53 = vadd.f32 %v1179_v36, %v1090_v38  ;;  %v9484_v39 = vpop.f32.mrf.mxu1 }
 0x2bd   : > { %v9496_v48 = vpop.f32.mrf.mxu0 }
 0x2be   : > { %v1201_v37 = vadd.f32 %v9496_v48, %v9484_v39  ;;  %v11114_v45 = vpop.f32.mrf.mxu1 }
 0x2bf   : > { %v11116_v17 = vpop.f32.mrf.mxu0 }
 0x2c0   : > { %v9485_v46 = vpop.f32.mrf.mxu1 }
 0x2c1   : > { %v9497_v47 = vpop.f32.mrf.mxu0 }
 0x2c2   : > { %v1204_v51 = vadd.f32 %v9497_v47, %v9485_v46  ;;  %v1106_v43 = vpop.f32.mrf.mxu1 }
 0x2c3   : > { %v1195_v58 = vpop.f32.mrf.mxu0 }
 0x2c4   : > { %v1196_v59 = vadd.f32 %v1195_v58, %v1106_v43  ;;  %v9504_v61 = vpop.f32.mrf.mxu1 }
 0x2c5   : > { %v1315_v6 = vadd.f32 %v9504_v61, %v1185_v19  ;;  %v9516_v7 = vpop.f32.mrf.mxu0 }
 0x2c6   : > { %v11118_v18 = vpop.f32.mrf.mxu1 }
 0x2c7   : > { %v1429_v8 = vadd.f32 %v9516_v7, %v1315_v6  ;;  %v11120_v5 = vpop.f32.mrf.mxu0 }
 0x2c8   : > { %v9505_v10 = vpop.f32.mrf.mxu1 }
 0x2c9   : > { %v1316_v23 = vadd.f32 %v9505_v10, %v1188_v34  ;;  %v9517_v24 = vpop.f32.mrf.mxu0 }
 0x2ca   : > { %v1285_v25 = vpop.f32.mrf.mxu1 }
 0x2cb   : > { %v1430_v26 = vadd.f32 %v9517_v24, %v1316_v23  ;;  %v1314_v21 = vadd.f32 %v1285_v25, %v1180_v53  ;;  %v1399_v27 = vpop.f32.mrf.mxu0 }
 0x2cc   : > { %v9508_v28 = vpop.f32.mrf.mxu1 }
 0x2cd   : > { %v1428_v29 = vadd.f32 %v1399_v27, %v1314_v21  ;;  %v1319_v20 = vadd.f32 %v9508_v28, %v1201_v37  ;;  %v9520_v31 = vpop.f32.mrf.mxu0 }
 0x2ce   : > { %v11122_v40 = vpop.f32.mrf.mxu1 }
 0x2cf   : > { %v1433_v41 = vadd.f32 %v9520_v31, %v1319_v20  ;;  %v11124_v42 = vpop.f32.mrf.mxu0 }
 0x2d0   : > { %v9509_v50 = vpop.f32.mrf.mxu1 }
 0x2d1   : > { %v1320_v63 = vadd.f32 %v9509_v50, %v1204_v51  ;;  %v9521_v0 = vpop.f32.mrf.mxu0 }
 0x2d2   : > { %v1301_v1 = vpop.f32.mrf.mxu1 }
 0x2d3   : > { %v11126_v2 = vadd.f32 %v9521_v0, %v1320_v63  ;;  %v1318_v4 = vadd.f32 %v1301_v1, %v1196_v59  ;;  %v1415_v9 = vpop.f32.mrf.mxu0 }
 0x2d4   : > { %v9528_v11 = vpop.f32.mrf.mxu1 }
 0x2d5   : > { %v11128_v12 = vadd.f32 %v1415_v9, %v1318_v4  ;;  %v1543_v44 = vadd.f32 %v9528_v11, %v1429_v8  ;;  %v9540_v52 = vpop.f32.mrf.mxu0 }
 0x2d6   : > { %v11130_v3 = vpop.f32.mrf.mxu1 }
 0x2d7   : > { %v1657_v54 = vadd.f32 %v9540_v52, %v1543_v44  ;;  %v11132_v55 = vpop.f32.mrf.mxu0 }
 0x2d8   : > { %v9529_v57 = vpop.f32.mrf.mxu1 }
 0x2d9   : > { %v1544_v56 = vadd.f32 %v9529_v57, %v1430_v26  ;;  %v9541_v60 = vpop.f32.mrf.mxu0 }
 0x2da   : > { %v1513_v62 = vpop.f32.mrf.mxu1 }
 0x2db   : > { %v1658_v22 = vadd.f32 %v9541_v60, %v1544_v56  ;;  %v11134_v16 = vadd.f32 %v1513_v62, %v1428_v29  ;;  %v11136_v19 = vpop.f32.mrf.mxu0 }
 0x2dc   : > { %v9532_v33 = vpop.f32.mrf.mxu1 }
 0x2dd   : > { %v1547_v49 = vadd.f32 %v9532_v33, %v1433_v41  ;;  %v9544_v34 = vpop.f32.mrf.mxu0 }
 0x2de   : > { %v1526_v38 = vpop.f32.mrf.mxu1 }
 0x2df   : > { %v11138_v36 = vadd.f32 %v9544_v34, %v1547_v49  ;;  %v11140_v53 = vpop.f32.mrf.mxu0 }
 0x2e0   : > { %v9533_v39 = vpop.f32.mrf.mxu1 }
 0x2e1   : > { %v11142_v48 = vpop.f32.mrf.mxu0 }
 0x2e2   : > { %v11144_v37 = vpop.f32.mrf.mxu1 }
 0x2e3   : > { %v11146_v46 = vpop.f32.mrf.mxu0  ;;  %v1546_v14 = vadd.f32 %v11144_v37, %v11128_v12 }
 0x2e4   : > { %v9552_v47 = vpop.f32.mrf.mxu1 }
 0x2e5   : > { %v1771_v51 = vadd.f32 %v9552_v47, %v1657_v54  ;;  %v9564_v43 = vpop.f32.mrf.mxu0  ;;  %v1660_v12 = vadd.f32 %v11146_v46, %v1546_v14 }
 0x2e6   : > { %v11148_v58 = vpop.f32.mrf.mxu1 }
 0x2e7   : > { %v11150_v59 = vadd.f32 %v9564_v43, %v1771_v51  ;;  %v11152_v61 = vpop.f32.mrf.mxu0 }
 0x2e8   : > { %v9553_v6 = vpop.f32.mrf.mxu1 }
 0x2e9   : > { %v1772_v7 = vadd.f32 %v9553_v6, %v1658_v22  ;;  %v9565_v8 = vpop.f32.mrf.mxu0  ;;  %v1193_v6 = vadd.f32 %v11116_v17, %v11114_v45 }
 0x2ea   : > { %v11154_v10 = vpop.f32.mrf.mxu1 }
 0x2eb   : > { %v11156_v23 = vadd.f32 %v9565_v8, %v1772_v7  ;;  %v11158_v24 = vpop.f32.mrf.mxu0  ;;  %v1317_v15 = vadd.f32 %v11122_v40, %v1193_v6  ;;  %v1548_v40 = vadd.f32 %v9533_v39, %v11126_v2 }
 0x2ec   : > { %v9556_v25 = vpop.f32.mrf.mxu1 }
 0x2ed   : > { %v11160_v26 = vpop.f32.mrf.mxu0  ;;  %v1662_v2 = vadd.f32 %v11142_v48, %v1548_v40 }
 0x2ee   : > { %v1754_v21 = vpop.f32.mrf.mxu1 }
 0x2ef   : > { %v11162_v27 = vpop.f32.mrf.mxu0 }
 0x2f0   : > { %v9557_v28 = vpop.f32.mrf.mxu1 }
 0x2f1   : > { %v11164_v29 = vpop.f32.mrf.mxu0  ;;  %v1776_v37 = vadd.f32 %v9557_v28, %v1662_v2 }
 0x2f2   : > { %v1757_v20 = vpop.f32.mrf.mxu1 }
 0x2f3   : > { %v11166_v31 = vpop.f32.mrf.mxu0  ;;  %v1774_v48 = vadd.f32 %v1757_v20, %v1660_v12  ;;  %v1890_v28 = vadd.f32 %v11164_v29, %v1776_v37 }
 0x2f4   : > { %v11168_v41 = vpop.f32.mrf.mxu1 }
 0x2f5   : > { %v11170_v50 = vpop.f32.mrf.mxu0  ;;  %v1888_v20 = vadd.f32 %v11166_v31, %v1774_v48 }
 0x2f6   : > { %v11172_v63 = vpop.f32.mrf.mxu1 }
 0x2f7   : > { %v11174_v0 = vpop.f32.mrf.mxu0 }
 0x2f8   : > { %v9577_v1 = vpop.f32.mrf.mxu1 }
 0x2f9   : > { %v11176_v4 = vpop.f32.mrf.mxu0 }
 0x2fa   : > { %v11178_v9 = vpop.f32.mrf.mxu1 }
 0x2fb   : > { %v11180_v11 = vpop.f32.mrf.mxu0 }
 0x2fc   : > { %v9580_v44 = vpop.f32.mrf.mxu1 }
 0x2fd   : > { %v11182_v52 = vpop.f32.mrf.mxu0 }
 0x2fe   : > { %v1982_v54 = vpop.f32.mrf.mxu1 }
 0x2ff   : > { %v11184_v57 = vpop.f32.mrf.mxu0 }
 0x300   : > { %v9581_v56 = vpop.f32.mrf.mxu1 }
 0x301   : > { %v11186_v60 = vpop.f32.mrf.mxu0 }
 0x302   : > { %v11188_v62 = vpop.f32.mrf.mxu1 }
 0x303   : > { %v11190_v22 = vpop.f32.mrf.mxu0 }
 0x304   : > { %v11192_v33 = vpop.f32.mrf.mxu1 }
 0x305   : > { %v11194_v49 = vpop.f32.mrf.mxu0 }
 0x306   : > { %12207 = vst [vmem:[#allocation17_spill] sm:$0xff] %v11194_v49  ;;  %v11196_v34 = vpop.f32.mrf.mxu1  ;;  %v1313_v49 = vadd.f32 %v11118_v18, %v1177_v13 }
 0x307   : > { %12208 = vst [vmem:[#allocation18_spill] sm:$0xff] %v11196_v34  ;;  %v11198_v47 = vpop.f32.mrf.mxu0 }
 0x308   : > { %12209 = vst [vmem:[#allocation19_spill] sm:$0xff] %v11198_v47  ;;  %v11200_v51 = vpop.f32.mrf.mxu1 }
 0x309   : > { %v11202_v43 = vpop.f32.mrf.mxu0 }
 0x30a   : > { %12210 = vst [vmem:[#allocation20_spill] sm:$0xff] %v11202_v43  ;;  %v11206_v7 = vpop.f32.mrf.mxu1  ;;  %v1431_v43 = vadd.f32 %v11124_v42, %v1317_v15  ;;  %v1775_v42 = vadd.f32 %v9556_v25, %v11138_v36 }
 0x30b   : > { %12211 = vst [vmem:[#allocation21_spill] sm:$0xff] %v11206_v7  ;;  %v11208_v8 = vpop.f32.mrf.mxu0 }
 0x30c   : > { %12212 = vst [vmem:[#allocation22_spill] sm:$0xff] %v11208_v8  ;;  %v9604_v35 = vpop.f32.mrf.mxu1  ;;  %v1545_v7 = vadd.f32 %v1526_v38, %v1431_v43  ;;  %v1656_v43 = vadd.f32 %v11136_v19, %v11134_v16 }
 0x30d   : > { %v11211_v32 = vpop.f32.mrf.mxu0 }
 0x30e   : > { %12213 = vst [vmem:[#allocation23_spill] sm:$0xff] %v11211_v32  ;;  %v2210_v47 = vpop.f32.mrf.mxu1  ;;  %v1427_v32 = vadd.f32 %v11120_v5, %v1313_v49  ;;  %v1659_v18 = vadd.f32 %v11140_v53, %v1545_v7  ;;  %v1770_v53 = vadd.f32 %v11154_v10, %v1656_v43  ;;  %v2000_v7 = vadd.f32 %v9577_v1, %v11156_v23  ;;  %v12219_v48 = vld [vmem:[#allocation18_spill] sm:$0xff] }
 0x30f   : > { %v11215_v34 = vpop.f32.mrf.mxu0  ;;  %v2002_v1 = vadd.f32 %v11188_v62, %v1888_v20 }
 0x310   : > { %v9605_v45 = vpop.f32.mrf.mxu1  ;;  %v1541_v15 = vadd.f32 %v11130_v3, %v1427_v32  ;;  %v1773_v5 = vadd.f32 %v1754_v21, %v1659_v18  ;;  %v1889_v3 = vadd.f32 %v11160_v26, %v1775_v42  ;;  %v1999_v26 = vadd.f32 %v11168_v41, %v11150_v59 }
 0x311   : > { %v11219_v17 = vpop.f32.mrf.mxu0  ;;  %v1884_v10 = vadd.f32 %v11158_v24, %v1770_v53  ;;  %v2114_v29 = vadd.f32 %v11176_v4, %v2000_v7  ;;  %v12216_v37 = vld [vmem:[#allocation20_spill] sm:$0xff] }
 0x312   : > { %v11221_v8 = vpop.f32.mrf.mxu1  ;;  %v1655_v32 = vadd.f32 %v11132_v55, %v1541_v15  ;;  %v1887_v16 = vadd.f32 %v11162_v27, %v1773_v5  ;;  %v2003_v19 = vadd.f32 %v9580_v44, %v1889_v3  ;;  %v2004_v15 = vadd.f32 %v9581_v56, %v1890_v28 }
 0x313   : > { %v11224_v6 = vpop.f32.mrf.mxu0  ;;  %v1998_v23 = vadd.f32 %v11178_v9, %v1884_v10  ;;  %v2113_v41 = vadd.f32 %v11170_v50, %v1999_v26  ;;  %v2116_v5 = vadd.f32 %v11190_v22, %v2002_v1 }
 0x314   : > { %v11227_v30 = vpop.f32.mrf.mxu1  ;;  %v1769_v21 = vadd.f32 %v11148_v58, %v1655_v32  ;;  %v2001_v40 = vadd.f32 %v1982_v54, %v1887_v16  ;;  %v2117_v44 = vadd.f32 %v11182_v52, %v2003_v19  ;;  %v2228_v52 = vadd.f32 %v11200_v51, %v2114_v29  ;;  %v12217_v32 = vld [vmem:[#allocation21_spill] sm:$0xff] }
 0x315   : > { %v11231_v13 = vpop.f32.mrf.mxu0  ;;  %v2227_v4 = vadd.f32 %v11192_v33, %v2113_v41  ;;  %v2112_v62 = vadd.f32 %v11180_v11, %v1998_v23  ;;  %v2230_v3 = vadd.f32 %v11221_v8, %v2116_v5 }
 0x316   : > { %12214 = vst [vmem:[#allocation24_spill] sm:$0xff] %v11231_v13  ;;  %v11236_v38 = vpop.f32.mrf.mxu1  ;;  %v1883_v27 = vadd.f32 %v11152_v61, %v1769_v21  ;;  %v2115_v31 = vadd.f32 %v11184_v57, %v2001_v40  ;;  %v2231_v54 = vadd.f32 %v9604_v35, %v2117_v44  ;;  %v2118_v61 = vadd.f32 %v11186_v60, %v2004_v15  ;;  %v12215_v57 = vld [vmem:[#allocation23_spill] sm:$0xff]  ;;  %v12220_v40 = vld [vmem:[#allocation22_spill] sm:$0xff] }
 0x317   : > { %v11239_v39 = vpop.f32.mrf.mxu0  ;;  %v2342_v60 = vadd.f32 %v12216_v37, %v2228_v52  ;;  %v2226_v51 = vadd.f32 %v12217_v32, %v2112_v62  ;;  %v2344_v8 = vadd.f32 %v11224_v6, %v2230_v3 }
 0x318   : > { %v9625_v49 = vpop.f32.mrf.mxu1  ;;  %v1997_v24 = vadd.f32 %v11172_v63, %v1883_v27  ;;  %v2229_v2 = vadd.f32 %v2210_v47, %v2115_v31  ;;  %v2232_v50 = vadd.f32 %v9605_v45, %v2118_v61  ;;  %v2345_v35 = vadd.f32 %v12215_v57, %v2231_v54  ;;  %v12218_v47 = vld [vmem:[#allocation17_spill] sm:$0xff]  ;;  %v12221_v27 = vld [vmem:[#allocation19_spill] sm:$0xff] }
 0x319   : > { %v11244_v13 = vpop.f32.mrf.mxu0  ;;  %v2341_v53 = vadd.f32 %v12218_v47, %v2227_v4  ;;  %v2456_v16 = vadd.f32 %v9625_v49, %v2342_v60  ;;  %v2340_v10 = vadd.f32 %v12220_v40, %v2226_v51 }
 0x31a   : > { %v11248_v36 = vpop.f32.mrf.mxu1  ;;  %v2111_v63 = vadd.f32 %v11174_v0, %v1997_v24  ;;  %v2343_v22 = vadd.f32 %v11215_v34, %v2229_v2  ;;  %v2346_v0 = vadd.f32 %v11219_v17, %v2232_v50 }
 0x31b   : > { %v11251_v25 = vpop.f32.mrf.mxu0  ;;  %v2455_v28 = vadd.f32 %v11227_v30, %v2341_v53  ;;  %v2454_v17 = vadd.f32 %v11248_v36, %v2340_v10  ;;  %v8597_v36 = vld [vmem:[%s12160_s9 + $0x1] ss:$0 sm:$0xff] }
 0x31c   : > { %v9628_v46 = vpop.f32.mrf.mxu1  ;;  %v2225_v11 = vadd.f32 %v12219_v48, %v2111_v63 }
 0x31d   : > { %v9640_v55 = vpop.f32.mrf.mxu0  ;;  %v2459_v45 = vadd.f32 %v9628_v46, %v2345_v35  ;;  %v2570_v46 = vadd.f32 %v11244_v13, %v2456_v16  ;;  %v12222_v1 = vld [vmem:[#allocation24_spill] sm:$0xff]  ;;  %v2568_v13 = vadd.f32 %v11251_v25, %v2454_v17 }
 0x31e   : > { %v2438_v14 = vpop.f32.mrf.mxu1  ;;  %v2339_v44 = vadd.f32 %v12221_v27, %v2225_v11  ;;  %v2569_v30 = vadd.f32 %v12222_v1, %v2455_v28 }
 0x31f   : > { %v2552_v58 = vpop.f32.mrf.mxu0  ;;  %v2457_v7 = vadd.f32 %v2438_v14, %v2343_v22  ;;  %v2573_v29 = vadd.f32 %v9640_v55, %v2459_v45 }
 0x320   : > { %v9629_v18 = vpop.f32.mrf.mxu1  ;;  %v2453_v14 = vadd.f32 %v11236_v38, %v2339_v44 }
 0x321   : > { %v9641_v59 = vpop.f32.mrf.mxu0  ;;  %v2460_v20 = vadd.f32 %v9629_v18, %v2346_v0  ;;  %v2571_v41 = vadd.f32 %v2552_v58, %v2457_v7 }
 0x322   : > { %v2441_v56 = vpop.f32.mrf.mxu1  ;;  %v2567_v38 = vadd.f32 %v11239_v39, %v2453_v14  ;;  %v8598_v39 = vld [vmem:[%s12161_s10 + $0x1] ss:$0 sm:$0xff] }
 0x323   : > { %v2555_v42 = vpop.f32.mrf.mxu0  ;;  %v2458_v49 = vadd.f32 %v2441_v56, %v2344_v8  ;;  %v2574_v6 = vadd.f32 %v9641_v59, %v2460_v20 }
 0x324   : > { %v9648_v9 = vpop.f32.mrf.mxu1 }
 0x325   : > { %v9660_v43 = vpop.f32.mrf.mxu0  ;;  %v2683_v61 = vadd.f32 %v9648_v9, %v2569_v30  ;;  %v2572_v2 = vadd.f32 %v2555_v42, %v2458_v49  ;;  %v12223_v30 = vmov 0.0  }
 0x326   : > { %v2650_v12 = vpop.f32.mrf.mxu1  ;;  %3051 = vst.msk [vmem:[#allocation3 + $0x10] sm:$0xff] %vm3048_vm1, %v12223_v30  ;;  %3049 = vst.msk [vmem:[#allocation3] sm:$0xff] %vm3048_vm1, %v12223_v30 }
 0x327   : > { %v2764_v33 = vpop.f32.mrf.mxu0  ;;  %v2797_v35 = vadd.f32 %v9660_v43, %v2683_v61  ;;  %v2681_v37 = vadd.f32 %v2650_v12, %v2567_v38  ;;  %v8599_v12 = vld [vmem:[%s12162_s11 + $0x1] ss:$0 sm:$0xff]  ;;  %3050 = vst.msk [vmem:[#allocation3 + $0x8] sm:$0xff] %vm3048_vm1, %v12223_v30  ;;  %3052 = vst.msk [vmem:[#allocation3 + $0x18] sm:$0xff] %vm3048_vm1, %v12223_v30 }
 0x328   : > { %v9649_v21 = vpop.f32.mrf.mxu1  ;;  %3053 = vst.msk [vmem:[#allocation3 + $0x20] sm:$0xff] %vm3048_vm1, %v12223_v30  ;;  %3054 = vst.msk [vmem:[#allocation3 + $0x28] sm:$0xff] %vm3048_vm1, %v12223_v30  ;;  %v10275_v38 = vld [vmem:[%s12154_s3 + $0x20] sm:$0xff]  }
 0x329   : > { %v9661_v19 = vpop.f32.mrf.mxu0  ;;  %v2684_v18 = vadd.f32 %v9649_v21, %v2570_v46  ;;  %v2812_v11 = vadd.f32 %v8597_v36, %v2797_v35  ;;  %v2795_v22 = vadd.f32 %v2764_v33, %v2681_v37  ;;  %4425 = vst.msk [vmem:[#allocation4] sm:$0xff] %vm3048_vm1, %v12223_v30  ;;  %4426 = vst.msk [vmem:[#allocation4 + $0x8] sm:$0xff] %vm3048_vm1, %v12223_v30 }
 0x32a   : > { %v2653_v26 = vpop.f32.mrf.mxu1  ;;  %4427 = vst.msk [vmem:[#allocation4 + $0x10] sm:$0xff] %vm3048_vm1, %v12223_v30  ;;  %4428 = vst.msk [vmem:[#allocation4 + $0x18] sm:$0xff] %vm3048_vm1, %v12223_v30 }
 0x32b   : > { %v2767_v15 = vpop.f32.mrf.mxu0  ;;  %v2798_v50 = vadd.f32 %v9661_v19, %v2684_v18  ;;  %v2682_v63 = vadd.f32 %v2653_v26, %v2568_v13  ;;  %v2820_v26 = vmax.f32 %v2812_v11, 0.0  ;;  %v2810_v40 = vadd.f32 %v8597_v36, %v2795_v22  ;;  %5522 = vst.msk [vmem:[#allocation5] sm:$0xff] %vm3048_vm1, %v12223_v30  ;;  %5523 = vst.msk [vmem:[#allocation5 + $0x8] sm:$0xff] %vm3048_vm1, %v12223_v30 }
 0x32c   : > { %v9652_v34 = vpop.f32.mrf.mxu1  ;;  %5524 = vst.msk [vmem:[#allocation5 + $0x10] sm:$0xff] %vm3048_vm1, %v12223_v30 }
 0x32d   : > { %v9664_v23 = vpop.f32.mrf.mxu0  ;;  %v2687_v24 = vadd.f32 %v9652_v34, %v2573_v29  ;;  %v2813_v3 = vadd.f32 %v8597_v36, %v2798_v50  ;;  %v2796_v47 = vadd.f32 %v2767_v15, %v2682_v63  ;;  %v2832_v27 = vmul.f32 %v8598_v39, %v2820_v26 }
 0x32e   : > { %v2666_v31 = vpop.f32.mrf.mxu1  ;;  %v2818_v44 = vmax.f32 %v2810_v40, 0.0  ;;  %v10277_v40 = vld [vmem:[%s12154_s3 + $0x30] sm:$0xff]  }
 0x32f   : > { %v2780_v54 = vpop.f32.mrf.mxu0  ;;  %v2801_v52 = vadd.f32 %v9664_v23, %v2687_v24  ;;  %v2685_v55 = vadd.f32 %v2666_v31, %v2571_v41  ;;  %v2821_v16 = vmax.f32 %v2813_v3, 0.0  ;;  %v2811_v19 = vadd.f32 %v8597_v36, %v2796_v47  ;;  %v12225_v24 = vld [vmem:[#allocation8_spill] sm:$0xff] }
 0x330   : > { %v9653_v4 = vpop.f32.mrf.mxu1  ;;  %v2844_v17 = vadd.f32 %v8599_v12, %v2832_v27  ;;  %v2830_v49 = vmul.f32 %v8598_v39, %v2818_v44  ;;  %v11305_v41 = vsel %vm10619_vm3, 1.0, %v12223_v30  ;;  %vm6422_vm3 = vcmask 64512  }
 0x331   : > { %v2688_v56 = vadd.f32 %v9653_v4, %v2574_v6  ;;  %v9665_v62 = vpop.f32.mrf.mxu0  ;;  %v2816_v58 = vadd.f32 %v8597_v36, %v2801_v52  ;;  %v2799_v5 = vadd.f32 %v2780_v54, %v2685_v55  ;;  %v2833_v33 = vmul.f32 %v8598_v39, %v2821_v16 }
 0x332   : > { %v2669_v59 = vpop.f32.mrf.mxu1  ;;  %v2819_v20 = vmax.f32 %v2811_v19, 0.0  ;;  %v2842_v1 = vadd.f32 %v8599_v12, %v2830_v49  ;;  %v11311_v6 = vsel %vm841_vm4, 1.0, %v12223_v30  ;;  %v8411_v54 = vsel %vm10629_vm5, 1.0, %v12223_v30  ;;  %v10278_v49 = vld [vmem:[%s12154_s3 + $0x28] sm:$0xff]  }
 0x333   : > { %v2802_v9 = vadd.f32 %v9665_v62, %v2688_v56  ;;  %v2686_v57 = vadd.f32 %v2669_v59, %v2572_v2  ;;  %v2783_v60 = vpop.f32.mrf.mxu0  ;;  %v2824_v25 = vmax.f32 %v2816_v58, 0.0  ;;  %v2814_v42 = vadd.f32 %v8597_v36, %v2799_v5  ;;  %v10273_v56 = vld [vmem:[%s12154_s3 + $0x10] sm:$0xff]   ;;  %v10274_v62 = vld [vmem:[%s12154_s3] sm:$0xff]  }
 0x334   : > { %v2845_v34 = vadd.f32 %v8599_v12, %v2833_v33  ;;  %v2831_v46 = vmul.f32 %v8598_v39, %v2819_v20  ;;  %v8427_v52 = vsel %vm842_vm6, 1.0, %v12223_v30  ;;  %v8412_v4 = vsel %vm10650_vm7, 1.0, %v12223_v30 }
 0x335   : > { %v2817_v32 = vadd.f32 %v8597_v36, %v2802_v9  ;;  %v2800_v51 = vadd.f32 %v2783_v60, %v2686_v57  ;;  %v2836_v45 = vmul.f32 %v8598_v39, %v2824_v25  ;;  %v2822_v21 = vmax.f32 %v2814_v42, 0.0 }
 0x336   : > { %v2843_v23 = vadd.f32 %v8599_v12, %v2831_v46  ;;  %v8428_v2 = vsel %vm843_vm8, 1.0, %v12223_v30  ;;  %vm6570_vm4 = vcmask 257024   ;;  %vm7600_vm5 = vcmask 1043456  }
 0x337   : > { %v2825_v53 = vmax.f32 %v2817_v32, 0.0  ;;  %v2815_v48 = vadd.f32 %v8597_v36, %v2800_v51  ;;  %v2848_v10 = vadd.f32 %v8599_v12, %v2836_v45  ;;  %v2834_v8 = vmul.f32 %v8598_v39, %v2822_v21  ;;  %v10272_v36 = vld [vmem:[%s12154_s3 + $0x8] sm:$0xff]   ;;  %6571 = vst.msk [vmem:[#allocation6 + $0x10] sm:$0xf] %vm6570_vm4, %v12223_v30 }
 0x338   : > { %vm7597_vm6 = vcmask 31744   ;;  %vm7828_vm7 = vcmp.eq.s32.totalorder %v12225_v24, 1  ;;  %vm7747_vm8 = vcmp.eq.s32.totalorder %v12225_v24, 0 }
 0x339   : > { %v2837_v0 = vmul.f32 %v8598_v39, %v2825_v53  ;;  %v2823_v43 = vmax.f32 %v2815_v48, 0.0  ;;  %v2846_v29 = vadd.f32 %v8599_v12, %v2834_v8 }
 0x33b   : > { %v2849_v28 = vadd.f32 %v8599_v12, %v2837_v0  ;;  %v2835_v7 = vmul.f32 %v8598_v39, %v2823_v43 }
 0x33d   : > { %9666 = vmatprep.subr.mxu1 %v2849_v28  ;;  %9688 = vmatprep.subr.mxu0 %v2849_v28  ;;  %v2847_v15 = vadd.f32 %v8599_v12, %v2835_v7  ;;  %v10276_v7 = vld [vmem:[%s12154_s3 + $0x18] sm:$0xff]  }
 0x33e   : > { %9667 = vmatpush3.msra.mxu1 %v2849_v28  ;;  %9689 = vmatpush3.msra.mxu0 %v2849_v28 }
 0x33f   : > { %9668 = vmatprep.subr.mxu1 %v2848_v10  ;;  %9690 = vmatprep.subr.mxu0 %v2848_v10 }
 0x340   : > { %9669 = vmatpush3.msra.mxu1 %v2848_v10  ;;  %9691 = vmatpush3.msra.mxu0 %v2848_v10 }
 0x341   : > { %9670 = vmatprep.subr.mxu1 %v2847_v15  ;;  %9692 = vmatprep.subr.mxu0 %v2847_v15 }
 0x342   : > { %9671 = vmatpush3.msra.mxu1 %v2847_v15  ;;  %9693 = vmatpush3.msra.mxu0 %v2847_v15 }
 0x343   : > { %9672 = vmatprep.subr.mxu1 %v2846_v29  ;;  %9694 = vmatprep.subr.mxu0 %v2846_v29 }
 0x344   : > { %9673 = vmatpush3.msra.mxu1 %v2846_v29  ;;  %9695 = vmatpush3.msra.mxu0 %v2846_v29 }
 0x345   : > { %9674 = vmatprep.subr.mxu1 %v2845_v34  ;;  %9696 = vmatprep.subr.mxu0 %v2845_v34 }
 0x346   : > { %9675 = vmatpush3.msra.mxu1 %v2845_v34  ;;  %9697 = vmatpush3.msra.mxu0 %v2845_v34 }
 0x347   : > { %9676 = vmatprep.subr.mxu1 %v2844_v17  ;;  %9698 = vmatprep.subr.mxu0 %v2844_v17 }
 0x348   : > { %9677 = vmatpush3.msra.mxu1 %v2844_v17  ;;  %9699 = vmatpush3.msra.mxu0 %v2844_v17 }
 0x349   : > { %9678 = vmatprep.subr.mxu1 %v2843_v23  ;;  %9700 = vmatprep.subr.mxu0 %v2843_v23 }
 0x34a   : > { %9679 = vmatpush3.msra.mxu1 %v2843_v23  ;;  %9701 = vmatpush3.msra.mxu0 %v2843_v23 }
 0x34b   : > { %9680 = vmatprep.subr.mxu1 %v2842_v1  ;;  %9702 = vmatprep.subr.mxu0 %v2842_v1 }
 0x34c   : > { %9681 = vmatpush3.msra.mxu1 %v2842_v1  ;;  %9703 = vmatpush3.msra.mxu0 %v2842_v1  ;;  %v10279_v1 = vld [vmem:[%s12154_s3 + $0x40] sm:$0xff]  }
 0x34d   : > { %9683 = vmatmul.mubr.msk.f32.vlgmr.msra.gmra.mxu1 %vm506_vm0, %v11305_v41  ;;  %9705 = vmatmul.mubr.msk.f32.vlgmr.msra.gmra.mxu0 %vm506_vm0, %v11311_v6 }
 0x34e   : > { %9685 = vmatprep.mubr.msk.f32.mxu1 %vm506_vm0, %v8411_v54  ;;  %9707 = vmatprep.mubr.msk.f32.mxu0 %vm506_vm0, %v8427_v52 }
 0x34f   : > { %9710 = vmatprep.subr.bf16.mxu1 %v10272_v36  ;;  %9722 = vmatprep.subr.bf16.mxu0 %v10273_v56 }
 0x350   : > { %9711 = vmatpush3.bf16.msra.mxu1 %v10272_v36  ;;  %9723 = vmatpush3.bf16.msra.mxu0 %v10273_v56  ;;  %v10281_v56 = vld [vmem:[%s12154_s3 + $0x50] sm:$0xff]  }
 0x351   : > { %9686 = vmatmul.mubr.msk.f32.gmra.mxu1 %vm506_vm0, %v8412_v4  ;;  %9708 = vmatmul.mubr.msk.f32.gmra.mxu0 %vm506_vm0, %v8428_v2  ;;  %v10280_v2 = vld [vmem:[%s12154_s3 + $0x38] sm:$0xff]  }
 0x352   : > { %9716 = vmatprep.subr.bf16.mxu1 %v10274_v62  ;;  %9734 = vmatprep.subr.bf16.mxu0 %v10275_v38 }
 0x40d   : > { %v9684_v58 = vpop.f32.mrf.mxu1  ;;  %v9706_v5 = vpop.f32.mrf.mxu0 }
 0x40e   : > { %v3045_v59 = vmax.f32 %v9684_v58, %v9706_v5 }
 0x40f   : > { %v2928_v50 = vpop.f32.mrf.mxu1  ;;  %v3025_v63 = vpop.f32.mrf.mxu0 }
 0x410   : > { %3056 = vst.msk [vmem:[#allocation3 + $0x10] sm:$0xff] %vm3048_vm1, %v3045_v59  ;;  %v3044_v9 = vmax.f32 %v2928_v50, %v3025_v63 }
 0x411   : > { %v9687_v57 = vpop.f32.mrf.mxu1  ;;  %v9709_v35 = vpop.f32.mrf.mxu0 }
 0x412   : > { %3055 = vst.msk [vmem:[#allocation3 + $0x8] sm:$0xff] %vm3048_vm1, %v3044_v9  ;;  %v3047_v37 = vmax.f32 %v9687_v57, %v9709_v35  ;;  %v10282_v57 = vld [vmem:[%s12154_s3 + $0x48] sm:$0xff]  }
 0x413   : > { %v2938_v60 = vpop.f32.mrf.mxu1  ;;  %v3035_v25 = vpop.f32.mrf.mxu0 }
 0x414   : > { %3058 = vst.msk [vmem:[#allocation3 + $0x20] sm:$0xff] %vm3048_vm1, %v3047_v37  ;;  %v3046_v42 = vmax.f32 %v2938_v60, %v3035_v25  ;;  %v10283_v37 = vld [vmem:[%s12154_s3 + $0x60] sm:$0xff]  }
 0x416   : > { %3057 = vst.msk [vmem:[#allocation3 + $0x18] sm:$0xff] %vm3048_vm1, %v3046_v42 }
 0x417   : > { %v3569_v50 = vld [vmem:[#allocation3 + $0x10] sm:$0xff] }
 0x419   : > { %v3067_v32 = vld [vmem:[#allocation3 + $0x2] sm:$0xff]  ;;  %v11377_v51 = vld [vmem:[#allocation3 + $0xa] sm:$0xff] }
 0x41a   : > { %v3198_v3 = vld [vmem:[#allocation3 + $0x3] sm:$0xff]  ;;  %v3071_v47 = vpack.c.bf16 %v11377_v51, %v3067_v32  ;;  %v11380_v53 = vld [vmem:[#allocation3 + $0xb] sm:$0xff] }
 0x41b   : > { %v3202_v48 = vpack.c.bf16 %v11380_v53, %v3198_v3  ;;  %v3059_v39 = vld [vmem:[#allocation3 + $0x1] sm:$0xff]  ;;  %v3060_v11 = vld [vmem:[#allocation3 + $0x9] sm:$0xff] }
 0x41c   : > { %9712 = vmatprep.mubr.msk.bf16.mxu1 %vm3048_vm1, %v3071_v47  ;;  %v3346_v22 = vld [vmem:[#allocation3 + $0x5] sm:$0xff]  ;;  %v11384_v45 = vld [vmem:[#allocation3 + $0xd] sm:$0xff]  ;;  %v3063_v28 = vpack.c.bf16 %v3060_v11, %v3059_v39 }
 0x41d   : > { %9724 = vmatprep.mubr.msk.bf16.mxu0 %vm3048_vm1, %v3202_v48  ;;  %v11387_v21 = vld [vmem:[#allocation3 + $0x12] sm:$0xff]  ;;  %v11389_v0 = vld [vmem:[#allocation3 + $0x1a] sm:$0xff]  ;;  %v3350_v26 = vpack.c.bf16 %v11384_v45, %v3346_v22  ;;  %v3272_v33 = vld [vmem:[#allocation3 + $0x4] sm:$0xff] }
 0x41e   : > { %v11391_v43 = vld [vmem:[#allocation3 + $0x13] sm:$0xff]  ;;  %v3072_v12 = vpack.c.bf16 %v11389_v0, %v11387_v21  ;;  %v11395_v16 = vld [vmem:[#allocation3 + $0x1b] sm:$0xff]  ;;  %v3494_v44 = vld [vmem:[#allocation3 + $0x7] sm:$0xff]  ;;  %v3720_v47 = vpack.c.bf16 %v11387_v21, %v11377_v51 }
 0x41f   : > { %v3203_v19 = vpack.c.bf16 %v11395_v16, %v11391_v43  ;;  %v3061_v10 = vld [vmem:[#allocation3 + $0x11] sm:$0xff]  ;;  %v3062_v8 = vld [vmem:[#allocation3 + $0x19] sm:$0xff]  ;;  %v3420_v61 = vld [vmem:[#allocation3 + $0x6] sm:$0xff]  ;;  %v3794_v35 = vpack.c.bf16 %v11391_v43, %v11380_v53 }
 0x420   : > { %9713 = vmatmul.mubr.msk.bf16.vlgmr.msra.gmra.mxu1 %vm3048_vm1, %v3072_v12  ;;  %v11410_v20 = vld [vmem:[#allocation3 + $0x15] sm:$0xff]  ;;  %v11412_v15 = vld [vmem:[#allocation3 + $0x1d] sm:$0xff]  ;;  %v11414_v27 = vld [vmem:[#allocation3 + $0xc] sm:$0xff]  ;;  %v3064_v34 = vpack.c.bf16 %v3062_v8, %v3061_v10  ;;  %v3646_v36 = vpack.c.bf16 %v3061_v10, %v3060_v11 }
 0x421   : > { %9725 = vmatmul.mubr.msk.bf16.vlgmr.msra.gmra.mxu0 %vm3048_vm1, %v3203_v19  ;;  %9718 = vmatprep.mubr.msk.bf16.mxu1 %vm3048_vm1, %v3063_v28  ;;  %v11416_v29 = vld [vmem:[#allocation3 + $0xf] sm:$0xff]  ;;  %v3351_v46 = vpack.c.bf16 %v11412_v15, %v11410_v20  ;;  %v3276_v17 = vpack.c.bf16 %v11414_v27, %v3272_v33  ;;  %v11434_v31 = vld [vmem:[#allocation3 + $0x1c] sm:$0xff]  ;;  %v3942_v48 = vpack.c.bf16 %v11410_v20, %v11384_v45  ;;  %v3941_v22 = vld [vmem:[#allocation3 + $0x25] sm:$0xff] }
 0x422   : > { %9736 = vmatprep.mubr.msk.bf16.mxu0 %vm3048_vm1, %v3350_v26  ;;  %9717 = vmatpush3.bf16.msra.mxu1 %v10274_v62  ;;  %v3498_v23 = vpack.c.bf16 %v11416_v29, %v3494_v44  ;;  %v11432_v14 = vld [vmem:[#allocation3 + $0x14] sm:$0xff]  ;;  %v11438_v54 = vld [vmem:[#allocation3 + $0x1f] sm:$0xff]  ;;  %v3568_v58 = vld [vmem:[#allocation3 + $0x8] sm:$0xff]  ;;  %v3943_v45 = vpack.c.bf16 %v3941_v22, %v11412_v15 }
 0x423   : > { %9735 = vmatpush3.bf16.msra.mxu0 %v10275_v38  ;;  %9728 = vmatprep.subr.bf16.mxu1 %v10276_v7  ;;  %v11436_v18 = vld [vmem:[#allocation3 + $0x17] sm:$0xff]  ;;  %v11440_v52 = vld [vmem:[#allocation3 + $0xe] sm:$0xff]  ;;  %v3277_v55 = vpack.c.bf16 %v11434_v31, %v11432_v14  ;;  %v3645_v59 = vld [vmem:[#allocation3 + $0x21] sm:$0xff]  ;;  %v3572_v9 = vpack.c.bf16 %v3569_v50, %v3568_v58  ;;  %v3868_v21 = vpack.c.bf16 %v11432_v14, %v11414_v27 }
 0x424   : > { %9746 = vmatprep.subr.bf16.mxu0 %v10277_v40  ;;  %v3499_v4 = vpack.c.bf16 %v11438_v54, %v11436_v18  ;;  %v3424_v13 = vpack.c.bf16 %v11440_v52, %v3420_v61  ;;  %v3422_v62 = vld [vmem:[#allocation3 + $0x16] sm:$0xff]  ;;  %v11457_v38 = vld [vmem:[#allocation3 + $0x1e] sm:$0xff]  ;;  %v3647_v63 = vpack.c.bf16 %v3645_v59, %v3062_v8  ;;  %v10284_v53 = vld [vmem:[%s12154_s3 + $0x58] sm:$0xff]   ;;  %v4090_v12 = vpack.c.bf16 %v11436_v18, %v11416_v29 }
 0x425   : > { %v3425_v5 = vpack.c.bf16 %v11457_v38, %v3422_v62  ;;  %v3570_v60 = vld [vmem:[#allocation3 + $0x18] sm:$0xff]  ;;  %v3571_v25 = vld [vmem:[#allocation3 + $0x20] sm:$0xff]  ;;  %v10287_v26 = vld [vmem:[%s12154_s3 + $0x78] sm:$0xff]  }
 0x426   : > { %v3573_v42 = vpack.c.bf16 %v3571_v25, %v3570_v60  ;;  %v3793_v32 = vld [vmem:[#allocation3 + $0x23] sm:$0xff]  ;;  %v10286_v43 = vld [vmem:[%s12154_s3 + $0x68] sm:$0xff]   ;;  %v4164_v33 = vpack.c.bf16 %v3570_v60, %v3569_v50  ;;  %v12232_v27 = vld [vmem:[#allocation9_spill] sm:$0xff] }
 0x427   : > { %v3795_v3 = vpack.c.bf16 %v3793_v32, %v11395_v16  ;;  %v10285_v39 = vld [vmem:[%s12154_s3 + $0x70] sm:$0xff]   ;;  %v4163_v20 = vld [vmem:[#allocation3 + $0x28] sm:$0xff] }
 0x428   : > { %9719 = vmatmul.mubr.msk.bf16.vlgmr.msra.gmra.mxu1 %vm3048_vm1, %v3064_v34  ;;  %v3719_v51 = vld [vmem:[#allocation3 + $0x22] sm:$0xff]  ;;  %v4165_v15 = vpack.c.bf16 %v4163_v20, %v3571_v25 }
 0x429   : > { %9737 = vmatmul.mubr.msk.bf16.vlgmr.msra.gmra.mxu0 %vm3048_vm1, %v3351_v46  ;;  %9730 = vmatprep.mubr.msk.bf16.mxu1 %vm3048_vm1, %v3276_v17  ;;  %v3721_v11 = vpack.c.bf16 %v3719_v51, %v11389_v0  ;;  %v3867_v0 = vld [vmem:[#allocation3 + $0x24] sm:$0xff] }
 0x42a   : > { %9748 = vmatprep.mubr.msk.bf16.mxu0 %vm3048_vm1, %v3498_v23  ;;  %9729 = vmatpush3.bf16.msra.mxu1 %v10276_v7  ;;  %v3869_v16 = vpack.c.bf16 %v3867_v0, %v11434_v31  ;;  %v4089_v19 = vld [vmem:[#allocation3 + $0x27] sm:$0xff]  ;;  %v4016_v7 = vpack.c.bf16 %v3422_v62, %v11440_v52 }
 0x42b   : > { %9747 = vmatpush3.bf16.msra.mxu0 %v10277_v40  ;;  %9740 = vmatprep.subr.bf16.mxu1 %v10278_v49  ;;  %v4091_v28 = vpack.c.bf16 %v4089_v19, %v11438_v54  ;;  %v12231_v40 = vld [vmem:[#allocation10_spill] sm:$0xff]  ;;  %v4015_v10 = vld [vmem:[#allocation3 + $0x26] sm:$0xff] }
 0x42c   : > { %9758 = vmatprep.subr.bf16.mxu0 %v10279_v1  ;;  %v4017_v8 = vpack.c.bf16 %v4015_v10, %v11457_v38 }
 0x430   : > { %9731 = vmatmul.mubr.msk.bf16.vlgmr.msra.gmra.mxu1 %vm3048_vm1, %v3277_v55 }
 0x431   : > { %9749 = vmatmul.mubr.msk.bf16.vlgmr.msra.gmra.mxu0 %vm3048_vm1, %v3499_v4  ;;  %9742 = vmatprep.mubr.msk.bf16.mxu1 %vm3048_vm1, %v3424_v13 }
 0x432   : > { %9760 = vmatprep.mubr.msk.bf16.mxu0 %vm3048_vm1, %v3646_v36  ;;  %9741 = vmatpush3.bf16.msra.mxu1 %v10278_v49 }
 0x433   : > { %9759 = vmatpush3.bf16.msra.mxu0 %v10279_v1  ;;  %9752 = vmatprep.subr.bf16.mxu1 %v10280_v2 }
 0x434   : > { %9770 = vmatprep.subr.bf16.mxu0 %v10281_v56 }
 0x438   : > { %9743 = vmatmul.mubr.msk.bf16.vlgmr.msra.gmra.mxu1 %vm3048_vm1, %v3425_v5 }
 0x439   : > { %9761 = vmatmul.mubr.msk.bf16.vlgmr.msra.gmra.mxu0 %vm3048_vm1, %v3647_v63  ;;  %9754 = vmatprep.mubr.msk.bf16.mxu1 %vm3048_vm1, %v3572_v9 }
 0x43a   : > { %9772 = vmatprep.mubr.msk.bf16.mxu0 %vm3048_vm1, %v3794_v35  ;;  %9753 = vmatpush3.bf16.msra.mxu1 %v10280_v2 }
 0x43b   : > { %9771 = vmatpush3.bf16.msra.mxu0 %v10281_v56  ;;  %9764 = vmatprep.subr.bf16.mxu1 %v10282_v57 }
 0x43c   : > { %9782 = vmatprep.subr.bf16.mxu0 %v10283_v37 }
 0x440   : > { %9755 = vmatmul.mubr.msk.bf16.vlgmr.msra.gmra.mxu1 %vm3048_vm1, %v3573_v42 }
 0x441   : > { %9773 = vmatmul.mubr.msk.bf16.vlgmr.msra.gmra.mxu0 %vm3048_vm1, %v3795_v3  ;;  %9766 = vmatprep.mubr.msk.bf16.mxu1 %vm3048_vm1, %v3720_v47 }
 0x442   : > { %9784 = vmatprep.mubr.msk.bf16.mxu0 %vm3048_vm1, %v3942_v48  ;;  %9765 = vmatpush3.bf16.msra.mxu1 %v10282_v57 }
 0x443   : > { %9783 = vmatpush3.bf16.msra.mxu0 %v10283_v37  ;;  %9776 = vmatprep.subr.bf16.mxu1 %v10284_v53 }
 0x444   : > { %9794 = vmatprep.subr.bf16.mxu0 %v10285_v39 }
 0x448   : > { %9767 = vmatmul.mubr.msk.bf16.vlgmr.msra.gmra.mxu1 %vm3048_vm1, %v3721_v11 }
 0x449   : > { %9785 = vmatmul.mubr.msk.bf16.vlgmr.msra.gmra.mxu0 %vm3048_vm1, %v3943_v45  ;;  %9778 = vmatprep.mubr.msk.bf16.mxu1 %vm3048_vm1, %v3868_v21 }
 0x44a   : > { %9796 = vmatprep.mubr.msk.bf16.mxu0 %vm3048_vm1, %v4090_v12  ;;  %9777 = vmatpush3.bf16.msra.mxu1 %v10284_v53 }
 0x44b   : > { %9795 = vmatpush3.bf16.msra.mxu0 %v10285_v39  ;;  %9788 = vmatprep.subr.bf16.mxu1 %v10286_v43 }
 0x450   : > { %9779 = vmatmul.mubr.msk.bf16.vlgmr.msra.gmra.mxu1 %vm3048_vm1, %v3869_v16 }
 0x451   : > { %9797 = vmatmul.mubr.msk.bf16.vlgmr.msra.gmra.mxu0 %vm3048_vm1, %v4091_v28  ;;  %9790 = vmatprep.mubr.msk.bf16.mxu1 %vm3048_vm1, %v4016_v7 }
 0x452   : > { %9789 = vmatpush3.bf16.msra.mxu1 %v10286_v43  ;;  %9814 = vmatprep.mubr.msk.f32.mxu0 %vm977_vm10, %v12231_v40 }
 0x453   : > { %9800 = vmatprep.subr.bf16.mxu1 %v10287_v26 }
 0x458   : > { %9791 = vmatmul.mubr.msk.bf16.vlgmr.msra.gmra.mxu1 %vm3048_vm1, %v4017_v8 }
 0x459   : > { %9802 = vmatprep.mubr.msk.bf16.mxu1 %vm3048_vm1, %v4164_v33  ;;  %9801 = vmatpush3.bf16.msra.mxu1 %v10287_v26 }
 0x460   : > { %9803 = vmatmul.mubr.msk.bf16.vlgmr.msra.gmra.mxu1 %vm3048_vm1, %v4165_v15 }
 0x461   : > { %9825 = vmatprep.mubr.msk.f32.mxu1 %vm977_vm10, %v12232_v27 }
 0x4e0   : > { %v9714_v44 = vpop.f32.mrf.mxu1 }
 0x4e1   : > { %v9726_v29 = vpop.f32.mrf.mxu0 }
 0x4e2   : > { %v3122_v34 = vpop.f32.mrf.mxu1 }
 0x4e3   : > { %v3253_v46 = vpop.f32.mrf.mxu0 }
 0x4e4   : > { %v9715_v17 = vpop.f32.mrf.mxu1 }
 0x4e5   : > { %v9727_v49 = vpop.f32.mrf.mxu0 }
 0x4e6   : > { %v3125_v23 = vpop.f32.mrf.mxu1 }
 0x4e7   : > { %v3256_v1 = vpop.f32.mrf.mxu0 }
 0x4e8   : > { %v9720_v14 = vpop.f32.mrf.mxu1 }
 0x4e9   : > { %v9738_v31 = vpop.f32.mrf.mxu0  ;;  %v3192_v5 = vadd.f32 %v9720_v14, %v9714_v44 }
 0x4ea   : > { %v3183_v18 = vpop.f32.mrf.mxu1 }
 0x4eb   : > { %v3401_v54 = vpop.f32.mrf.mxu0  ;;  %v3184_v63 = vadd.f32 %v3183_v18, %v3122_v34  ;;  %v3270_v37 = vadd.f32 %v9726_v29, %v3192_v5 }
 0x4ec   : > { %v9721_v61 = vpop.f32.mrf.mxu1 }
 0x4ed   : > { %v9739_v52 = vpop.f32.mrf.mxu0  ;;  %v3195_v35 = vadd.f32 %v9721_v61, %v9715_v17  ;;  %v3268_v3 = vadd.f32 %v3253_v46, %v3184_v63 }
 0x4ee   : > { %v3186_v55 = vpop.f32.mrf.mxu1 }
 0x4ef   : > { %v3404_v4 = vpop.f32.mrf.mxu0  ;;  %v3187_v42 = vadd.f32 %v3186_v55, %v3125_v23  ;;  %v3271_v39 = vadd.f32 %v9727_v49, %v3195_v35 }
 0x4f0   : > { %v9732_v13 = vpop.f32.mrf.mxu1 }
 0x4f1   : > { %v9750_v2 = vpop.f32.mrf.mxu0  ;;  %v3344_v32 = vadd.f32 %v9732_v13, %v3270_v37  ;;  %v3269_v45 = vadd.f32 %v3256_v1, %v3187_v42 }
 0x4f2   : > { %v3327_v36 = vpop.f32.mrf.mxu1 }
 0x4f3   : > { %v3549_v56 = vpop.f32.mrf.mxu0  ;;  %v3342_v48 = vadd.f32 %v3327_v36, %v3268_v3  ;;  %v3418_v21 = vadd.f32 %v9738_v31, %v3344_v32 }
 0x4f4   : > { %v9733_v62 = vpop.f32.mrf.mxu1 }
 0x4f5   : > { %v9751_v38 = vpop.f32.mrf.mxu0  ;;  %v3345_v22 = vadd.f32 %v9733_v62, %v3271_v39  ;;  %v3416_v19 = vadd.f32 %v3401_v54, %v3342_v48 }
 0x4f6   : > { %v3330_v58 = vpop.f32.mrf.mxu1 }
 0x4f7   : > { %v3552_v59 = vpop.f32.mrf.mxu0  ;;  %v3343_v0 = vadd.f32 %v3330_v58, %v3269_v45  ;;  %v3419_v10 = vadd.f32 %v9739_v52, %v3345_v22 }
 0x4f8   : > { %v9744_v50 = vpop.f32.mrf.mxu1 }
 0x4f9   : > { %v9762_v9 = vpop.f32.mrf.mxu0  ;;  %v3492_v16 = vadd.f32 %v9744_v50, %v3418_v21  ;;  %v3417_v15 = vadd.f32 %v3404_v4, %v3343_v0 }
 0x4fa   : > { %v3475_v57 = vpop.f32.mrf.mxu1 }
 0x4fb   : > { %v3697_v60 = vpop.f32.mrf.mxu0  ;;  %v3490_v26 = vadd.f32 %v3475_v57, %v3416_v19  ;;  %v3566_v44 = vadd.f32 %v9750_v2, %v3492_v16 }
 0x4fc   : > { %v9745_v25 = vpop.f32.mrf.mxu1 }
 0x4fd   : > { %v9763_v47 = vpop.f32.mrf.mxu0  ;;  %v3493_v20 = vadd.f32 %v9745_v25, %v3419_v10  ;;  %v3564_v49 = vadd.f32 %v3549_v56, %v3490_v26 }
 0x4fe   : > { %v3478_v53 = vpop.f32.mrf.mxu1 }
 0x4ff   : > { %v3700_v51 = vpop.f32.mrf.mxu0  ;;  %v3491_v46 = vadd.f32 %v3478_v53, %v3417_v15  ;;  %v3567_v31 = vadd.f32 %v9751_v38, %v3493_v20 }
 0x500   : > { %v9756_v11 = vpop.f32.mrf.mxu1 }
 0x501   : > { %v9774_v43 = vpop.f32.mrf.mxu0  ;;  %v3640_v17 = vadd.f32 %v9756_v11, %v3566_v44  ;;  %v3565_v55 = vadd.f32 %v3552_v59, %v3491_v46 }
 0x502   : > { %v3623_v12 = vpop.f32.mrf.mxu1 }
 0x503   : > { %v3845_v28 = vpop.f32.mrf.mxu0  ;;  %v3638_v14 = vadd.f32 %v3623_v12, %v3564_v49  ;;  %v3714_v13 = vadd.f32 %v9762_v9, %v3640_v17 }
 0x504   : > { %v9757_v7 = vpop.f32.mrf.mxu1 }
 0x505   : > { %v9775_v8 = vpop.f32.mrf.mxu0  ;;  %v3641_v61 = vadd.f32 %v9757_v7, %v3567_v31  ;;  %v3712_v58 = vadd.f32 %v3697_v60, %v3638_v14 }
 0x506   : > { %v3626_v33 = vpop.f32.mrf.mxu1 }
 0x507   : > { %v3848_v29 = vpop.f32.mrf.mxu0  ;;  %v3639_v36 = vadd.f32 %v3626_v33, %v3565_v55  ;;  %v3715_v50 = vadd.f32 %v9763_v47, %v3641_v61  ;;  %v8687_v55 = vld [vmem:[%s12161_s10 + $0x2] ss:$0 sm:$0xff] }
 0x508   : > { %v9768_v34 = vpop.f32.mrf.mxu1 }
 0x509   : > { %v9786_v23 = vpop.f32.mrf.mxu0  ;;  %v3788_v62 = vadd.f32 %v9768_v34, %v3714_v13  ;;  %v3713_v56 = vadd.f32 %v3700_v51, %v3639_v36 }
 0x50a   : > { %v3771_v1 = vpop.f32.mrf.mxu1 }
 0x50b   : > { %v3993_v18 = vpop.f32.mrf.mxu0  ;;  %v3786_v5 = vadd.f32 %v3771_v1, %v3712_v58  ;;  %v3862_v35 = vadd.f32 %v9774_v43, %v3788_v62 }
 0x50c   : > { %v9769_v54 = vpop.f32.mrf.mxu1 }
 0x50d   : > { %v9787_v4 = vpop.f32.mrf.mxu0  ;;  %v3789_v57 = vadd.f32 %v9769_v54, %v3715_v50  ;;  %v3860_v32 = vadd.f32 %v3845_v28, %v3786_v5 }
 0x50e   : > { %v3774_v52 = vpop.f32.mrf.mxu1 }
 0x50f   : > { %v3996_v37 = vpop.f32.mrf.mxu0  ;;  %v3787_v38 = vadd.f32 %v3774_v52, %v3713_v56  ;;  %v3863_v9 = vadd.f32 %v9775_v8, %v3789_v57  ;;  %v8686_v8 = vld [vmem:[%s12160_s9 + $0x2] ss:$0 sm:$0xff] }
 0x510   : > { %v9780_v2 = vpop.f32.mrf.mxu1 }
 0x511   : > { %v3936_v42 = vadd.f32 %v9780_v2, %v3862_v35  ;;  %v9798_v53 = vpop.f32.mrf.mxu0  ;;  %v3861_v39 = vadd.f32 %v3848_v29, %v3787_v38  ;;  %v8688_v2 = vld [vmem:[%s12162_s11 + $0x2] ss:$0 sm:$0xff] }
 0x512   : > { %v3919_v63 = vpop.f32.mrf.mxu1 }
 0x513   : > { %v3934_v59 = vadd.f32 %v3919_v63, %v3860_v32  ;;  %v4010_v11 = vadd.f32 %v9786_v23, %v3936_v42  ;;  %v4141_v12 = vpop.f32.mrf.mxu0 }
 0x514   : > { %v9781_v25 = vpop.f32.mrf.mxu1 }
 0x515   : > { %v3937_v60 = vadd.f32 %v9781_v25, %v3863_v9  ;;  %v4008_v21 = vadd.f32 %v3993_v18, %v3934_v59  ;;  %v9799_v26 = vpop.f32.mrf.mxu0  ;;  %v10289_v25 = vld [vmem:[%s12155_s4] sm:$0xff]   ;;  %v10290_v59 = vld [vmem:[%s12155_s4 + $0x10] sm:$0xff]  }
 0x516   : > { %v3922_v3 = vpop.f32.mrf.mxu1 }
 0x517   : > { %v3935_v45 = vadd.f32 %v3922_v3, %v3861_v39  ;;  %v4011_v0 = vadd.f32 %v9787_v4, %v3937_v60  ;;  %v4144_v17 = vpop.f32.mrf.mxu0 }
 0x518   : > { %v9792_v48 = vpop.f32.mrf.mxu1 }
 0x519   : > { %v4084_v47 = vadd.f32 %v9792_v48, %v4010_v11  ;;  %v4009_v7 = vadd.f32 %v3996_v37, %v3935_v45  ;;  %v10288_v37 = vld [vmem:[%s12155_s4 + $0x8] sm:$0xff]   ;;  %v10291_v11 = vld [vmem:[%s12155_s4 + $0x18] sm:$0xff]  }
 0x51a   : > { %v4067_v22 = vpop.f32.mrf.mxu1 }
 0x51b   : > { %v4082_v43 = vadd.f32 %v4067_v22, %v4008_v21  ;;  %v4158_v28 = vadd.f32 %v9798_v53, %v4084_v47 }
 0x51c   : > { %v9793_v51 = vpop.f32.mrf.mxu1 }
 0x51d   : > { %v4085_v19 = vadd.f32 %v9793_v51, %v4011_v0  ;;  %v4156_v15 = vadd.f32 %v4141_v12, %v4082_v43  ;;  %v10292_v51 = vld [vmem:[%s12155_s4 + $0x20] sm:$0xff]   ;;  %v10293_v0 = vld [vmem:[%s12155_s4 + $0x28] sm:$0xff]  }
 0x51e   : > { %v4070_v16 = vpop.f32.mrf.mxu1 }
 0x51f   : > { %v4083_v33 = vadd.f32 %v4070_v16, %v4009_v7  ;;  %v4159_v46 = vadd.f32 %v9799_v26, %v4085_v19 }
 0x520   : > { %v9804_v10 = vpop.f32.mrf.mxu1 }
 0x521   : > { %v4232_v20 = vadd.f32 %v9804_v10, %v4158_v28  ;;  %v4157_v1 = vadd.f32 %v4144_v17, %v4083_v33  ;;  %v10294_v10 = vld [vmem:[%s12155_s4 + $0x30] sm:$0xff]   ;;  %v10295_v33 = vld [vmem:[%s12155_s4 + $0x38] sm:$0xff]  }
 0x522   : > { %v4215_v44 = vpop.f32.mrf.mxu1 }
 0x523   : > { %v4243_v29 = vadd.f32 %v8686_v8, %v4232_v20  ;;  %v4230_v34 = vadd.f32 %v4215_v44, %v4156_v15 }
 0x524   : > { %v9805_v49 = vpop.f32.mrf.mxu1 }
 0x525   : > { %v4233_v23 = vadd.f32 %v9805_v49, %v4159_v46  ;;  %v4247_v31 = vmax.f32 %v4243_v29, 0.0  ;;  %v4241_v18 = vadd.f32 %v8686_v8, %v4230_v34  ;;  %v10296_v34 = vld [vmem:[%s12155_s4 + $0x40] sm:$0xff]   ;;  %v10297_v49 = vld [vmem:[%s12155_s4 + $0x48] sm:$0xff]  }
 0x526   : > { %v4218_v14 = vpop.f32.mrf.mxu1 }
 0x527   : > { %v4244_v54 = vadd.f32 %v8686_v8, %v4233_v23  ;;  %v4231_v61 = vadd.f32 %v4218_v14, %v4157_v1  ;;  %v4255_v36 = vmul.f32 %v8687_v55, %v4247_v31  ;;  %v4245_v62 = vmax.f32 %v4241_v18, 0.0  ;;  %v10298_v14 = vld [vmem:[%s12155_s4 + $0x50] sm:$0xff]  }
 0x529   : > { %v4248_v13 = vmax.f32 %v4244_v54, 0.0  ;;  %v4242_v52 = vadd.f32 %v8686_v8, %v4231_v61  ;;  %v4263_v63 = vadd.f32 %v8688_v2, %v4255_v36  ;;  %v4253_v57 = vmul.f32 %v8687_v55, %v4245_v62  ;;  %v10299_v54 = vld [vmem:[%s12155_s4 + $0x58] sm:$0xff]   ;;  %v10301_v62 = vld [vmem:[%s12155_s4 + $0x68] sm:$0xff]  }
 0x52b   : > { %v4256_v58 = vmul.f32 %v8687_v55, %v4248_v13  ;;  %v4246_v4 = vmax.f32 %v4242_v52, 0.0  ;;  %v4261_v35 = vadd.f32 %v8688_v2, %v4253_v57  ;;  %v10300_v13 = vld [vmem:[%s12155_s4 + $0x60] sm:$0xff]  }
 0x52d   : > { %v4264_v5 = vadd.f32 %v8688_v2, %v4256_v58  ;;  %v4254_v50 = vmul.f32 %v8687_v55, %v4246_v4 }
 0x52f   : > { %9806 = vmatprep.subr.mxu0 %v4264_v5  ;;  %9817 = vmatprep.subr.mxu1 %v4264_v5  ;;  %v4262_v56 = vadd.f32 %v8688_v2, %v4254_v50  ;;  %v10302_v2 = vld [vmem:[%s12155_s4 + $0x70] sm:$0xff]  }
 0x530   : > { %9807 = vmatpush3.msra.mxu0 %v4264_v5  ;;  %9818 = vmatpush3.msra.mxu1 %v4264_v5 }
 0x531   : > { %9808 = vmatprep.subr.mxu0 %v4263_v63  ;;  %9819 = vmatprep.subr.mxu1 %v4263_v63 }
 0x532   : > { %9809 = vmatpush3.msra.mxu0 %v4263_v63  ;;  %9820 = vmatpush3.msra.mxu1 %v4263_v63  ;;  %v10303_v63 = vld [vmem:[%s12155_s4 + $0x78] sm:$0xff]  }
 0x533   : > { %9810 = vmatprep.subr.mxu0 %v4262_v56  ;;  %9821 = vmatprep.subr.mxu1 %v4262_v56 }
 0x534   : > { %9811 = vmatpush3.msra.mxu0 %v4262_v56  ;;  %9822 = vmatpush3.msra.mxu1 %v4262_v56  ;;  %v5297_v56 = vld [vmem:[#allocation4 + $0x18] sm:$0xff] }
 0x535   : > { %9812 = vmatprep.subr.mxu0 %v4261_v35  ;;  %9823 = vmatprep.subr.mxu1 %v4261_v35 }
 0x536   : > { %9813 = vmatpush3.msra.mxu0 %v4261_v35  ;;  %9824 = vmatpush3.msra.mxu1 %v4261_v35 }
 0x537   : > { %9815 = vmatmul.mubr.msk.f32.vlgmr.msra.gmra.mxu0 %vm977_vm10, %v11305_v41  ;;  %9826 = vmatmul.mubr.msk.f32.vlgmr.msra.gmra.mxu1 %vm977_vm10, %v11311_v6 }
 0x538   : > { %9828 = vmatprep.subr.bf16.mxu0 %v12223_v30  ;;  %9834 = vmatprep.subr.bf16.mxu1 %v12223_v30 }
 0x539   : > { %9830 = vmatprep.mubr.msk.bf16.mxu0 %vm10408_vm2, %v12223_v30  ;;  %9836 = vmatprep.mubr.msk.bf16.mxu1 %vm10408_vm2, %v12223_v30 }
 0x53a   : > { %9829 = vmatpush3.bf16.msra.mxu0 %v10288_v37  ;;  %9835 = vmatpush3.bf16.msra.mxu1 %v10289_v25 }
 0x53b   : > { %9840 = vmatprep.subr.bf16.mxu0 %v12223_v30  ;;  %9846 = vmatprep.subr.bf16.mxu1 %v12223_v30 }
 0x5f7   : > { %v9816_v41 = vpop.f32.mrf.mxu0  ;;  %v9827_v6 = vpop.f32.mrf.mxu1 }
 0x5f8   : > { %v4424_v38 = vmax.f32 %v9816_v41, %v9827_v6 }
 0x5f9   : > { %v4335_v42 = vpop.f32.mrf.mxu0  ;;  %v4414_v32 = vpop.f32.mrf.mxu1 }
 0x5fa   : > { %4430 = vst.msk [vmem:[#allocation4 + $0x10] sm:$0xff] %vm3048_vm1, %v4424_v38  ;;  %v4423_v3 = vmax.f32 %v4335_v42, %v4414_v32 }
 0x5fc   : > { %4429 = vst.msk [vmem:[#allocation4 + $0x8] sm:$0xff] %vm3048_vm1, %v4423_v3 }
 0x601   : > { %v4833_v17 = vld [vmem:[#allocation4 + $0x10] sm:$0xff] }
 0x602   : > { %v4891_v1 = vld [vmem:[#allocation4 + $0x11] sm:$0xff]  ;;  %v5298_v25 = vpack.c.bf16 %v5297_v56, %v4833_v17 }
 0x603   : > { %v4436_v9 = vld [vmem:[#allocation4 + $0x2] sm:$0xff]  ;;  %v11549_v53 = vld [vmem:[#allocation4 + $0xa] sm:$0xff]  ;;  %v4949_v18 = vld [vmem:[#allocation4 + $0x12] sm:$0xff] }
 0x604   : > { %v4431_v48 = vld [vmem:[#allocation4 + $0x1] sm:$0xff]  ;;  %v4438_v39 = vpack.c.bf16 %v11549_v53, %v4436_v9  ;;  %v11552_v60 = vld [vmem:[#allocation4 + $0x9] sm:$0xff]  ;;  %v4950_v61 = vpack.c.bf16 %v4949_v18, %v11549_v53  ;;  %v5007_v55 = vld [vmem:[#allocation4 + $0x13] sm:$0xff] }
 0x605   : > { %v4433_v22 = vpack.c.bf16 %v11552_v60, %v4431_v48  ;;  %v4542_v45 = vld [vmem:[#allocation4 + $0x3] sm:$0xff]  ;;  %v11564_v47 = vld [vmem:[#allocation4 + $0xb] sm:$0xff]  ;;  %v4892_v31 = vpack.c.bf16 %v4891_v1, %v11552_v60  ;;  %v5065_v36 = vld [vmem:[#allocation4 + $0x14] sm:$0xff] }
 0x606   : > { %9831 = vmatmul.mubr.msk.bf16.vlgmr.msra.gmra.mxu0 %vm3048_vm1, %v4438_v39  ;;  %v4600_v21 = vld [vmem:[#allocation4 + $0x4] sm:$0xff]  ;;  %v11567_v12 = vld [vmem:[#allocation4 + $0xc] sm:$0xff]  ;;  %v4544_v43 = vpack.c.bf16 %v11564_v47, %v4542_v45  ;;  %v5008_v52 = vpack.c.bf16 %v5007_v55, %v11564_v47  ;;  %v5123_v4 = vld [vmem:[#allocation4 + $0x15] sm:$0xff] }
 0x607   : > { %9837 = vmatmul.mubr.msk.bf16.vlgmr.msra.gmra.mxu1 %vm3048_vm1, %v4433_v22  ;;  %9841 = vmatpush3.bf16.msra.mxu0 %v10290_v59  ;;  %v4602_v16 = vpack.c.bf16 %v11567_v12, %v4600_v21  ;;  %v4658_v19 = vld [vmem:[#allocation4 + $0x5] sm:$0xff]  ;;  %v11584_v7 = vld [vmem:[#allocation4 + $0xd] sm:$0xff]  ;;  %v5066_v58 = vpack.c.bf16 %v5065_v36, %v11567_v12  ;;  %v5181_v50 = vld [vmem:[#allocation4 + $0x16] sm:$0xff] }
 0x608   : > { %9847 = vmatpush3.bf16.msra.mxu1 %v10291_v11  ;;  %9842 = vmatprep.mubr.msk.bf16.mxu0 %vm10408_vm2, %v12223_v30  ;;  %v4716_v28 = vld [vmem:[#allocation4 + $0x6] sm:$0xff]  ;;  %v11587_v26 = vld [vmem:[#allocation4 + $0xe] sm:$0xff]  ;;  %v4660_v8 = vpack.c.bf16 %v11584_v7, %v4658_v19  ;;  %v5124_v5 = vpack.c.bf16 %v5123_v4, %v11584_v7  ;;  %v5239_v35 = vld [vmem:[#allocation4 + $0x17] sm:$0xff] }
 0x609   : > { %9848 = vmatprep.mubr.msk.bf16.mxu1 %vm10408_vm2, %v12223_v30  ;;  %9852 = vmatprep.subr.bf16.mxu0 %v12223_v30  ;;  %v4718_v20 = vpack.c.bf16 %v11587_v26, %v4716_v28  ;;  %v4774_v15 = vld [vmem:[#allocation4 + $0x7] sm:$0xff]  ;;  %v11604_v44 = vld [vmem:[#allocation4 + $0xf] sm:$0xff]  ;;  %v5182_v57 = vpack.c.bf16 %v5181_v50, %v11587_v26 }
 0x60a   : > { %9858 = vmatprep.subr.bf16.mxu1 %v12223_v30  ;;  %v4832_v29 = vld [vmem:[#allocation4 + $0x8] sm:$0xff]  ;;  %v4776_v46 = vpack.c.bf16 %v11604_v44, %v4774_v15  ;;  %v5240_v37 = vpack.c.bf16 %v5239_v35, %v11604_v44 }
 0x60b   : > { %v4834_v23 = vpack.c.bf16 %v4833_v17, %v4832_v29 }
 0x60e   : > { %9843 = vmatmul.mubr.msk.bf16.vlgmr.msra.gmra.mxu0 %vm3048_vm1, %v4544_v43 }
 0x60f   : > { %9849 = vmatmul.mubr.msk.bf16.vlgmr.msra.gmra.mxu1 %vm3048_vm1, %v4602_v16  ;;  %9853 = vmatpush3.bf16.msra.mxu0 %v10292_v51 }
 0x610   : > { %9859 = vmatpush3.bf16.msra.mxu1 %v10293_v0  ;;  %9854 = vmatprep.mubr.msk.bf16.mxu0 %vm10408_vm2, %v12223_v30 }
 0x611   : > { %9860 = vmatprep.mubr.msk.bf16.mxu1 %vm10408_vm2, %v12223_v30  ;;  %9864 = vmatprep.subr.bf16.mxu0 %v12223_v30 }
 0x612   : > { %9870 = vmatprep.subr.bf16.mxu1 %v12223_v30 }
 0x616   : > { %9855 = vmatmul.mubr.msk.bf16.vlgmr.msra.gmra.mxu0 %vm3048_vm1, %v4660_v8 }
 0x617   : > { %9861 = vmatmul.mubr.msk.bf16.vlgmr.msra.gmra.mxu1 %vm3048_vm1, %v4718_v20  ;;  %9865 = vmatpush3.bf16.msra.mxu0 %v10294_v10 }
 0x618   : > { %9871 = vmatpush3.bf16.msra.mxu1 %v10295_v33  ;;  %9866 = vmatprep.mubr.msk.bf16.mxu0 %vm10408_vm2, %v12223_v30 }
 0x619   : > { %9872 = vmatprep.mubr.msk.bf16.mxu1 %vm10408_vm2, %v12223_v30  ;;  %9876 = vmatprep.subr.bf16.mxu0 %v12223_v30 }
 0x61a   : > { %9882 = vmatprep.subr.bf16.mxu1 %v12223_v30 }
 0x61e   : > { %9867 = vmatmul.mubr.msk.bf16.vlgmr.msra.gmra.mxu0 %vm3048_vm1, %v4776_v46 }
 0x61f   : > { %9873 = vmatmul.mubr.msk.bf16.vlgmr.msra.gmra.mxu1 %vm3048_vm1, %v4834_v23  ;;  %9877 = vmatpush3.bf16.msra.mxu0 %v10296_v34 }
 0x620   : > { %9883 = vmatpush3.bf16.msra.mxu1 %v10297_v49  ;;  %9878 = vmatprep.mubr.msk.bf16.mxu0 %vm10408_vm2, %v12223_v30 }
 0x621   : > { %9884 = vmatprep.mubr.msk.bf16.mxu1 %vm10408_vm2, %v12223_v30  ;;  %9888 = vmatprep.subr.bf16.mxu0 %v12223_v30 }
 0x622   : > { %9894 = vmatprep.subr.bf16.mxu1 %v12223_v30 }
 0x626   : > { %9879 = vmatmul.mubr.msk.bf16.vlgmr.msra.gmra.mxu0 %vm3048_vm1, %v4892_v31 }
 0x627   : > { %9885 = vmatmul.mubr.msk.bf16.vlgmr.msra.gmra.mxu1 %vm3048_vm1, %v4950_v61  ;;  %9889 = vmatpush3.bf16.msra.mxu0 %v10298_v14 }
 0x628   : > { %9895 = vmatpush3.bf16.msra.mxu1 %v10299_v54  ;;  %9890 = vmatprep.mubr.msk.bf16.mxu0 %vm10408_vm2, %v12223_v30 }
 0x629   : > { %9896 = vmatprep.mubr.msk.bf16.mxu1 %vm10408_vm2, %v12223_v30  ;;  %9900 = vmatprep.subr.bf16.mxu0 %v12223_v30 }
 0x62a   : > { %9906 = vmatprep.subr.bf16.mxu1 %v12223_v30 }
 0x62e   : > { %9891 = vmatmul.mubr.msk.bf16.vlgmr.msra.gmra.mxu0 %vm3048_vm1, %v5008_v52 }
 0x62f   : > { %9897 = vmatmul.mubr.msk.bf16.vlgmr.msra.gmra.mxu1 %vm3048_vm1, %v5066_v58  ;;  %9901 = vmatpush3.bf16.msra.mxu0 %v10300_v13 }
 0x630   : > { %9907 = vmatpush3.bf16.msra.mxu1 %v10301_v62  ;;  %9902 = vmatprep.mubr.msk.bf16.mxu0 %vm10408_vm2, %v12223_v30 }
 0x631   : > { %9908 = vmatprep.mubr.msk.bf16.mxu1 %vm10408_vm2, %v12223_v30  ;;  %9912 = vmatprep.subr.bf16.mxu0 %v12223_v30 }
 0x632   : > { %9918 = vmatprep.subr.bf16.mxu1 %v12223_v30 }
 0x636   : > { %9903 = vmatmul.mubr.msk.bf16.vlgmr.msra.gmra.mxu0 %vm3048_vm1, %v5124_v5 }
 0x637   : > { %9909 = vmatmul.mubr.msk.bf16.vlgmr.msra.gmra.mxu1 %vm3048_vm1, %v5182_v57  ;;  %9913 = vmatpush3.bf16.msra.mxu0 %v10302_v2 }
 0x638   : > { %9919 = vmatpush3.bf16.msra.mxu1 %v10303_v63  ;;  %9914 = vmatprep.mubr.msk.bf16.mxu0 %vm10408_vm2, %v12223_v30 }
 0x639   : > { %9920 = vmatprep.mubr.msk.bf16.mxu1 %vm10408_vm2, %v12223_v30  ;;  %9924 = vmatprep.subr.mxu0 %v12223_v30 }
 0x63a   : > { %9931 = vmatprep.subr.mxu1 %v12223_v30 }
 0x63e   : > { %9915 = vmatmul.mubr.msk.bf16.vlgmr.msra.gmra.mxu0 %vm3048_vm1, %v5240_v37 }
 0x63f   : > { %9921 = vmatmul.mubr.msk.bf16.vlgmr.msra.gmra.mxu1 %vm3048_vm1, %v5298_v25  ;;  %9928 = vmatprep.mubr.msk.f32.mxu0 %vm10408_vm2, %v12223_v30 }
 0x640   : > { %9935 = vmatprep.mubr.msk.f32.mxu1 %vm10408_vm2, %v12223_v30 }
 0x6c6   : > { %v4485_v41 = vpop.f32.mrf.mxu0 }
 0x6c7   : > { %v4535_v6 = vpop.f32.mrf.mxu1 }
 0x6c8   : > { %v9832_v38 = vpop.f32.mrf.mxu0  ;;  %v4536_v43 = vadd.f32 %v4535_v6, %v4485_v41 }
 0x6c9   : > { %v9838_v42 = vpop.f32.mrf.mxu1 }
 0x6ca   : > { %v4488_v32 = vpop.f32.mrf.mxu0 }
 0x6cb   : > { %v4538_v3 = vpop.f32.mrf.mxu1 }
 0x6cc   : > { %v9833_v59 = vpop.f32.mrf.mxu0  ;;  %v4539_v26 = vadd.f32 %v4538_v3, %v4488_v32 }
 0x6cd   : > { %v9839_v9 = vpop.f32.mrf.mxu1 }
 0x6ce   : > { %v4591_v53 = vpop.f32.mrf.mxu0 }
 0x6cf   : > { %v4649_v48 = vpop.f32.mrf.mxu1  ;;  %v4598_v19 = vadd.f32 %v4591_v53, %v4536_v43 }
 0x6d0   : > { %v9844_v39 = vpop.f32.mrf.mxu0 }
 0x6d1   : > { %v9850_v60 = vpop.f32.mrf.mxu1  ;;  %v4656_v33 = vadd.f32 %v4649_v48, %v4598_v19 }
 0x6d2   : > { %v4594_v11 = vpop.f32.mrf.mxu0 }
 0x6d3   : > { %v4652_v22 = vpop.f32.mrf.mxu1  ;;  %v4599_v20 = vadd.f32 %v4594_v11, %v4539_v26 }
 0x6d4   : > { %v9845_v45 = vpop.f32.mrf.mxu0 }
 0x6d5   : > { %v9851_v47 = vpop.f32.mrf.mxu1  ;;  %v4657_v17 = vadd.f32 %v4652_v22, %v4599_v20 }
 0x6d6   : > { %v4707_v21 = vpop.f32.mrf.mxu0 }
 0x6d7   : > { %v4765_v12 = vpop.f32.mrf.mxu1  ;;  %v4714_v29 = vadd.f32 %v4707_v21, %v4656_v33 }
 0x6d8   : > { %v9856_v51 = vpop.f32.mrf.mxu0 }
 0x6d9   : > { %v9862_v0 = vpop.f32.mrf.mxu1  ;;  %v4772_v1 = vadd.f32 %v4765_v12, %v4714_v29 }
 0x6da   : > { %v4710_v16 = vpop.f32.mrf.mxu0 }
 0x6db   : > { %v4768_v7 = vpop.f32.mrf.mxu1  ;;  %v4715_v14 = vadd.f32 %v4710_v16, %v4657_v17 }
 0x6dc   : > { %v9857_v28 = vpop.f32.mrf.mxu0 }
 0x6dd   : > { %v9863_v10 = vpop.f32.mrf.mxu1  ;;  %v4773_v13 = vadd.f32 %v4768_v7, %v4715_v14  ;;  %v8755_v28 = vld [vmem:[%s12160_s9 + $0x3] ss:$0 sm:$0xff] }
 0x6de   : > { %v4823_v8 = vpop.f32.mrf.mxu0 }
 0x6df   : > { %v4881_v15 = vpop.f32.mrf.mxu1  ;;  %v4830_v54 = vadd.f32 %v4823_v8, %v4772_v1  ;;  %v8756_v1 = vld [vmem:[%s12161_s10 + $0x3] ss:$0 sm:$0xff] }
 0x6e0   : > { %v9868_v44 = vpop.f32.mrf.mxu0 }
 0x6e1   : > { %v9874_v34 = vpop.f32.mrf.mxu1  ;;  %v4888_v62 = vadd.f32 %v4881_v15, %v4830_v54  ;;  %v8757_v54 = vld [vmem:[%s12162_s11 + $0x3] ss:$0 sm:$0xff] }
 0x6e2   : > { %v4826_v46 = vpop.f32.mrf.mxu0 }
 0x6e3   : > { %v4884_v49 = vpop.f32.mrf.mxu1  ;;  %v4831_v58 = vadd.f32 %v4826_v46, %v4773_v13  ;;  %v10304_v13 = vld [vmem:[%s12156_s5 + $0x8] sm:$0xff]  }
 0x6e4   : > { %v9869_v23 = vpop.f32.mrf.mxu0 }
 0x6e5   : > { %v9875_v31 = vpop.f32.mrf.mxu1  ;;  %v4889_v57 = vadd.f32 %v4884_v49, %v4831_v58 }
 0x6e6   : > { %v4939_v18 = vpop.f32.mrf.mxu0 }
 0x6e7   : > { %v4997_v61 = vpop.f32.mrf.mxu1  ;;  %v4946_v5 = vadd.f32 %v4939_v18, %v4888_v62 }
 0x6e8   : > { %v9880_v55 = vpop.f32.mrf.mxu0 }
 0x6e9   : > { %v9886_v52 = vpop.f32.mrf.mxu1  ;;  %v5004_v37 = vadd.f32 %v4997_v61, %v4946_v5  ;;  %v10306_v5 = vld [vmem:[%s12156_s5 + $0x10] sm:$0xff]  }
 0x6ea   : > { %v4942_v36 = vpop.f32.mrf.mxu0  ;;  %v10305_v52 = vld [vmem:[%s12156_s5] sm:$0xff]  }
 0x6eb   : > { %v5000_v4 = vpop.f32.mrf.mxu1  ;;  %v4947_v25 = vadd.f32 %v4942_v36, %v4889_v57  ;;  %v10307_v57 = vld [vmem:[%s12156_s5 + $0x18] sm:$0xff]  }
 0x6ec   : > { %v9881_v2 = vpop.f32.mrf.mxu0 }
 0x6ed   : > { %v9887_v50 = vpop.f32.mrf.mxu1  ;;  %v5005_v3 = vadd.f32 %v5000_v4, %v4947_v25 }
 0x6ee   : > { %v5055_v63 = vpop.f32.mrf.mxu0 }
 0x6ef   : > { %v5113_v56 = vpop.f32.mrf.mxu1  ;;  %v5062_v38 = vadd.f32 %v5055_v63, %v5004_v37 }
 0x6f0   : > { %v9892_v35 = vpop.f32.mrf.mxu0 }
 0x6f1   : > { %v9898_v41 = vpop.f32.mrf.mxu1  ;;  %v5120_v53 = vadd.f32 %v5113_v56, %v5062_v38 }
 0x6f2   : > { %v5058_v6 = vpop.f32.mrf.mxu0  ;;  %v10308_v41 = vld [vmem:[%s12156_s5 + $0x20] sm:$0xff]  }
 0x6f3   : > { %v5116_v42 = vpop.f32.mrf.mxu1  ;;  %v5063_v48 = vadd.f32 %v5058_v6, %v5005_v3  ;;  %v10309_v6 = vld [vmem:[%s12156_s5 + $0x28] sm:$0xff]  }
 0x6f4   : > { %v9893_v32 = vpop.f32.mrf.mxu0 }
 0x6f5   : > { %v9899_v59 = vpop.f32.mrf.mxu1  ;;  %v5121_v47 = vadd.f32 %v5116_v42, %v5063_v48 }
 0x6f6   : > { %v5171_v9 = vpop.f32.mrf.mxu0  ;;  %v10310_v59 = vld [vmem:[%s12156_s5 + $0x30] sm:$0xff]  }
 0x6f7   : > { %v5229_v39 = vpop.f32.mrf.mxu1  ;;  %v5178_v11 = vadd.f32 %v5171_v9, %v5120_v53  ;;  %v10311_v9 = vld [vmem:[%s12156_s5 + $0x38] sm:$0xff]  }
 0x6f8   : > { %v9904_v60 = vpop.f32.mrf.mxu0 }
 0x6f9   : > { %v9910_v22 = vpop.f32.mrf.mxu1  ;;  %v5236_v51 = vadd.f32 %v5229_v39, %v5178_v11  ;;  %v10312_v11 = vld [vmem:[%s12156_s5 + $0x40] sm:$0xff]  }
 0x6fa   : > { %v5174_v45 = vpop.f32.mrf.mxu0  ;;  %v10313_v22 = vld [vmem:[%s12156_s5 + $0x48] sm:$0xff]  }
 0x6fb   : > { %v5232_v21 = vpop.f32.mrf.mxu1  ;;  %v5179_v43 = vadd.f32 %v5174_v45, %v5121_v47 }
 0x6fc   : > { %v9905_v12 = vpop.f32.mrf.mxu0 }
 0x6fd   : > { %v9911_v0 = vpop.f32.mrf.mxu1  ;;  %v5237_v10 = vadd.f32 %v5232_v21, %v5179_v43  ;;  %v10315_v43 = vld [vmem:[%s12156_s5 + $0x58] sm:$0xff]  }
 0x6fe   : > { %v5287_v16 = vpop.f32.mrf.mxu0 }
 0x6ff   : > { %v5294_v19 = vadd.f32 %v5287_v16, %v5236_v51  ;;  %v5345_v7 = vpop.f32.mrf.mxu1  ;;  %v10314_v51 = vld [vmem:[%s12156_s5 + $0x50] sm:$0xff]  }
 0x700   : > { %v9916_v26 = vpop.f32.mrf.mxu0 }
 0x701   : > { %v5352_v8 = vadd.f32 %v5345_v7, %v5294_v19  ;;  %v9922_v33 = vpop.f32.mrf.mxu1  ;;  %v10317_v26 = vld [vmem:[%s12156_s5 + $0x68] sm:$0xff]  }
 0x702   : > { %v5290_v20 = vpop.f32.mrf.mxu0 }
 0x703   : > { %v5361_v15 = vadd.f32 %v8755_v28, %v5352_v8  ;;  %v5295_v44 = vadd.f32 %v5290_v20, %v5237_v10  ;;  %v5348_v29 = vpop.f32.mrf.mxu1 }
 0x704   : > { %v9917_v34 = vpop.f32.mrf.mxu0 }
 0x705   : > { %v5353_v46 = vadd.f32 %v5348_v29, %v5295_v44  ;;  %v9923_v17 = vpop.f32.mrf.mxu1  ;;  %v5363_v49 = vmax.f32 %v5361_v15, 0.0  ;;  %v10318_v15 = vld [vmem:[%s12156_s5 + $0x70] sm:$0xff]   ;;  %v10319_v44 = vld [vmem:[%s12156_s5 + $0x78] sm:$0xff]  }
 0x707   : > { %v5362_v23 = vadd.f32 %v8755_v28, %v5353_v46  ;;  %v5369_v31 = vmul.f32 %v8756_v1, %v5363_v49  ;;  %v10316_v28 = vld [vmem:[%s12156_s5 + $0x60] sm:$0xff]   ;;  %v6348_v46 = vld [vmem:[#allocation5 + $0x10] sm:$0xff] }
 0x708   : > { %v6349_v49 = vpack.c.bf16 %v6348_v46, %v6348_v46 }
 0x709   : > { %v5364_v14 = vmax.f32 %v5362_v23, 0.0  ;;  %v5375_v55 = vadd.f32 %v8757_v54, %v5369_v31 }
 0x70b   : > { %v5370_v18 = vmul.f32 %v8756_v1, %v5364_v14 }
 0x70d   : > { %v5376_v61 = vadd.f32 %v8757_v54, %v5370_v18 }
 0x70f   : > { %9925 = vmatpush3.msra.mxu0 %v5376_v61  ;;  %9932 = vmatpush3.msra.mxu1 %v5376_v61 }
 0x710   : > { %9926 = vmatprep.subr.mxu0 %v12223_v30  ;;  %9933 = vmatprep.subr.mxu1 %v12223_v30 }
 0x711   : > { %9927 = vmatpush3.msra.mxu0 %v5375_v55  ;;  %9934 = vmatpush3.msra.mxu1 %v5375_v55 }
 0x712   : > { %9929 = vmatmul.mubr.msk.f32.vlgmr.msra.gmra.mxu0 %vm3048_vm1, %v12231_v40  ;;  %9936 = vmatmul.mubr.msk.f32.vlgmr.msra.gmra.mxu1 %vm3048_vm1, %v12232_v27 }
 0x713   : > { %9938 = vmatprep.subr.bf16.mxu0 %v12223_v30  ;;  %9944 = vmatprep.subr.bf16.mxu1 %v12223_v30 }
 0x714   : > { %9940 = vmatprep.mubr.msk.bf16.mxu0 %vm10408_vm2, %v12223_v30  ;;  %9946 = vmatprep.mubr.msk.bf16.mxu1 %vm10408_vm2, %v12223_v30 }
 0x715   : > { %9939 = vmatpush3.bf16.msra.mxu0 %v10304_v13  ;;  %9945 = vmatpush3.bf16.msra.mxu1 %v10305_v52 }
 0x716   : > { %9950 = vmatprep.subr.bf16.mxu0 %v12223_v30  ;;  %9956 = vmatprep.subr.bf16.mxu1 %v12223_v30 }
 0x7d2   : > { %v5445_v36 = vpop.f32.mrf.mxu0  ;;  %v5517_v62 = vpop.f32.mrf.mxu1 }
 0x7d3   : > { %v5521_v58 = vmax.f32 %v5445_v36, %v5517_v62 }
 0x7d4   : > { %v9930_v4 = vpop.f32.mrf.mxu0  ;;  %v9937_v2 = vpop.f32.mrf.mxu1 }
 0x7d5   : > { %5525 = vst.msk [vmem:[#allocation5 + $0x8] sm:$0xff] %vm3048_vm1, %v5521_v58 }
 0x7dc   : > { %v5530_v50 = vld [vmem:[#allocation5 + $0x2] sm:$0xff]  ;;  %v6018_v12 = vld [vmem:[#allocation5 + $0xa] sm:$0xff] }
 0x7dd   : > { %v5526_v63 = vld [vmem:[#allocation5 + $0x1] sm:$0xff]  ;;  %v5531_v56 = vpack.c.bf16 %v5530_v50, %v5530_v50  ;;  %v5963_v21 = vld [vmem:[#allocation5 + $0x9] sm:$0xff]  ;;  %v6019_v16 = vpack.c.bf16 %v6018_v12, %v6018_v12 }
 0x7de   : > { %v5527_v35 = vpack.c.bf16 %v5526_v63, %v5526_v63  ;;  %v5633_v37 = vld [vmem:[#allocation5 + $0x3] sm:$0xff]  ;;  %v5964_v0 = vpack.c.bf16 %v5963_v21, %v5963_v21  ;;  %v6073_v19 = vld [vmem:[#allocation5 + $0xb] sm:$0xff] }
 0x7df   : > { %9941 = vmatmul.mubr.msk.bf16.vlgmr.msra.gmra.mxu0 %vm3048_vm1, %v5531_v56  ;;  %v5688_v25 = vld [vmem:[#allocation5 + $0x4] sm:$0xff]  ;;  %v5634_v38 = vpack.c.bf16 %v5633_v37, %v5633_v37  ;;  %v6128_v7 = vld [vmem:[#allocation5 + $0xc] sm:$0xff]  ;;  %v6074_v10 = vpack.c.bf16 %v6073_v19, %v6073_v19 }
 0x7e0   : > { %9947 = vmatmul.mubr.msk.bf16.vlgmr.msra.gmra.mxu1 %vm3048_vm1, %v5527_v35  ;;  %9951 = vmatpush3.bf16.msra.mxu0 %v10306_v5  ;;  %v5689_v42 = vpack.c.bf16 %v5688_v25, %v5688_v25  ;;  %v5743_v32 = vld [vmem:[#allocation5 + $0x5] sm:$0xff]  ;;  %v6129_v8 = vpack.c.bf16 %v6128_v7, %v6128_v7  ;;  %v6183_v33 = vld [vmem:[#allocation5 + $0xd] sm:$0xff] }
 0x7e1   : > { %9957 = vmatpush3.bf16.msra.mxu1 %v10307_v57  ;;  %9952 = vmatprep.mubr.msk.bf16.mxu0 %vm10408_vm2, %v12223_v30  ;;  %v5798_v3 = vld [vmem:[#allocation5 + $0x6] sm:$0xff]  ;;  %v5744_v53 = vpack.c.bf16 %v5743_v32, %v5743_v32  ;;  %v6238_v20 = vld [vmem:[#allocation5 + $0xe] sm:$0xff]  ;;  %v6184_v29 = vpack.c.bf16 %v6183_v33, %v6183_v33 }
 0x7e2   : > { %9958 = vmatprep.mubr.msk.bf16.mxu1 %vm10408_vm2, %v12223_v30  ;;  %9962 = vmatprep.subr.bf16.mxu0 %v12223_v30  ;;  %v5799_v48 = vpack.c.bf16 %v5798_v3, %v5798_v3  ;;  %v5853_v39 = vld [vmem:[#allocation5 + $0x7] sm:$0xff]  ;;  %v6239_v34 = vpack.c.bf16 %v6238_v20, %v6238_v20  ;;  %v6293_v17 = vld [vmem:[#allocation5 + $0xf] sm:$0xff] }
 0x7e3   : > { %9968 = vmatprep.subr.bf16.mxu1 %v12223_v30  ;;  %v5908_v60 = vld [vmem:[#allocation5 + $0x8] sm:$0xff]  ;;  %v5854_v45 = vpack.c.bf16 %v5853_v39, %v5853_v39  ;;  %v6294_v23 = vpack.c.bf16 %v6293_v17, %v6293_v17 }
 0x7e4   : > { %v5909_v47 = vpack.c.bf16 %v5908_v60, %v5908_v60 }
 0x7e7   : > { %9953 = vmatmul.mubr.msk.bf16.vlgmr.msra.gmra.mxu0 %vm3048_vm1, %v5634_v38 }
 0x7e8   : > { %9959 = vmatmul.mubr.msk.bf16.vlgmr.msra.gmra.mxu1 %vm3048_vm1, %v5689_v42  ;;  %9963 = vmatpush3.bf16.msra.mxu0 %v10308_v41 }
 0x7e9   : > { %9969 = vmatpush3.bf16.msra.mxu1 %v10309_v6  ;;  %9964 = vmatprep.mubr.msk.bf16.mxu0 %vm10408_vm2, %v12223_v30 }
 0x7ea   : > { %9970 = vmatprep.mubr.msk.bf16.mxu1 %vm10408_vm2, %v12223_v30  ;;  %9974 = vmatprep.subr.bf16.mxu0 %v12223_v30 }
 0x7eb   : > { %9980 = vmatprep.subr.bf16.mxu1 %v12223_v30 }
 0x7ef   : > { %9965 = vmatmul.mubr.msk.bf16.vlgmr.msra.gmra.mxu0 %vm3048_vm1, %v5744_v53 }
 0x7f0   : > { %9971 = vmatmul.mubr.msk.bf16.vlgmr.msra.gmra.mxu1 %vm3048_vm1, %v5799_v48  ;;  %9975 = vmatpush3.bf16.msra.mxu0 %v10310_v59 }
 0x7f1   : > { %9981 = vmatpush3.bf16.msra.mxu1 %v10311_v9  ;;  %9976 = vmatprep.mubr.msk.bf16.mxu0 %vm10408_vm2, %v12223_v30 }
 0x7f2   : > { %9982 = vmatprep.mubr.msk.bf16.mxu1 %vm10408_vm2, %v12223_v30  ;;  %9986 = vmatprep.subr.bf16.mxu0 %v12223_v30 }
 0x7f3   : > { %9992 = vmatprep.subr.bf16.mxu1 %v12223_v30 }
 0x7f7   : > { %9977 = vmatmul.mubr.msk.bf16.vlgmr.msra.gmra.mxu0 %vm3048_vm1, %v5854_v45 }
 0x7f8   : > { %9983 = vmatmul.mubr.msk.bf16.vlgmr.msra.gmra.mxu1 %vm3048_vm1, %v5909_v47  ;;  %9987 = vmatpush3.bf16.msra.mxu0 %v10312_v11 }
 0x7f9   : > { %9993 = vmatpush3.bf16.msra.mxu1 %v10313_v22  ;;  %9988 = vmatprep.mubr.msk.bf16.mxu0 %vm10408_vm2, %v12223_v30 }
 0x7fa   : > { %9994 = vmatprep.mubr.msk.bf16.mxu1 %vm10408_vm2, %v12223_v30  ;;  %9998 = vmatprep.subr.bf16.mxu0 %v12223_v30 }
 0x7fb   : > { %10004 = vmatprep.subr.bf16.mxu1 %v12223_v30 }
 0x7ff   : > { %9989 = vmatmul.mubr.msk.bf16.vlgmr.msra.gmra.mxu0 %vm3048_vm1, %v5964_v0 }
 0x800   : > { %9995 = vmatmul.mubr.msk.bf16.vlgmr.msra.gmra.mxu1 %vm3048_vm1, %v6019_v16  ;;  %9999 = vmatpush3.bf16.msra.mxu0 %v10314_v51 }
 0x801   : > { %10005 = vmatpush3.bf16.msra.mxu1 %v10315_v43  ;;  %10000 = vmatprep.mubr.msk.bf16.mxu0 %vm10408_vm2, %v12223_v30 }
 0x802   : > { %10006 = vmatprep.mubr.msk.bf16.mxu1 %vm10408_vm2, %v12223_v30  ;;  %10010 = vmatprep.subr.bf16.mxu0 %v12223_v30 }
 0x803   : > { %10016 = vmatprep.subr.bf16.mxu1 %v12223_v30 }
 0x807   : > { %10001 = vmatmul.mubr.msk.bf16.vlgmr.msra.gmra.mxu0 %vm3048_vm1, %v6074_v10 }
 0x808   : > { %10007 = vmatmul.mubr.msk.bf16.vlgmr.msra.gmra.mxu1 %vm3048_vm1, %v6129_v8  ;;  %10011 = vmatpush3.bf16.msra.mxu0 %v10316_v28 }
 0x809   : > { %10017 = vmatpush3.bf16.msra.mxu1 %v10317_v26  ;;  %10012 = vmatprep.mubr.msk.bf16.mxu0 %vm10408_vm2, %v12223_v30 }
 0x80a   : > { %10018 = vmatprep.mubr.msk.bf16.mxu1 %vm10408_vm2, %v12223_v30  ;;  %10022 = vmatprep.subr.bf16.mxu0 %v12223_v30 }
 0x80b   : > { %10028 = vmatprep.subr.bf16.mxu1 %v12223_v30 }
 0x80f   : > { %10013 = vmatmul.mubr.msk.bf16.vlgmr.msra.gmra.mxu0 %vm3048_vm1, %v6184_v29 }
 0x810   : > { %10019 = vmatmul.mubr.msk.bf16.vlgmr.msra.gmra.mxu1 %vm3048_vm1, %v6239_v34  ;;  %10023 = vmatpush3.bf16.msra.mxu0 %v10318_v15 }
 0x811   : > { %10029 = vmatpush3.bf16.msra.mxu1 %v10319_v44  ;;  %10024 = vmatprep.mubr.msk.bf16.mxu0 %vm10408_vm2, %v12223_v30 }
 0x812   : > { %10030 = vmatprep.mubr.msk.bf16.mxu1 %vm10408_vm2, %v12223_v30  ;;  %10034 = vmatprep.subr.mxu0 %v12223_v30 }
 0x813   : > { %10039 = vmatprep.subr.mxu1 %v12223_v30 }
 0x817   : > { %10025 = vmatmul.mubr.msk.bf16.vlgmr.msra.gmra.mxu0 %vm3048_vm1, %v6294_v23 }
 0x818   : > { %10031 = vmatmul.mubr.msk.bf16.vlgmr.msra.gmra.mxu1 %vm3048_vm1, %v6349_v49  ;;  %10036 = vmatprep.mubr.msk.f32.mxu0 %vm10408_vm2, %v12223_v30 }
 0x819   : > { %10041 = vmatprep.mubr.msk.f32.mxu1 %vm10408_vm2, %v12223_v30 }
 0x89f   : > { %v5578_v1 = vpop.f32.mrf.mxu0 }
 0x8a0   : > { %v5627_v14 = vpop.f32.mrf.mxu1 }
 0x8a1   : > { %v9942_v31 = vpop.f32.mrf.mxu0  ;;  %v5628_v37 = vadd.f32 %v5627_v14, %v5578_v1 }
 0x8a2   : > { %v9948_v18 = vpop.f32.mrf.mxu1 }
 0x8a3   : > { %v5581_v54 = vpop.f32.mrf.mxu0 }
 0x8a4   : > { %v5630_v61 = vpop.f32.mrf.mxu1 }
 0x8a5   : > { %v9943_v55 = vpop.f32.mrf.mxu0 }
 0x8a6   : > { %v9949_v13 = vpop.f32.mrf.mxu1 }
 0x8a7   : > { %v5681_v52 = vpop.f32.mrf.mxu0 }
 0x8a8   : > { %v5736_v36 = vpop.f32.mrf.mxu1  ;;  %v5687_v6 = vadd.f32 %v5681_v52, %v5628_v37 }
 0x8a9   : > { %v9954_v62 = vpop.f32.mrf.mxu0 }
 0x8aa   : > { %v9960_v58 = vpop.f32.mrf.mxu1  ;;  %v5742_v59 = vadd.f32 %v5736_v36, %v5687_v6  ;;  %v8824_v6 = vld [vmem:[%s12162_s11 + $0x4] ss:$0 sm:$0xff] }
 0x8ab   : > { %v5684_v4 = vpop.f32.mrf.mxu0 }
 0x8ac   : > { %v5739_v2 = vpop.f32.mrf.mxu1  ;;  %v8822_v4 = vld [vmem:[%s12160_s9 + $0x4] ss:$0 sm:$0xff] }
 0x8ad   : > { %v9955_v5 = vpop.f32.mrf.mxu0 }
 0x8ae   : > { %v9961_v50 = vpop.f32.mrf.mxu1 }
 0x8af   : > { %v5791_v63 = vpop.f32.mrf.mxu0 }
 0x8b0   : > { %v5846_v57 = vpop.f32.mrf.mxu1  ;;  %v5797_v48 = vadd.f32 %v5791_v63, %v5742_v59  ;;  %v10322_v59 = vld [vmem:[%s12157_s6 + $0x10] sm:$0xff]  }
 0x8b1   : > { %v9966_v56 = vpop.f32.mrf.mxu0 }
 0x8b2   : > { %v9972_v35 = vpop.f32.mrf.mxu1  ;;  %v5852_v45 = vadd.f32 %v5846_v57, %v5797_v48  ;;  %v6573_v48 = vld [vmem:[#allocation6 + $0x1] sm:$0xf] }
 0x8b3   : > { %v5794_v25 = vpop.f32.mrf.mxu0  ;;  %v8823_v35 = vld [vmem:[%s12161_s10 + $0x4] ss:$0 sm:$0xff] }
 0x8b4   : > { %v5849_v41 = vpop.f32.mrf.mxu1 }
 0x8b5   : > { %v9967_v38 = vpop.f32.mrf.mxu0 }
 0x8b6   : > { %v9973_v42 = vpop.f32.mrf.mxu1 }
 0x8b7   : > { %v5901_v32 = vpop.f32.mrf.mxu0 }
 0x8b8   : > { %v5956_v3 = vpop.f32.mrf.mxu1  ;;  %v5907_v12 = vadd.f32 %v5901_v32, %v5852_v45  ;;  %v10320_v32 = vld [vmem:[%s12157_s6 + $0x18] sm:$0xff]   ;;  %v10326_v45 = vld [vmem:[%s12157_s6 + $0x20] sm:$0xff]  }
 0x8b9   : > { %v9978_v9 = vpop.f32.mrf.mxu0 }
 0x8ba   : > { %v9984_v53 = vpop.f32.mrf.mxu1  ;;  %v5962_v19 = vadd.f32 %v5956_v3, %v5907_v12  ;;  %v10321_v3 = vld [vmem:[%s12157_s6 + $0x8] sm:$0xff]   ;;  %v10323_v9 = vld [vmem:[%s12157_s6] sm:$0xff]  }
 0x8bb   : > { %v5904_v39 = vpop.f32.mrf.mxu0  ;;  %v6579_v53 = vld [vmem:[#allocation6 + $0x2] sm:$0xf] }
 0x8bc   : > { %v5959_v60 = vpop.f32.mrf.mxu1  ;;  %v6580_v39 = vpack.c.bf16 %v6579_v53, %v6579_v53 }
 0x8bd   : > { %v9979_v11 = vpop.f32.mrf.mxu0  ;;  %v6574_v60 = vpack.c.bf16 %v6573_v48, %v6573_v48 }
 0x8be   : > { %v9985_v22 = vpop.f32.mrf.mxu1  ;;  %v10324_v11 = vld [vmem:[%s12157_s6 + $0x28] sm:$0xff]  }
 0x8bf   : > { %v6011_v47 = vpop.f32.mrf.mxu0  ;;  %v10325_v22 = vld [vmem:[%s12157_s6 + $0x38] sm:$0xff]  }
 0x8c0   : > { %v6066_v21 = vpop.f32.mrf.mxu1  ;;  %v6017_v26 = vadd.f32 %v6011_v47, %v5962_v19  ;;  %v10327_v47 = vld [vmem:[%s12157_s6 + $0x30] sm:$0xff]   ;;  %v10330_v19 = vld [vmem:[%s12157_s6 + $0x40] sm:$0xff]  }
 0x8c1   : > { %v9990_v51 = vpop.f32.mrf.mxu0 }
 0x8c2   : > { %v9996_v43 = vpop.f32.mrf.mxu1  ;;  %v6072_v15 = vadd.f32 %v6066_v21, %v6017_v26  ;;  %v6696_v21 = vld [vmem:[#allocation6 + $0x3] sm:$0xf] }
 0x8c3   : > { %v6014_v0 = vpop.f32.mrf.mxu0  ;;  %v6697_v12 = vpack.c.bf16 %v6696_v21, %v6696_v21  ;;  %v6759_v51 = vld [vmem:[#allocation6 + $0x4] sm:$0xf]  ;;  %v10328_v43 = vld [vmem:[%s12157_s6 + $0x48] sm:$0xff]  }
 0x8c4   : > { %v6069_v16 = vpop.f32.mrf.mxu1  ;;  %v10329_v0 = vld [vmem:[%s12157_s6 + $0x58] sm:$0xff]   ;;  %v7389_v21 = vld [vmem:[#allocation6 + $0xe] sm:$0xf] }
 0x8c5   : > { %v9991_v7 = vpop.f32.mrf.mxu0  ;;  %v6760_v16 = vpack.c.bf16 %v6759_v51, %v6759_v51  ;;  %v7390_v51 = vpack.c.bf16 %v7389_v21, %v7389_v21 }
 0x8c6   : > { %v9997_v28 = vpop.f32.mrf.mxu1  ;;  %v10331_v7 = vld [vmem:[%s12157_s6 + $0x50] sm:$0xff]  }
 0x8c7   : > { %v6121_v10 = vpop.f32.mrf.mxu0 }
 0x8c8   : > { %v6176_v8 = vpop.f32.mrf.mxu1  ;;  %v6127_v34 = vadd.f32 %v6121_v10, %v6072_v15 }
 0x8c9   : > { %v10002_v33 = vpop.f32.mrf.mxu0 }
 0x8ca   : > { %v10008_v20 = vpop.f32.mrf.mxu1  ;;  %v6182_v1 = vadd.f32 %v6176_v8, %v6127_v34 }
 0x8cb   : > { %v6124_v44 = vpop.f32.mrf.mxu0  ;;  %v10332_v20 = vld [vmem:[%s12157_s6 + $0x68] sm:$0xff]  }
 0x8cc   : > { %v6179_v29 = vpop.f32.mrf.mxu1 }
 0x8cd   : > { %v10003_v46 = vpop.f32.mrf.mxu0 }
 0x8ce   : > { %v10009_v17 = vpop.f32.mrf.mxu1  ;;  %v10333_v46 = vld [vmem:[%s12157_s6 + $0x78] sm:$0xff]  }
 0x8cf   : > { %v6231_v49 = vpop.f32.mrf.mxu0 }
 0x8d0   : > { %v6286_v23 = vpop.f32.mrf.mxu1  ;;  %v6237_v18 = vadd.f32 %v6231_v49, %v6182_v1 }
 0x8d1   : > { %v10014_v14 = vpop.f32.mrf.mxu0 }
 0x8d2   : > { %v10020_v31 = vpop.f32.mrf.mxu1  ;;  %v6292_v52 = vadd.f32 %v6286_v23, %v6237_v18 }
 0x8d3   : > { %v6234_v54 = vpop.f32.mrf.mxu0 }
 0x8d4   : > { %v6289_v61 = vpop.f32.mrf.mxu1  ;;  %v10334_v54 = vld [vmem:[%s12157_s6 + $0x60] sm:$0xff]  }
 0x8d5   : > { %v10015_v55 = vpop.f32.mrf.mxu0  ;;  %v10335_v61 = vld [vmem:[%s12157_s6 + $0x70] sm:$0xff]  }
 0x8d6   : > { %v10021_v13 = vpop.f32.mrf.mxu1 }
 0x8d7   : > { %v6341_v36 = vpop.f32.mrf.mxu0 }
 0x8d8   : > { %v6396_v62 = vpop.f32.mrf.mxu1  ;;  %v6347_v58 = vadd.f32 %v6341_v36, %v6292_v52 }
 0x8d9   : > { %v10026_v2 = vpop.f32.mrf.mxu0 }
 0x8da   : > { %v10032_v5 = vpop.f32.mrf.mxu1  ;;  %v6402_v50 = vadd.f32 %v6396_v62, %v6347_v58  ;;  %v10336_v58 = vld [vmem:[%s12157_s6 + $0x88] sm:$0xff]  }
 0x8db   : > { %v6344_v63 = vpop.f32.mrf.mxu0 }
 0x8dc   : > { %v6399_v57 = vpop.f32.mrf.mxu1  ;;  %v6410_v56 = vadd.f32 %v8822_v4, %v6402_v50  ;;  %v10337_v4 = vld [vmem:[%s12157_s6 + $0x98] sm:$0xff]  }
 0x8dd   : > { %v10027_v37 = vpop.f32.mrf.mxu0 }
 0x8de   : > { %v10033_v25 = vpop.f32.mrf.mxu1  ;;  %v6411_v41 = vmax.f32 %v6410_v56, 0.0  ;;  %v10338_v56 = vld [vmem:[%s12157_s6 + $0x80] sm:$0xff]  }
 0x8e0   : > { %v6416_v38 = vmul.f32 %v8823_v35, %v6411_v41  ;;  %v10339_v35 = vld [vmem:[%s12157_s6 + $0x90] sm:$0xff]  }
 0x8e2   : > { %v6421_v42 = vadd.f32 %v8824_v6, %v6416_v38  ;;  %v10340_v6 = vld [vmem:[%s12157_s6 + $0xa8] sm:$0xff]   ;;  %v10341_v38 = vld [vmem:[%s12157_s6 + $0xb8] sm:$0xff]  }
 0x8e4   : > { %10035 = vmatpush3.msra.mxu0 %v6421_v42  ;;  %10040 = vmatpush3.msra.mxu1 %v6421_v42 }
 0x8e5   : > { %10037 = vmatmul.mubr.msk.f32.vlgmr.msra.gmra.mxu0 %vm6422_vm3, %v12231_v40  ;;  %10042 = vmatmul.mubr.msk.f32.vlgmr.msra.gmra.mxu1 %vm6422_vm3, %v12232_v27 }
 0x8e6   : > { %10044 = vmatprep.subr.bf16.mxu0 %v12223_v30  ;;  %10052 = vmatprep.subr.bf16.mxu1 %v12223_v30 }
 0x8e7   : > { %10045 = vmatpush3.bf16.msra.mxu0 %v10320_v32  ;;  %10053 = vmatpush3.bf16.msra.mxu1 %v10321_v3  ;;  %v10342_v3 = vld [vmem:[%s12157_s6 + $0xa0] sm:$0xff]  }
 0x8e8   : > { %10046 = vmatprep.subr.bf16.mxu0 %v12223_v30  ;;  %10054 = vmatprep.subr.bf16.mxu1 %v12223_v30 }
 0x8e9   : > { %10048 = vmatprep.mubr.msk.bf16.mxu0 %vm10408_vm2, %v12223_v30  ;;  %10056 = vmatprep.mubr.msk.bf16.mxu1 %vm10408_vm2, %v12223_v30 }
 0x8eb   : > { %10047 = vmatpush3.bf16.msra.mxu0 %v10322_v59  ;;  %10055 = vmatpush3.bf16.msra.mxu1 %v10323_v9  ;;  %v10343_v59 = vld [vmem:[%s12157_s6 + $0xb0] sm:$0xff]   ;;  %v7263_v9 = vld [vmem:[#allocation6 + $0xc] sm:$0xf] }
 0x8ec   : > { %10060 = vmatprep.subr.bf16.mxu0 %v12223_v30  ;;  %10068 = vmatprep.subr.bf16.mxu1 %v12223_v30  ;;  %v7264_v48 = vpack.c.bf16 %v7263_v9, %v7263_v9 }
 0x8ee   : > { %10049 = vmatmul.mubr.msk.bf16.vlgmr.msra.gmra.mxu0 %vm977_vm10, %v6580_v39  ;;  %10057 = vmatmul.mubr.msk.bf16.vlgmr.msra.gmra.mxu1 %vm977_vm10, %v6574_v60  ;;  %v10344_v39 = vld [vmem:[%s12157_s6 + $0xc8] sm:$0xff]   ;;  %v10345_v60 = vld [vmem:[%s12157_s6 + $0xd8] sm:$0xff]  }
 0x8ef   : > { %10061 = vmatpush3.bf16.msra.mxu0 %v10324_v11  ;;  %10069 = vmatpush3.bf16.msra.mxu1 %v10325_v22  ;;  %v10346_v22 = vld [vmem:[%s12157_s6 + $0xc0] sm:$0xff]  }
 0x8f0   : > { %10062 = vmatprep.subr.bf16.mxu0 %v12223_v30  ;;  %10070 = vmatprep.subr.bf16.mxu1 %v12223_v30 }
 0x8f1   : > { %10064 = vmatprep.mubr.msk.bf16.mxu0 %vm10408_vm2, %v12223_v30  ;;  %10072 = vmatprep.mubr.msk.bf16.mxu1 %vm10408_vm2, %v12223_v30 }
 0x8f3   : > { %10063 = vmatpush3.bf16.msra.mxu0 %v10326_v45  ;;  %10071 = vmatpush3.bf16.msra.mxu1 %v10327_v47  ;;  %v10347_v45 = vld [vmem:[%s12157_s6 + $0xd0] sm:$0xff]   ;;  %v7326_v47 = vld [vmem:[#allocation6 + $0xd] sm:$0xf] }
 0x8f4   : > { %10076 = vmatprep.subr.bf16.mxu0 %v12223_v30  ;;  %10084 = vmatprep.subr.bf16.mxu1 %v12223_v30 }
 0x8f6   : > { %10065 = vmatmul.mubr.msk.bf16.vlgmr.msra.gmra.mxu0 %vm977_vm10, %v6697_v12  ;;  %10073 = vmatmul.mubr.msk.bf16.vlgmr.msra.gmra.mxu1 %vm977_vm10, %v6760_v16  ;;  %v7327_v12 = vpack.c.bf16 %v7326_v47, %v7326_v47  ;;  %v10350_v16 = vld [vmem:[%s12157_s6 + $0xe0] sm:$0xff]  }
 0x8f7   : > { %10080 = vmatprep.mubr.msk.bf16.mxu0 %vm10408_vm2, %v12223_v30  ;;  %10077 = vmatpush3.bf16.msra.mxu0 %v10328_v43  ;;  %v10348_v43 = vld [vmem:[%s12157_s6 + $0xe8] sm:$0xff]  }
 0x8f8   : > { %10078 = vmatprep.subr.bf16.mxu0 %v12223_v30  ;;  %10085 = vmatpush3.bf16.msra.mxu1 %v10329_v0  ;;  %v10349_v0 = vld [vmem:[%s12157_s6 + $0xf8] sm:$0xff]  }
 0x8f9   : > { %10088 = vmatprep.mubr.msk.bf16.mxu1 %vm10408_vm2, %v12223_v30  ;;  %10086 = vmatprep.subr.bf16.mxu1 %v12223_v30 }
 0x8fb   : > { %10079 = vmatpush3.bf16.msra.mxu0 %v10330_v19  ;;  %v10351_v19 = vld [vmem:[%s12157_s6 + $0xf0] sm:$0xff]  }
 0x8fc   : > { %10092 = vmatprep.subr.bf16.mxu0 %v12223_v30  ;;  %10087 = vmatpush3.bf16.msra.mxu1 %v10331_v7  ;;  %v7452_v7 = vld [vmem:[#allocation6 + $0xf] sm:$0xf] }
 0x8fd   : > { %10100 = vmatprep.subr.bf16.mxu1 %v12223_v30 }
 0x9a5   : > { %v6491_v28 = vpop.f32.mrf.mxu0  ;;  %v6563_v26 = vpop.f32.mrf.mxu1 }
 0x9a6   : > { %v6567_v10 = vmax.f32 %v6491_v28, %v6563_v26  ;;  %v7515_v28 = vld [vmem:[#allocation6 + $0x10] sm:$0xf]  ;;  %v7453_v26 = vpack.c.bf16 %v7452_v7, %v7452_v7 }
 0x9a7   : > { %v10038_v8 = vpop.f32.mrf.mxu0  ;;  %v10043_v33 = vpop.f32.mrf.mxu1 }
 0x9a8   : > { %6572 = vst.msk [vmem:[#allocation6 + $0x8] sm:$0xf] %vm6570_vm4, %v6567_v10  ;;  %v7516_v10 = vpack.c.bf16 %v7515_v28, %v7515_v28 }
 0x9ae   : > { %v6635_v15 = vpop.f32.mrf.mxu0  ;;  %v6690_v44 = vpop.f32.mrf.mxu1 }
 0x9af   : > { %v6822_v29 = vld [vmem:[#allocation6 + $0x5] sm:$0xf]  ;;  %v6691_v17 = vadd.f32 %v6690_v44, %v6635_v15  ;;  %v7074_v25 = vld [vmem:[#allocation6 + $0x9] sm:$0xf] }
 0x9b0   : > { %v6885_v34 = vld [vmem:[#allocation6 + $0x6] sm:$0xf]  ;;  %v6823_v49 = vpack.c.bf16 %v6822_v29, %v6822_v29  ;;  %v10050_v1 = vpop.f32.mrf.mxu0  ;;  %v10058_v14 = vpop.f32.mrf.mxu1  ;;  %v7137_v41 = vld [vmem:[#allocation6 + $0xa] sm:$0xf]  ;;  %v7075_v42 = vpack.c.bf16 %v7074_v25, %v7074_v25 }
 0x9b1   : > { %v6886_v23 = vpack.c.bf16 %v6885_v34, %v6885_v34  ;;  %v6948_v52 = vld [vmem:[#allocation6 + $0x7] sm:$0xf]  ;;  %v7138_v32 = vpack.c.bf16 %v7137_v41, %v7137_v41  ;;  %v7200_v53 = vld [vmem:[#allocation6 + $0xb] sm:$0xf] }
 0x9b2   : > { %10081 = vmatmul.mubr.msk.bf16.vlgmr.msra.gmra.mxu0 %vm977_vm10, %v6823_v49  ;;  %v6638_v31 = vpop.f32.mrf.mxu0  ;;  %v6693_v18 = vpop.f32.mrf.mxu1  ;;  %v7011_v36 = vld [vmem:[#allocation6 + $0x8] sm:$0xf]  ;;  %v6949_v5 = vpack.c.bf16 %v6948_v52, %v6948_v52  ;;  %v7201_v11 = vpack.c.bf16 %v7200_v53, %v7200_v53 }
 0x9b3   : > { %10089 = vmatmul.mubr.msk.bf16.vlgmr.msra.gmra.mxu1 %vm977_vm10, %v6886_v23  ;;  %10093 = vmatpush3.bf16.msra.mxu0 %v10332_v20  ;;  %v7012_v50 = vpack.c.bf16 %v7011_v36, %v7011_v36 }
 0x9b4   : > { %10101 = vmatpush3.bf16.msra.mxu1 %v10333_v46  ;;  %10094 = vmatprep.subr.bf16.mxu0 %v12223_v30  ;;  %v10051_v55 = vpop.f32.mrf.mxu0  ;;  %v10059_v13 = vpop.f32.mrf.mxu1 }
 0x9b5   : > { %10102 = vmatprep.subr.bf16.mxu1 %v12223_v30  ;;  %10096 = vmatprep.mubr.msk.bf16.mxu0 %vm10408_vm2, %v12223_v30 }
 0x9b6   : > { %10104 = vmatprep.mubr.msk.bf16.mxu1 %vm10408_vm2, %v12223_v30  ;;  %v6752_v62 = vpop.f32.mrf.mxu0  ;;  %v6815_v8 = vpop.f32.mrf.mxu1 }
 0x9b7   : > { %10095 = vmatpush3.bf16.msra.mxu0 %v10334_v54  ;;  %v11918_v2 = vadd.f32 %v6752_v62, %v6691_v17 }
 0x9b8   : > { %10103 = vmatpush3.bf16.msra.mxu1 %v10335_v61  ;;  %10108 = vmatprep.subr.bf16.mxu0 %v12223_v30  ;;  %v10066_v63 = vpop.f32.mrf.mxu0  ;;  %v10074_v20 = vpop.f32.mrf.mxu1 }
 0x9b9   : > { %10116 = vmatprep.subr.bf16.mxu1 %v12223_v30  ;;  %v6821_v33 = vadd.f32 %v6815_v8, %v11918_v2 }
 0x9ba   : > { %10097 = vmatmul.mubr.msk.bf16.vlgmr.msra.gmra.mxu0 %vm977_vm10, %v6949_v5  ;;  %v6755_v57 = vpop.f32.mrf.mxu0  ;;  %v6818_v15 = vpop.f32.mrf.mxu1 }
 0x9bb   : > { %10105 = vmatmul.mubr.msk.bf16.vlgmr.msra.gmra.mxu1 %vm977_vm10, %v7012_v50  ;;  %10109 = vmatpush3.bf16.msra.mxu0 %v10336_v58 }
 0x9bc   : > { %10117 = vmatpush3.bf16.msra.mxu1 %v10337_v4  ;;  %10110 = vmatprep.subr.bf16.mxu0 %v12223_v30  ;;  %v10067_v37 = vpop.f32.mrf.mxu0  ;;  %v10075_v44 = vpop.f32.mrf.mxu1 }
 0x9bd   : > { %10118 = vmatprep.subr.bf16.mxu1 %v12223_v30  ;;  %10112 = vmatprep.mubr.msk.bf16.mxu0 %vm10408_vm2, %v12223_v30 }
 0x9be   : > { %10120 = vmatprep.mubr.msk.bf16.mxu1 %vm10408_vm2, %v12223_v30 }
 0x9bf   : > { %10111 = vmatpush3.bf16.msra.mxu0 %v10338_v56 }
 0x9c0   : > { %10119 = vmatpush3.bf16.msra.mxu1 %v10339_v35  ;;  %10124 = vmatprep.subr.bf16.mxu0 %v12223_v30 }
 0x9c1   : > { %10132 = vmatprep.subr.bf16.mxu1 %v12223_v30 }
 0x9c2   : > { %10113 = vmatmul.mubr.msk.bf16.vlgmr.msra.gmra.mxu0 %vm977_vm10, %v7075_v42 }
 0x9c3   : > { %10121 = vmatmul.mubr.msk.bf16.vlgmr.msra.gmra.mxu1 %vm977_vm10, %v7138_v32  ;;  %10125 = vmatpush3.bf16.msra.mxu0 %v10340_v6 }
 0x9c4   : > { %10133 = vmatpush3.bf16.msra.mxu1 %v10341_v38  ;;  %10126 = vmatprep.subr.bf16.mxu0 %v12223_v30 }
 0x9c5   : > { %10134 = vmatprep.subr.bf16.mxu1 %v12223_v30  ;;  %10128 = vmatprep.mubr.msk.bf16.mxu0 %vm10408_vm2, %v12223_v30 }
 0x9c6   : > { %10136 = vmatprep.mubr.msk.bf16.mxu1 %vm10408_vm2, %v12223_v30 }
 0x9c7   : > { %10127 = vmatpush3.bf16.msra.mxu0 %v10342_v3 }
 0x9c8   : > { %10135 = vmatpush3.bf16.msra.mxu1 %v10343_v59  ;;  %10140 = vmatprep.subr.bf16.mxu0 %v12223_v30 }
 0x9c9   : > { %10148 = vmatprep.subr.bf16.mxu1 %v12223_v30 }
 0x9ca   : > { %10129 = vmatmul.mubr.msk.bf16.vlgmr.msra.gmra.mxu0 %vm977_vm10, %v7201_v11 }
 0x9cb   : > { %10137 = vmatmul.mubr.msk.bf16.vlgmr.msra.gmra.mxu1 %vm977_vm10, %v7264_v48  ;;  %10141 = vmatpush3.bf16.msra.mxu0 %v10344_v39 }
 0x9cc   : > { %10149 = vmatpush3.bf16.msra.mxu1 %v10345_v60  ;;  %10142 = vmatprep.subr.bf16.mxu0 %v12223_v30 }
 0x9cd   : > { %10150 = vmatprep.subr.bf16.mxu1 %v12223_v30  ;;  %10144 = vmatprep.mubr.msk.bf16.mxu0 %vm10408_vm2, %v12223_v30 }
 0x9ce   : > { %10152 = vmatprep.mubr.msk.bf16.mxu1 %vm10408_vm2, %v12223_v30 }
 0x9cf   : > { %10143 = vmatpush3.bf16.msra.mxu0 %v10346_v22 }
 0x9d0   : > { %10151 = vmatpush3.bf16.msra.mxu1 %v10347_v45  ;;  %10156 = vmatprep.subr.bf16.mxu0 %v12223_v30 }
 0x9d1   : > { %10164 = vmatprep.subr.bf16.mxu1 %v12223_v30 }
 0x9d2   : > { %10145 = vmatmul.mubr.msk.bf16.vlgmr.msra.gmra.mxu0 %vm977_vm10, %v7327_v12 }
 0x9d3   : > { %10153 = vmatmul.mubr.msk.bf16.vlgmr.msra.gmra.mxu1 %vm977_vm10, %v7390_v51  ;;  %10157 = vmatpush3.bf16.msra.mxu0 %v10348_v43 }
 0x9d4   : > { %10165 = vmatpush3.bf16.msra.mxu1 %v10349_v0  ;;  %10158 = vmatprep.subr.bf16.mxu0 %v12223_v30 }
 0x9d5   : > { %10166 = vmatprep.subr.bf16.mxu1 %v12223_v30  ;;  %10160 = vmatprep.mubr.msk.bf16.mxu0 %vm10408_vm2, %v12223_v30 }
 0x9d6   : > { %10168 = vmatprep.mubr.msk.bf16.mxu1 %vm10408_vm2, %v12223_v30 }
 0x9d7   : > { %10159 = vmatpush3.bf16.msra.mxu0 %v10350_v16 }
 0x9d8   : > { %10167 = vmatpush3.bf16.msra.mxu1 %v10351_v19  ;;  %10172 = vmatprep.subr.mxu0 %v12223_v30 }
 0x9d9   : > { %10177 = vmatprep.subr.mxu1 %v12223_v30 }
 0x9da   : > { %10161 = vmatmul.mubr.msk.bf16.vlgmr.msra.gmra.mxu0 %vm977_vm10, %v7453_v26  ;;  %v8935_v26 = vld [vmem:[%s12160_s9 + $0x5] ss:$0 sm:$0xff] }
 0x9db   : > { %10169 = vmatmul.mubr.msk.bf16.vlgmr.msra.gmra.mxu1 %vm977_vm10, %v7516_v10  ;;  %10174 = vmatprep.mubr.msk.f32.mxu0 %vm10408_vm2, %v12223_v30 }
 0x9dc   : > { %10179 = vmatprep.mubr.msk.f32.mxu1 %vm10408_vm2, %v12223_v30 }
 0xa72   : > { %v6878_v29 = vpop.f32.mrf.mxu0 }
 0xa73   : > { %v6941_v34 = vpop.f32.mrf.mxu1  ;;  %v6884_v55 = vadd.f32 %v6878_v29, %v6821_v33  ;;  %v8936_v29 = vld [vmem:[%s12161_s10 + $0x5] ss:$0 sm:$0xff] }
 0xa74   : > { %v10082_v46 = vpop.f32.mrf.mxu0 }
 0xa75   : > { %v10090_v17 = vpop.f32.mrf.mxu1  ;;  %v6947_v58 = vadd.f32 %v6941_v34, %v6884_v55 }
 0xa76   : > { %v6881_v49 = vpop.f32.mrf.mxu0 }
 0xa77   : > { %v6944_v23 = vpop.f32.mrf.mxu1  ;;  %v8937_v49 = vld [vmem:[%s12162_s11 + $0x5] ss:$0 sm:$0xff] }
 0xa78   : > { %v10083_v1 = vpop.f32.mrf.mxu0 }
 0xa79   : > { %v10091_v14 = vpop.f32.mrf.mxu1 }
 0xa7a   : > { %v7004_v31 = vpop.f32.mrf.mxu0 }
 0xa7b   : > { %v7067_v18 = vpop.f32.mrf.mxu1  ;;  %v7010_v5 = vadd.f32 %v7004_v31, %v6947_v58  ;;  %v10359_v58 = vld [vmem:[%s12158_s7 + $0x98] ss:$12 sps:$4 sm:$0xff]  }
 0xa7c   : > { %v10098_v54 = vpop.f32.mrf.mxu0 }
 0xa7d   : > { %v10106_v61 = vpop.f32.mrf.mxu1  ;;  %v7073_v35 = vadd.f32 %v7067_v18, %v7010_v5  ;;  %v8942_v18 = vsel %vm7747_vm8, 1.0, %v12223_v30  ;;  %v10354_v54 = vld [vmem:[%s12158_s7 + $0xac] ss:$12 sps:$4 sm:$0xff]  }
 0xa7e   : > { %v7007_v13 = vpop.f32.mrf.mxu0  ;;  %v10363_v5 = vld [vmem:[%s12158_s7 + $0x80] ss:$12 sps:$4 sm:$0xff]  }
 0xa7f   : > { %v7070_v52 = vpop.f32.mrf.mxu1  ;;  %v10352_v13 = vld [vmem:[%s12158_s7 + $0xa8] ss:$12 sps:$4 sm:$0xff]  }
 0xa80   : > { %v10099_v36 = vpop.f32.mrf.mxu0  ;;  %v10355_v52 = vld [vmem:[%s12158_s7 + $0xb0] ss:$12 sps:$4 sm:$0xff]  }
 0xa81   : > { %v10107_v62 = vpop.f32.mrf.mxu1  ;;  %v10358_v36 = vld [vmem:[%s12158_s7 + $0x94] ss:$12 sps:$4 sm:$0xff]  }
 0xa82   : > { %v7130_v4 = vpop.f32.mrf.mxu0  ;;  %v10356_v62 = vld [vmem:[%s12158_s7 + $0x90] ss:$12 sps:$4 sm:$0xff]  }
 0xa83   : > { %v7193_v2 = vpop.f32.mrf.mxu1  ;;  %v7136_v41 = vadd.f32 %v7130_v4, %v7073_v35  ;;  %v10362_v4 = vld [vmem:[%s12158_s7 + $0x7c] ss:$12 sps:$4 sm:$0xff]   ;;  %v10409_v35 = vmov 0  }
 0xa84   : > { %v10114_v50 = vpop.f32.mrf.mxu0 }
 0xa85   : > { %v10122_v63 = vpop.f32.mrf.mxu1  ;;  %v7199_v3 = vadd.f32 %v7193_v2, %v7136_v41  ;;  %v10360_v2 = vld [vmem:[%s12158_s7 + $0x78] ss:$12 sps:$4 sm:$0xff]   ;;  %v10371_v41 = vld [vmem:[%s12158_s7 + $0x50] ss:$12 sps:$4 sm:$0xff]  }
 0xa86   : > { %v7133_v57 = vpop.f32.mrf.mxu0  ;;  %v10366_v50 = vld [vmem:[%s12158_s7 + $0x64] ss:$12 sps:$4 sm:$0xff]   ;;  %v10364_v63 = vld [vmem:[%s12158_s7 + $0x60] ss:$12 sps:$4 sm:$0xff]  }
 0xa87   : > { %v7196_v56 = vpop.f32.mrf.mxu1  ;;  %v10367_v57 = vld [vmem:[%s12158_s7 + $0x68] ss:$12 sps:$4 sm:$0xff]  }
 0xa88   : > { %v10115_v37 = vpop.f32.mrf.mxu0  ;;  %v10370_v56 = vld [vmem:[%s12158_s7 + $0x4c] ss:$12 sps:$4 sm:$0xff]  }
 0xa89   : > { %v10123_v25 = vpop.f32.mrf.mxu1 }
 0xa8a   : > { %v7256_v6 = vpop.f32.mrf.mxu0  ;;  %v10368_v25 = vld [vmem:[%s12158_s7 + $0x48] ss:$12 sps:$4 sm:$0xff]  }
 0xa8b   : > { %v7319_v38 = vpop.f32.mrf.mxu1  ;;  %v7262_v53 = vadd.f32 %v7256_v6, %v7199_v3 }
 0xa8c   : > { %v10130_v42 = vpop.f32.mrf.mxu0 }
 0xa8d   : > { %v10138_v32 = vpop.f32.mrf.mxu1  ;;  %v7325_v22 = vadd.f32 %v7319_v38, %v7262_v53  ;;  %v10374_v42 = vld [vmem:[%s12158_s7 + $0x34] ss:$12 sps:$4 sm:$0xff]   ;;  %v10378_v53 = vld [vmem:[%s12158_s7 + $0x1c] ss:$12 sps:$4 sm:$0xff]  }
 0xa8e   : > { %v7259_v59 = vpop.f32.mrf.mxu0 }
 0xa8f   : > { %v7322_v9 = vpop.f32.mrf.mxu1  ;;  %v10372_v59 = vld [vmem:[%s12158_s7 + $0x30] ss:$12 sps:$4 sm:$0xff]  }
 0xa90   : > { %v10131_v48 = vpop.f32.mrf.mxu0  ;;  %v10375_v9 = vld [vmem:[%s12158_s7 + $0x38] ss:$12 sps:$4 sm:$0xff]  }
 0xa91   : > { %v10139_v39 = vpop.f32.mrf.mxu1  ;;  %v10376_v48 = vld [vmem:[%s12158_s7 + $0x18] ss:$12 sps:$4 sm:$0xff]  }
 0xa92   : > { %v7382_v60 = vpop.f32.mrf.mxu0  ;;  %v10379_v39 = vld [vmem:[%s12158_s7 + $0x20] ss:$12 sps:$4 sm:$0xff]  }
 0xa93   : > { %v7445_v11 = vpop.f32.mrf.mxu1  ;;  %v7388_v21 = vadd.f32 %v7382_v60, %v7325_v22  ;;  %v10382_v60 = vld [vmem:[%s12158_s7 + $0x4] ss:$12 sps:$4 sm:$0xff]   ;;  %v10383_v22 = vld [vmem:[%s12158_s7 + $0x8] ss:$12 sps:$4 sm:$0xff]  }
 0xa94   : > { %v10146_v45 = vpop.f32.mrf.mxu0 }
 0xa95   : > { %v10154_v47 = vpop.f32.mrf.mxu1  ;;  %v7451_v16 = vadd.f32 %v7445_v11, %v7388_v21  ;;  %v10380_v11 = vld [vmem:[%s12158_s7] ss:$12 sps:$4 sm:$0xff]  }
 0xa96   : > { %v7385_v12 = vpop.f32.mrf.mxu0 }
 0xa97   : > { %v7448_v51 = vpop.f32.mrf.mxu1 }
 0xa98   : > { %v10147_v43 = vpop.f32.mrf.mxu0 }
 0xa99   : > { %v10155_v0 = vpop.f32.mrf.mxu1 }
 0xa9a   : > { %v7508_v19 = vpop.f32.mrf.mxu0 }
 0xa9b   : > { %v7571_v7 = vpop.f32.mrf.mxu1  ;;  %v7514_v28 = vadd.f32 %v7508_v19, %v7451_v16 }
 0xa9c   : > { %v10162_v10 = vpop.f32.mrf.mxu0 }
 0xa9d   : > { %v10170_v8 = vpop.f32.mrf.mxu1  ;;  %v7577_v33 = vadd.f32 %v7571_v7, %v7514_v28  ;;  %v12233_v7 = vld [vmem:[#allocation7_spill] sm:$0xff] }
 0xa9e   : > { %v7511_v20 = vpop.f32.mrf.mxu0  ;;  %v8238_v28 = vsub.s32 0, %v12233_v7  ;;  %v8242_v10 = vsub.s32 1, %v12233_v7 }
 0xa9f   : > { %v7574_v15 = vpop.f32.mrf.mxu1  ;;  %v7585_v44 = vadd.f32 %v8935_v26, %v7577_v33  ;;  %v8246_v26 = vsub.s32 2, %v12233_v7 }
 0xaa0   : > { %v10163_v34 = vpop.f32.mrf.mxu0 }
 0xaa1   : > { %v10171_v46 = vpop.f32.mrf.mxu1  ;;  %v7586_v17 = vmax.f32 %v7585_v44, 0.0 }
 0xaa3   : > { %v7591_v23 = vmul.f32 %v8936_v29, %v7586_v17 }
 0xaa5   : > { %v7596_v1 = vadd.f32 %v8937_v49, %v7591_v23 }
 0xaa7   : > { %10173 = vmatpush3.msk.msra.mxu0 %vm7600_vm5, %v7596_v1  ;;  %10178 = vmatpush3.msk.msra.mxu1 %vm7600_vm5, %v7596_v1 }
 0xaa8   : > { %10175 = vmatmul.mubr.msk.f32.vlgmr.msra.gmra.mxu0 %vm7597_vm6, %v12231_v40  ;;  %10180 = vmatmul.mubr.msk.f32.vlgmr.msra.gmra.mxu1 %vm7597_vm6, %v12232_v27  ;;  %v8945_v27 = vsel %vm7828_vm7, 1.0, %v12223_v30 }
 0xaa9   : > { %10187 = vmatprep.subr.mxu1 %v12223_v30  ;;  %10189 = vmatprep.mubr.msk.f32.mxu1 %vm10408_vm2, %v12223_v30 }
 0xaaa   : > { %10182 = vmatprep.subr.mxu0 %v12223_v30  ;;  %10184 = vmatprep.mubr.msk.f32.mxu0 %vm10408_vm2, %v12223_v30 }
 0xb68   : > { %v7670_v14 = vpop.f32.mrf.mxu0  ;;  %v7742_v31 = vpop.f32.mrf.mxu1 }
 0xb69   : > { %v7746_v40 = vmax.f32 %v7670_v14, %v7742_v31 }
 0xb6a   : > { %v10176_v61 = vpop.f32.mrf.mxu0  ;;  %v10181_v55 = vpop.f32.mrf.mxu1 }
 0xb6b   : > { %10188 = vmatpush3.msk.msra.mxu1 %vm7754_vm11, %v7746_v40  ;;  %10183 = vmatpush3.msk.msra.mxu0 %vm7754_vm11, %v7746_v40 }
 0xb6c   : > { %10190 = vmatmul.mubr.msk.f32.vlgmr.msra.gmra.mxu1 %vm7750_vm12, %v8945_v27  ;;  %10185 = vmatmul.mubr.msk.f32.vlgmr.msra.gmra.mxu0 %vm7750_vm12, %v8942_v18 }
 0xb6d   : > { %8013 = vmatprep.subr.bf16.mxu0 %v10354_v54  ;;  %10192 = vmatprep.subr.bf16.mxu1 %v12223_v30 }
 0xb6e   : > { %8014 = vmatpush1.bf16.msra.mxu0 %v10352_v13  ;;  %10193 = vmatpush3.bf16.msra.mxu1 %v10355_v52 }
 0xb6f   : > { %8015 = vmatprep.subr.bf16.mxu0 %v10358_v36  ;;  %10194 = vmatprep.subr.bf16.mxu1 %v12223_v30 }
 0xb70   : > { %10200 = vmatprep.mubr.msk.bf16.mxu1 %vm10408_vm2, %v12223_v30  ;;  %8037 = vmatprep.mubr.bf16.mxu0 %v10409_v35 }
 0xb72   : > { %8016 = vmatpush1.bf16.msra.mxu0 %v10356_v62  ;;  %10195 = vmatpush3.bf16.msra.mxu1 %v10359_v58 }
 0xb73   : > { %8017 = vmatprep.subr.bf16.mxu0 %v10362_v4  ;;  %10196 = vmatprep.subr.bf16.mxu1 %v12223_v30 }
 0xb76   : > { %8018 = vmatpush1.bf16.msra.mxu0 %v10360_v2  ;;  %10197 = vmatpush3.bf16.msra.mxu1 %v10363_v5  ;;  %v8273_v2 = vadd.s32 256, %v12225_v24 }
 0xb77   : > { %8019 = vmatprep.subr.bf16.mxu0 %v10366_v50  ;;  %10198 = vmatprep.subr.bf16.mxu1 %v12223_v30 }
 0xb78   : > { %vm8279_vm13 = vcmp.lt.s32.totalorder %v8273_v2, 308 }
 0xb7a   : > { %8020 = vmatpush1.bf16.msra.mxu0 %v10364_v63  ;;  %10199 = vmatpush3.bf16.msra.mxu1 %v10367_v57 }
 0xb7b   : > { %10204 = vmatprep.subr.bf16.mxu1 %v12223_v30  ;;  %8161 = vmatprep.subr.bf16.mxu0 %v10370_v56 }
 0xc2c   : > { %v7900_v37 = vpop.f32.mrf.mxu1  ;;  %v7824_v6 = vpop.f32.mrf.mxu0 }
 0xc2d   : > { %v7921_v38 = vpack.c.bf16 %v7900_v37, %v7900_v37  ;;  %v7904_v45 = vpack.c.bf16 %v7824_v6, %v7824_v6 }
 0xc2e   : > { %v10191_v32 = vpop.f32.mrf.mxu1  ;;  %v10186_v3 = vpop.f32.mrf.mxu0 }
 0xc2f   : > { %8960 = vmatmul.mubr.msk.bf16.vlgmr.msra.gmra.mxu0 %vm506_vm0, %v7921_v38  ;;  %10201 = vmatmul.mubr.msk.bf16.vlgmr.msra.gmra.mxu1 %vm506_vm0, %v7921_v38  ;;  %v8272_v38 = vadd.s32 128, %v12225_v24 }
 0xc30   : > { %8162 = vmatpush1.bf16.msra.mxu0 %v10368_v25  ;;  %10205 = vmatpush3.bf16.msra.mxu1 %v10371_v41 }
 0xc31   : > { %8163 = vmatprep.subr.bf16.mxu0 %v10374_v42  ;;  %10206 = vmatprep.subr.bf16.mxu1 %v12223_v30 }
 0xc32   : > { %8185 = vmatprep.mubr.bf16.mxu0 %v10409_v35  ;;  %10212 = vmatprep.mubr.msk.bf16.mxu1 %vm10408_vm2, %v12223_v30 }
 0xc34   : > { %8164 = vmatpush1.bf16.msra.mxu0 %v10372_v59  ;;  %10207 = vmatpush3.bf16.msra.mxu1 %v10375_v9 }
 0xc35   : > { %8165 = vmatprep.subr.bf16.mxu0 %v10378_v53  ;;  %10208 = vmatprep.subr.bf16.mxu1 %v12223_v30 }
 0xc38   : > { %8166 = vmatpush1.bf16.msra.mxu0 %v10376_v48  ;;  %10209 = vmatpush3.bf16.msra.mxu1 %v10379_v39 }
 0xc39   : > { %8167 = vmatprep.subr.bf16.mxu0 %v10382_v60  ;;  %10210 = vmatprep.subr.bf16.mxu1 %v12223_v30  ;;  %v8234_v30 = vld [vmem:[%s12159_s8] sm:$0x7] }
 0xc3a   : > { %v8239_v8 = vrot.slane %v8234_v30, %v8238_v28  ;;  %v8247_v33 = vrot.slane %v8234_v30, %v8246_v26  ;;  %v8243_v34 = vrot.slane %v8234_v30, %v8242_v10 }
 0xc3c   : > { %8168 = vmatpush1.bf16.msra.mxu0 %v10380_v11  ;;  %10211 = vmatpush3.bf16.msra.mxu1 %v10383_v22 }
 0xc3f   : > { %8974 = vmatmul.mubr.msk.bf16.vlgmr.msra.gmra.mxu0 %vm506_vm0, %v7904_v45  ;;  %10213 = vmatmul.mubr.msk.bf16.vlgmr.msra.gmra.mxu1 %vm506_vm0, %v7904_v45  ;;  %vm8274_vm0 = vcmp.ge.s32.totalorder %v12225_v24, 39 }
 0xcef   : > { %v8039_v47 = vpop.f32.mrf.mxu0  ;;  %v8080_v21 = vpop.f32.mrf.mxu1 }
 0xcf1   : > { %v8041_v12 = vpop.f32.mrf.mxu0  ;;  %v10202_v51 = vpop.f32.mrf.mxu1 }
 0xcf3   : > { %v8043_v43 = vpop.f32.mrf.mxu0  ;;  %v8083_v0 = vpop.f32.mrf.mxu1 }
 0xcf5   : > { %v8044_v16 = vpop.f32.mrf.mxu0  ;;  %v10203_v19 = vpop.f32.mrf.mxu1 }
 0xcff   : > { %v8187_v20 = vpop.f32.mrf.mxu0  ;;  %v8228_v15 = vpop.f32.mrf.mxu1 }
 0xd00   : > { %v8188_v44 = vadd.f32 %v8187_v20, %v8039_v47  ;;  %v8229_v29 = vadd.f32 %v8228_v15, %v8080_v21 }
 0xd01   : > { %v8189_v46 = vpop.f32.mrf.mxu0  ;;  %v10214_v17 = vpop.f32.mrf.mxu1 }
 0xd02   : > { %v8251_v49 = vadd.f32 %v8239_v8, %v8188_v44  ;;  %v8253_v23 = vadd.f32 %v8247_v33, %v8229_v29  ;;  %v8190_v1 = vadd.f32 %v8189_v46, %v8041_v12 }
 0xd03   : > { %v8191_v14 = vpop.f32.mrf.mxu0  ;;  %v8231_v31 = vpop.f32.mrf.mxu1 }
 0xd04   : > { %v8976_v40 = vmul.f32 -1.442695, %v8251_v49  ;;  %v8978_v27 = vmul.f32 -1.442695, %v8253_v23  ;;  %v8252_v18 = vadd.f32 %v8243_v34, %v8190_v1 }
 0xd05   : > { %v8192_v54 = vpop.f32.mrf.mxu0  ;;  %v10215_v61 = vpop.f32.mrf.mxu1 }
 0xd06   : > { %10384 = vpow2.f32 %v8976_v40  ;;  %v8977_v55 = vmul.f32 -1.442695, %v8252_v18 }
 0xd07   : > { %10386 = vpow2.f32 %v8978_v27 }
 0xd08   : > { %10388 = vpow2.f32 %v8977_v55 }
 0xd13   : > { %v10385_v13 = vpop.eup %10384 }
 0xd14   : > { %v10387_v52 = vpop.eup %10386  ;;  %v8263_v36 = vadd.f32 1.0, %v10385_v13 }
 0xd15   : > { %v10389_v62 = vpop.eup %10388  ;;  %v8265_v58 = vadd.f32 1.0, %v10387_v52 }
 0xd16   : > { %10390 = vrcp.f32 %v8263_v36  ;;  %v8264_v4 = vadd.f32 1.0, %v10389_v62 }
 0xd17   : > { %10392 = vrcp.f32 %v8265_v58 }
 0xd18   : > { %10394 = vrcp.f32 %v8264_v4 }
 0xd23   : > { %v10391_v5 = vpop.eup %10390 }
 0xd24   : > { %v10393_v50 = vpop.eup %10392  ;;  %v8283_v63 = vsel %vm8274_vm0, %v10391_v5, -inf }
 0xd25   : > { %v10395_v57 = vpop.eup %10394  ;;  %v8285_v56 = vsel %vm8279_vm13, %v10393_v50, -inf  ;;  %v8287_v35 = vsel %vm8286_vm14, %v8283_v63, -inf }
 0xd26   : > { %v8288_v37 = vsel %vm8286_vm14, %v10395_v57, -inf  ;;  %v8290_v41 = vsel %vm8289_vm15, %v8285_v56, -inf }
 0xd27   : > { %v8291_v25 = vmax.f32 %v8287_v35, %v8288_v37 }
 0xd29   : > { %v8292_v6 = vmax.f32 %v8291_v25, %v8290_v41 }
 0xd2b   : > { %8293 = vmax.xlane.f32.xlu0 %v8292_v6 }
 0xdb4   : > { %v8294_v42 = vpop.xlane.xlu0 %8293 }
 0xdb5   : > { %vm8295_vm9 = vcmp.eq.f32.partialorder %v8283_v63, %v8294_v42  ;;  %vm8296_vm10 = vcmp.eq.f32.partialorder %v10395_v57, %v8294_v42  ;;  %vm8297_vm1 = vcmp.eq.f32.partialorder %v8285_v56, %v8294_v42  ;;  %v8329_v20 = vsel %vm7828_vm7, %v8294_v42, 0.0 }
 0xdb6   : > { %v8298_v32 = vsel %vm8295_vm9, %v12225_v24, 1073741824  ;;  %v8299_v3 = vsel %vm8296_vm10, %v8272_v38, 1073741824  ;;  %v8300_v59 = vsel %vm8297_vm1, %v8273_v2, 1073741824 }
 0xdb7   : > { %v8301_v9 = vsel %vm8286_vm14, %v8298_v32, 2147483647  ;;  %v8302_v53 = vsel %vm8286_vm14, %v8299_v3, 2147483647  ;;  %v8303_v48 = vsel %vm8289_vm15, %v8300_v59, 2147483647 }
 0xdb8   : > { %vm8304_vm2 = vcmp.lt.s32.totalorder %v8301_v9, %v8302_v53 }
 0xdb9   : > { %v8305_v39 = vsel %vm8304_vm2, %v8301_v9, %v8302_v53 }
 0xdba   : > { %vm8306_vm3 = vcmp.lt.s32.totalorder %v8305_v39, %v8303_v48 }
 0xdbb   : > { %v8307_v60 = vsel %vm8306_vm3, %v8305_v39, %v8303_v48 }
 0xdbc   : > { %v8309_v11 = vshra.s32 %v8307_v60, 16  ;;  %v8308_v45 = vand.u32 65535, %v8307_v60 }
 0xdbe   : > { %v8311_v22 = vcvt.s32.f32 %v8309_v11  ;;  %v8310_v21 = vcvt.s32.f32 %v8308_v45 }
 0xdc0   : > { %8312 = vmin.xlane.f32.xlu0 %v8311_v22 }
 0xe49   : > { %v8313_v47 = vpop.xlane.xlu0 %8312 }
 0xe4a   : > { %vm8314_vm4 = vcmp.eq.f32.partialorder %v8311_v22, %v8313_v47  ;;  %v8319_v51 = vcvt.f32.s32 %v8313_v47 }
 0xe4b   : > { %v8315_v12 = vsel %vm8314_vm4, %v8310_v21, inf }
 0xe4c   : > { %8316 = vmin.xlane.f32.xlu1 %v8315_v12  ;;  %v8320_v0 = vshll.u32 %v8319_v51, 16 }
 0xed5   : > { %v8317_v43 = vpop.xlane.xlu1 %8316 }
 0xed6   : > { %v8318_v16 = vcvt.f32.s32 %v8317_v43 }
 0xed8   : > { %v8321_v19 = vadd.s32 %v8320_v0, %v8318_v16 }
 0xeda   : > { %v8322_v7 = vcvt.s32.f32 %v8321_v19 }
 0xedc   : > { %v8323_v28 = vmul.f32 20.0, %v8322_v7 }
 0xede   : > { %v8324_v26 = vadd.f32 1997.3794, %v8323_v28 }
 0xee0   : > { %v8325_v30 = vmul.f32 0.0005776227, %v8324_v26 }
 0xee2   : > { %v8326_v10 = vmul.f32 1.442695, %v8325_v30 }
 0xee4   : > { %10396 = vpow2.f32 %v8326_v10 }
 0xef1   : > { %v10397_v8 = vpop.eup %10396 }
 0xef2   : > { %v8328_v33 = vmul.f32 10.0, %v10397_v8 }
 0xef4   : > { %v8330_v15 = vsel %vm7747_vm8, %v8328_v33, %v8329_v20 }
 0xef5   : > { %8331 = vst [vmem:[%s409_s27] sm:$0x1] %v8330_v15 }
 0xef6 PF: > { %s22_s21 = sadd.s32 1, %s10404_s21  }
 0xef7   : > { %p19_p4 = scmp.ge.s32.totalorder %s22_s21, 13  }
 0xef9   :  { %21 = sbr.rel (!%p19_p4) target bundleno = 1 (0x1), region = 173 }

</bundles_post_ra>
